<compile_context>
chip_gen: v6e
topology: v6e:2x2x1
jax: 0.10.0
libtpu: 0.0.40
codegen_flags: <defaults>
</compile_context>

<pallas_src>
import jax
import jax.numpy as jnp
from jax.experimental import pallas as pl
from jax.experimental.pallas import tpu as pltpu


# ----------------------------------------------------------------------------
# Fused bidirectional-GRU encoder kernel (single invocation, no grid)
# ----------------------------------------------------------------------------
def _bigru_encoder_kernel(x_ref, lens_ref, h0_ref, wih_ref, whh_f_ref,
                          whh_b_ref, bih_ref, bhh_ref, out_ref, hn_ref, gi_ref):
    S, B, H = x_ref.shape
    H3 = 3 * H

    # ---- Hoisted input projection: one (S*B, H) x (H, 6H) MXU push covering
    # every timestep and BOTH directions, input bias folded in, -> VMEM scratch.
    xf = x_ref[...].reshape(S * B, H).astype(jnp.bfloat16)
    gi_ref[...] = (jnp.dot(xf, wih_ref[...], preferred_element_type=jnp.float32)
                   + bih_ref[...])                          # (S*B, 6H) f32

    # ---- Loop-invariant small values hoisted exactly once (JAX does not CSE
    # broadcast_in_dim, so these must not be re-emitted inside the unrolled body).
    lens = lens_ref[...]                                    # (B, H) int32
    bhh_f = jnp.broadcast_to(bhh_ref[0], (B, H3))           # (B, 3H) f32
    bhh_b = jnp.broadcast_to(bhh_ref[1], (B, H3))           # (B, 3H) f32

    def gru_step(gi_t, h, whh_ref_d, bhh_d):
        # Whh is read at the use site (not hoisted) to keep vreg pressure low.
        # b_hn stays inside the r * (W_hn h + b_hn) term (nn.GRU formula).
        gh = jnp.dot(h.astype(jnp.bfloat16), whh_ref_d[...],
                     preferred_element_type=jnp.float32) + bhh_d      # (B, 3H)
        r = jax.nn.sigmoid(gi_t[:, :H] + gh[:, :H])
        z = jax.nn.sigmoid(gi_t[:, H:2 * H] + gh[:, H:2 * H])
        n = jnp.tanh(gi_t[:, 2 * H:] + r * gh[:, 2 * H:])
        return (1.0 - z) * n + z * h                                   # (B, H)

    h_f = h0_ref[0]                                          # (B, H) f32
    h_b = h0_ref[1]

    # ---- Fully unrolled, fully static time loop. The forward step at time t
    # and the backward step at time S-1-t are emitted back-to-back so the two
    # independent recurrences interleave on one TensorCore.
    for t in range(S):
        tb = S - 1 - t

        # forward direction, position t
        m_f = t < lens                                       # (B, H) bool, 1 VPU cmp
        h_f = jnp.where(m_f,
                        gru_step(gi_ref[t * B:(t + 1) * B, :H3], h_f,
                                 whh_f_ref, bhh_f),
                        h_f)
        y_f = jnp.where(m_f, h_f, 0.0)

        # backward direction, position tb
        m_b = tb < lens
        h_b = jnp.where(m_b,
                        gru_step(gi_ref[tb * B:(tb + 1) * B, H3:], h_b,
                                 whh_b_ref, bhh_b),
                        h_b)
        y_b = jnp.where(m_b, h_b, 0.0)

        # Accumulate fwd+bwd halves directly into the single (S, B, H) output.
        # Each time position is touched exactly twice; whether a touch writes
        # or accumulates is decided at trace time (t, tb are Python ints).
        if t < tb:
            out_ref[t] = y_f
            out_ref[tb] = y_b
        elif t > tb:
            out_ref[t] = out_ref[t] + y_f
            out_ref[tb] = out_ref[tb] + y_b
        else:  # S odd, middle position
            out_ref[t] = y_f + y_b

    hn_ref[0] = h_f
    hn_ref[1] = h_b


# ----------------------------------------------------------------------------
# Wrapper matching PGNEncoder.forward(input, input_lens, h_0) -> (output, h_n)
# ----------------------------------------------------------------------------
def pgn_encoder_forward(params, x, input_lens, h_0=None):
    """x: (S, B, H) f32 embedded words; input_lens: (B,) ints; h_0: (2, B, H) or None.

    Returns:
      output: (S, B, H) = forward_half + backward_half (padded positions are 0)
      h_n:    (2, B, H) final hidden per direction (at each sequence's true end)
    Dropout is the identity (module default p=0 / eval mode).
    """
    S, B, H = x.shape
    assert H % 128 == 0, "hidden_size must be lane-aligned (multiple of 128)"
    input_lens = jnp.asarray(input_lens, jnp.int32)
    if h_0 is None:
        h_0 = jnp.zeros((2, B, H), jnp.float32)

    # Pad batch to sublane granularity; padded rows get length 0 -> zero output.
    B_pad = ((B + 7) // 8) * 8
    if B_pad != B:
        x = jnp.pad(x, ((0, 0), (0, B_pad - B), (0, 0)))
        h_0 = jnp.pad(h_0, ((0, 0), (0, B_pad - B), (0, 0)))
        input_lens = jnp.pad(input_lens, (0, B_pad - B))

    # Lane-dense length vector: one (B, H) int32 vreg, compared in-kernel.
    lens_bh = jnp.broadcast_to(input_lens[:, None], (B_pad, H)).astype(jnp.int32)

    def _vmem():
        return pl.BlockSpec(memory_space=pltpu.MemorySpace.VMEM)

    out, h_n = pl.pallas_call(
        _bigru_encoder_kernel,
        out_shape=(jax.ShapeDtypeStruct((S, B_pad, H), jnp.float32),
                   jax.ShapeDtypeStruct((2, B_pad, H), jnp.float32)),
        in_specs=[_vmem() for _ in range(8)],
        out_specs=(_vmem(), _vmem()),
        scratch_shapes=[pltpu.VMEM((S * B_pad, 6 * H), jnp.float32)],
    )(x, lens_bh, h_0,
      params["wih_all"], params["whh_f"], params["whh_b"],
      params["bih_all"], params["bhh"])

    return out[:, :B, :], h_n[:, :B, :]


# ----------------------------------------------------------------------------
# Pure-JAX reference (f32) for correctness checking.
# ----------------------------------------------------------------------------
def _encoder_reference(params, x, input_lens, h_0):
    S, B, H = x.shape
    H3 = 3 * H
    wih = params["wih_all"].astype(jnp.float32)              # (H, 6H)
    whh_f = params["whh_f"].astype(jnp.float32)              # (H, 3H)
    whh_b = params["whh_b"].astype(jnp.float32)
    bih = params["bih_all"][0]                               # (6H,)
    bhh_f = params["bhh"][0, 0]                              # (3H,)
    bhh_b = params["bhh"][1, 0]
    lens = jnp.asarray(input_lens, jnp.int32)

    gi_all = jnp.einsum("sbh,hg->sbg", x, wih) + bih         # (S, B, 6H)

    def step(h, gi_t, whh, bhh):
        gh = h @ whh + bhh
        r = jax.nn.sigmoid(gi_t[:, :H] + gh[:, :H])
        z = jax.nn.sigmoid(gi_t[:, H:2 * H] + gh[:, H:2 * H])
        n = jnp.tanh(gi_t[:, 2 * H:] + r * gh[:, 2 * H:])
        return (1.0 - z) * n + z * h

    out = jnp.zeros((S, B, H), jnp.float32)
    h_f, h_b = h_0[0], h_0[1]
    for t in range(S):                        # forward direction
        m = (t < lens)[:, None]
        h_f = jnp.where(m, step(h_f, gi_all[t, :, :H3], whh_f, bhh_f), h_f)
        out = out.at[t].add(jnp.where(m, h_f, 0.0))
    for t in range(S - 1, -1, -1):            # backward direction
        m = (t < lens)[:, None]
        h_b = jnp.where(m, step(h_b, gi_all[t, :, H3:], whh_b, bhh_b), h_b)
        out = out.at[t].add(jnp.where(m, h_b, 0.0))
    return out, jnp.stack([h_f, h_b])


# ----------------------------------------------------------------------------
# Deterministic synthetic parameters (nn.GRU bidirectional, 1 layer).
# Weights stored transposed and gate-fused (gate order r, z, n like nn.GRU):
#   wih_all: (H, 6H) = [fwd 3H | bwd 3H]  bf16 (MXU)
#   whh_f / whh_b: (H, 3H)                bf16
#   bih_all: (1, 6H), bhh: (2, 1, 3H)     f32
# ----------------------------------------------------------------------------
def init_params(key, H):
    ks = jax.random.split(key, 5)

    def nrm(k, shape, dtype=jnp.float32):
        return (0.1 * jax.random.normal(k, shape, jnp.float32)).astype(dtype)

    return {
        "wih_all": nrm(ks[0], (H, 6 * H), jnp.bfloat16),
        "whh_f":   nrm(ks[1], (H, 3 * H), jnp.bfloat16),
        "whh_b":   nrm(ks[2], (H, 3 * H), jnp.bfloat16),
        "bih_all": nrm(ks[3], (1, 6 * H)),
        "bhh":     nrm(ks[4], (2, 1, 3 * H)),
    }


if __name__ == "__main__":
    S, H = 8, 128          # seq len; lane-aligned hidden size
    B = 2                  # logical batch (wrapper pads to 8 internally)

    key = jax.random.PRNGKey(0)
    k_params, k_x, k_h = jax.random.split(key, 3)

    params = init_params(k_params, H)
    x = jax.random.normal(k_x, (S, B, H), dtype=jnp.float32)
    input_lens = jnp.array([S, S - 3], dtype=jnp.int32)   # sorted desc (packed req.)
    h_0 = 0.1 * jax.random.normal(k_h, (2, B, H), dtype=jnp.float32)

    output, h_n = pgn_encoder_forward(params, x, input_lens, h_0)
    output, h_n = jax.block_until_ready((output, h_n))

    assert output.shape == (S, B, H), output.shape
    assert h_n.shape == (2, B, H), h_n.shape
    assert bool(jnp.all(jnp.isfinite(output))) and bool(jnp.all(jnp.isfinite(h_n)))
    # Padded time steps of the shorter sequence must be exactly zero
    # (pad_packed_sequence semantics).
    assert bool(jnp.all(output[int(input_lens[1]):, 1, :] == 0.0))

    # Compare against the pure-JAX f32 reference (bf16 MXU casts -> small tol).
    ref_out, ref_hn = _encoder_reference(params, x, input_lens, h_0)
    assert float(jnp.max(jnp.abs(output - ref_out))) < 5e-2
    assert float(jnp.max(jnp.abs(h_n - ref_hn))) < 5e-2

    print("KERNEL_OK")
</pallas_src>

<mosaic_0001>
module attributes {stable_mosaic.version = 11 : i64} {
  func.func @_bigru_encoder_kernel(%arg0: memref<8x8x128xf32, #tpu.memory_space<vmem>>, %arg1: memref<8x128xi32, #tpu.memory_space<vmem>>, %arg2: memref<2x8x128xf32, #tpu.memory_space<vmem>>, %arg3: memref<128x768xbf16, #tpu.memory_space<vmem>>, %arg4: memref<128x384xbf16, #tpu.memory_space<vmem>>, %arg5: memref<128x384xbf16, #tpu.memory_space<vmem>>, %arg6: memref<1x768xf32, #tpu.memory_space<vmem>>, %arg7: memref<2x1x384xf32, #tpu.memory_space<vmem>>, %arg8: memref<8x8x128xf32, #tpu.memory_space<vmem>>, %arg9: memref<2x8x128xf32, #tpu.memory_space<vmem>>, %arg10: memref<64x768xf32, #tpu.memory_space<vmem>>) attributes {dimension_semantics = [], scalar_prefetch = 0 : i64, scratch_operands = 1 : i64, tpu.core_type = #tpu.core_type<tc>} {
    %c0 = arith.constant 0 : index
    %c0_0 = arith.constant 0 : index
    %c0_1 = arith.constant 0 : index
    %0 = vector.load %arg0[%c0, %c0_0, %c0_1] : memref<8x8x128xf32, #tpu.memory_space<vmem>>, vector<8x8x128xf32>
    %1 = vector.shape_cast %0 : vector<8x8x128xf32> to vector<64x128xf32>
    %2 = arith.truncf %1 : vector<64x128xf32> to vector<64x128xbf16>
    %c0_2 = arith.constant 0 : index
    %c0_3 = arith.constant 0 : index
    %3 = vector.load %arg3[%c0_2, %c0_3] : memref<128x768xbf16, #tpu.memory_space<vmem>>, vector<128x768xbf16>
    %cst = arith.constant dense<0.000000e+00> : vector<64x768xf32>
    %4 = tpu.matmul %2, %3, %cst {dimension_numbers = #tpu.dot_dimension_numbers<[1], [0], [0], [1], [0, 0, 1, 1], [], []>} : vector<64x128xbf16>, vector<128x768xbf16>, vector<64x768xf32> -> vector<64x768xf32>
    %c0_4 = arith.constant 0 : index
    %c0_5 = arith.constant 0 : index
    %5 = vector.load %arg6[%c0_4, %c0_5] : memref<1x768xf32, #tpu.memory_space<vmem>>, vector<1x768xf32>
    %6 = vector.broadcast %5 : vector<1x768xf32> to vector<64x768xf32>
    %7 = arith.addf %4, %6 : vector<64x768xf32>
    %c0_6 = arith.constant 0 : index
    %c0_7 = arith.constant 0 : index
    %8 = vector.load %arg10[%c0_6, %c0_7] : memref<64x768xf32, #tpu.memory_space<vmem>>, vector<64x768xf32>
    tpu.vector_store %arg10[%c0_6, %c0_7], %7 {strides = array<i32>} : memref<64x768xf32, #tpu.memory_space<vmem>>, vector<64x768xf32>,
    %c0_8 = arith.constant 0 : index
    %c0_9 = arith.constant 0 : index
    %9 = vector.load %arg1[%c0_8, %c0_9] : memref<8x128xi32, #tpu.memory_space<vmem>>, vector<8x128xi32>
    %c0_10 = arith.constant 0 : index
    %c0_11 = arith.constant 0 : index
    %c0_12 = arith.constant 0 : index
    %10 = vector.load %arg7[%c0_10, %c0_11, %c0_12] : memref<2x1x384xf32, #tpu.memory_space<vmem>>, vector<1x1x384xf32>
    %11 = vector.shape_cast %10 : vector<1x1x384xf32> to vector<1x384xf32>
    %12 = vector.shape_cast %11 : vector<1x384xf32> to vector<1x384xf32>
    %13 = vector.broadcast %12 : vector<1x384xf32> to vector<8x384xf32>
    %c1 = arith.constant 1 : index
    %c0_13 = arith.constant 0 : index
    %c0_14 = arith.constant 0 : index
    %14 = vector.load %arg7[%c1, %c0_13, %c0_14] : memref<2x1x384xf32, #tpu.memory_space<vmem>>, vector<1x1x384xf32>
    %15 = vector.shape_cast %14 : vector<1x1x384xf32> to vector<1x384xf32>
    %16 = vector.shape_cast %15 : vector<1x384xf32> to vector<1x384xf32>
    %17 = vector.broadcast %16 : vector<1x384xf32> to vector<8x384xf32>
    %c0_15 = arith.constant 0 : index
    %c0_16 = arith.constant 0 : index
    %c0_17 = arith.constant 0 : index
    %18 = vector.load %arg2[%c0_15, %c0_16, %c0_17] : memref<2x8x128xf32, #tpu.memory_space<vmem>>, vector<1x8x128xf32>
    %19 = vector.shape_cast %18 : vector<1x8x128xf32> to vector<8x128xf32>
    %c1_18 = arith.constant 1 : index
    %c0_19 = arith.constant 0 : index
    %c0_20 = arith.constant 0 : index
    %20 = vector.load %arg2[%c1_18, %c0_19, %c0_20] : memref<2x8x128xf32, #tpu.memory_space<vmem>>, vector<1x8x128xf32>
    %21 = vector.shape_cast %20 : vector<1x8x128xf32> to vector<8x128xf32>
    %c0_i32 = arith.constant 0 : i32
    %22 = vector.broadcast %c0_i32 : i32 to vector<8x128xi32>
    %23 = arith.cmpi sgt, %9, %22 : vector<8x128xi32>
    %c0_21 = arith.constant 0 : index
    %c0_22 = arith.constant 0 : index
    %24 = vector.load %arg10[%c0_21, %c0_22] : memref<64x768xf32, #tpu.memory_space<vmem>>, vector<8x384xf32>
    %25 = arith.truncf %19 : vector<8x128xf32> to vector<8x128xbf16>
    %c0_23 = arith.constant 0 : index
    %c0_24 = arith.constant 0 : index
    %26 = vector.load %arg4[%c0_23, %c0_24] : memref<128x384xbf16, #tpu.memory_space<vmem>>, vector<128x384xbf16>
    %cst_25 = arith.constant dense<0.000000e+00> : vector<8x384xf32>
    %27 = tpu.matmul %25, %26, %cst_25 {dimension_numbers = #tpu.dot_dimension_numbers<[1], [0], [0], [1], [0, 0, 1, 1], [], []>} : vector<8x128xbf16>, vector<128x384xbf16>, vector<8x384xf32> -> vector<8x384xf32>
    %28 = arith.addf %27, %13 : vector<8x384xf32>
    %29 = vector.extract_strided_slice %24 {offsets = [0, 0], sizes = [8, 128], strides = [1, 1]} : vector<8x384xf32> to vector<8x128xf32>
    %30 = vector.extract_strided_slice %28 {offsets = [0, 0], sizes = [8, 128], strides = [1, 1]} : vector<8x384xf32> to vector<8x128xf32>
    %31 = arith.addf %29, %30 : vector<8x128xf32>
    %32 = arith.negf %31 : vector<8x128xf32>
    %33 = math.exp %32 : vector<8x128xf32>
    %cst_26 = arith.constant 1.000000e+00 : f32
    %34 = vector.broadcast %cst_26 : f32 to vector<8x128xf32>
    %35 = arith.addf %34, %33 : vector<8x128xf32>
    %36 = arith.divf %34, %35 : vector<8x128xf32>
    %37 = vector.extract_strided_slice %24 {offsets = [0, 128], sizes = [8, 128], strides = [1, 1]} : vector<8x384xf32> to vector<8x128xf32>
    %38 = vector.extract_strided_slice %28 {offsets = [0, 128], sizes = [8, 128], strides = [1, 1]} : vector<8x384xf32> to vector<8x128xf32>
    %39 = arith.addf %37, %38 : vector<8x128xf32>
    %40 = arith.negf %39 : vector<8x128xf32>
    %41 = math.exp %40 : vector<8x128xf32>
    %cst_27 = arith.constant 1.000000e+00 : f32
    %42 = vector.broadcast %cst_27 : f32 to vector<8x128xf32>
    %43 = arith.addf %42, %41 : vector<8x128xf32>
    %44 = arith.divf %42, %43 : vector<8x128xf32>
    %45 = vector.extract_strided_slice %24 {offsets = [0, 256], sizes = [8, 128], strides = [1, 1]} : vector<8x384xf32> to vector<8x128xf32>
    %46 = vector.extract_strided_slice %28 {offsets = [0, 256], sizes = [8, 128], strides = [1, 1]} : vector<8x384xf32> to vector<8x128xf32>
    %47 = arith.mulf %36, %46 : vector<8x128xf32>
    %48 = arith.addf %45, %47 : vector<8x128xf32>
    %49 = math.tanh %48 : vector<8x128xf32>
    %cst_28 = arith.constant 1.000000e+00 : f32
    %50 = vector.broadcast %cst_28 : f32 to vector<8x128xf32>
    %51 = arith.subf %50, %44 : vector<8x128xf32>
    %52 = arith.mulf %51, %49 : vector<8x128xf32>
    %53 = arith.mulf %44, %19 : vector<8x128xf32>
    %54 = arith.addf %52, %53 : vector<8x128xf32>
    %55 = arith.select %23, %54, %19 : vector<8x128xi1>, vector<8x128xf32>
    %cst_29 = arith.constant 0.000000e+00 : f32
    %56 = vector.broadcast %cst_29 : f32 to vector<8x128xf32>
    %57 = arith.select %23, %55, %56 : vector<8x128xi1>, vector<8x128xf32>
    %c7_i32 = arith.constant 7 : i32
    %58 = vector.broadcast %c7_i32 : i32 to vector<8x128xi32>
    %59 = arith.cmpi sgt, %9, %58 : vector<8x128xi32>
    %c56 = arith.constant 56 : index
    %c384 = arith.constant 384 : index
    %60 = vector.load %arg10[%c56, %c384] : memref<64x768xf32, #tpu.memory_space<vmem>>, vector<8x384xf32>
    %61 = arith.truncf %21 : vector<8x128xf32> to vector<8x128xbf16>
    %c0_30 = arith.constant 0 : index
    %c0_31 = arith.constant 0 : index
    %62 = vector.load %arg5[%c0_30, %c0_31] : memref<128x384xbf16, #tpu.memory_space<vmem>>, vector<128x384xbf16>
    %cst_32 = arith.constant dense<0.000000e+00> : vector<8x384xf32>
    %63 = tpu.matmul %61, %62, %cst_32 {dimension_numbers = #tpu.dot_dimension_numbers<[1], [0], [0], [1], [0, 0, 1, 1], [], []>} : vector<8x128xbf16>, vector<128x384xbf16>, vector<8x384xf32> -> vector<8x384xf32>
    %64 = arith.addf %63, %17 : vector<8x384xf32>
    %65 = vector.extract_strided_slice %60 {offsets = [0, 0], sizes = [8, 128], strides = [1, 1]} : vector<8x384xf32> to vector<8x128xf32>
    %66 = vector.extract_strided_slice %64 {offsets = [0, 0], sizes = [8, 128], strides = [1, 1]} : vector<8x384xf32> to vector<8x128xf32>
    %67 = arith.addf %65, %66 : vector<8x128xf32>
    %68 = arith.negf %67 : vector<8x128xf32>
    %69 = math.exp %68 : vector<8x128xf32>
    %cst_33 = arith.constant 1.000000e+00 : f32
    %70 = vector.broadcast %cst_33 : f32 to vector<8x128xf32>
    %71 = arith.addf %70, %69 : vector<8x128xf32>
    %72 = arith.divf %70, %71 : vector<8x128xf32>
    %73 = vector.extract_strided_slice %60 {offsets = [0, 128], sizes = [8, 128], strides = [1, 1]} : vector<8x384xf32> to vector<8x128xf32>
    %74 = vector.extract_strided_slice %64 {offsets = [0, 128], sizes = [8, 128], strides = [1, 1]} : vector<8x384xf32> to vector<8x128xf32>
    %75 = arith.addf %73, %74 : vector<8x128xf32>
    %76 = arith.negf %75 : vector<8x128xf32>
    %77 = math.exp %76 : vector<8x128xf32>
    %cst_34 = arith.constant 1.000000e+00 : f32
    %78 = vector.broadcast %cst_34 : f32 to vector<8x128xf32>
    %79 = arith.addf %78, %77 : vector<8x128xf32>
    %80 = arith.divf %78, %79 : vector<8x128xf32>
    %81 = vector.extract_strided_slice %60 {offsets = [0, 256], sizes = [8, 128], strides = [1, 1]} : vector<8x384xf32> to vector<8x128xf32>
    %82 = vector.extract_strided_slice %64 {offsets = [0, 256], sizes = [8, 128], strides = [1, 1]} : vector<8x384xf32> to vector<8x128xf32>
    %83 = arith.mulf %72, %82 : vector<8x128xf32>
    %84 = arith.addf %81, %83 : vector<8x128xf32>
    %85 = math.tanh %84 : vector<8x128xf32>
    %cst_35 = arith.constant 1.000000e+00 : f32
    %86 = vector.broadcast %cst_35 : f32 to vector<8x128xf32>
    %87 = arith.subf %86, %80 : vector<8x128xf32>
    %88 = arith.mulf %87, %85 : vector<8x128xf32>
    %89 = arith.mulf %80, %21 : vector<8x128xf32>
    %90 = arith.addf %88, %89 : vector<8x128xf32>
    %91 = arith.select %59, %90, %21 : vector<8x128xi1>, vector<8x128xf32>
    %cst_36 = arith.constant 0.000000e+00 : f32
    %92 = vector.broadcast %cst_36 : f32 to vector<8x128xf32>
    %93 = arith.select %59, %91, %92 : vector<8x128xi1>, vector<8x128xf32>
    %c0_37 = arith.constant 0 : index
    %c0_38 = arith.constant 0 : index
    %c0_39 = arith.constant 0 : index
    %94 = vector.load %arg8[%c0_37, %c0_38, %c0_39] : memref<8x8x128xf32, #tpu.memory_space<vmem>>, vector<1x8x128xf32>
    %95 = vector.shape_cast %94 : vector<1x8x128xf32> to vector<8x128xf32>
    %96 = vector.shape_cast %57 : vector<8x128xf32> to vector<1x8x128xf32>
    tpu.vector_store %arg8[%c0_37, %c0_38, %c0_39], %96 {strides = array<i32>} : memref<8x8x128xf32, #tpu.memory_space<vmem>>, vector<1x8x128xf32>,
    %c7 = arith.constant 7 : index
    %c0_40 = arith.constant 0 : index
    %c0_41 = arith.constant 0 : index
    %97 = vector.load %arg8[%c7, %c0_40, %c0_41] : memref<8x8x128xf32, #tpu.memory_space<vmem>>, vector<1x8x128xf32>
    %98 = vector.shape_cast %97 : vector<1x8x128xf32> to vector<8x128xf32>
    %99 = vector.shape_cast %93 : vector<8x128xf32> to vector<1x8x128xf32>
    tpu.vector_store %arg8[%c7, %c0_40, %c0_41], %99 {strides = array<i32>} : memref<8x8x128xf32, #tpu.memory_space<vmem>>, vector<1x8x128xf32>,
    %c1_i32 = arith.constant 1 : i32
    %100 = vector.broadcast %c1_i32 : i32 to vector<8x128xi32>
    %101 = arith.cmpi sgt, %9, %100 : vector<8x128xi32>
    %c8 = arith.constant 8 : index
    %c0_42 = arith.constant 0 : index
    %102 = vector.load %arg10[%c8, %c0_42] : memref<64x768xf32, #tpu.memory_space<vmem>>, vector<8x384xf32>
    %103 = arith.truncf %55 : vector<8x128xf32> to vector<8x128xbf16>
    %c0_43 = arith.constant 0 : index
    %c0_44 = arith.constant 0 : index
    %104 = vector.load %arg4[%c0_43, %c0_44] : memref<128x384xbf16, #tpu.memory_space<vmem>>, vector<128x384xbf16>
    %cst_45 = arith.constant dense<0.000000e+00> : vector<8x384xf32>
    %105 = tpu.matmul %103, %104, %cst_45 {dimension_numbers = #tpu.dot_dimension_numbers<[1], [0], [0], [1], [0, 0, 1, 1], [], []>} : vector<8x128xbf16>, vector<128x384xbf16>, vector<8x384xf32> -> vector<8x384xf32>
    %106 = arith.addf %105, %13 : vector<8x384xf32>
    %107 = vector.extract_strided_slice %102 {offsets = [0, 0], sizes = [8, 128], strides = [1, 1]} : vector<8x384xf32> to vector<8x128xf32>
    %108 = vector.extract_strided_slice %106 {offsets = [0, 0], sizes = [8, 128], strides = [1, 1]} : vector<8x384xf32> to vector<8x128xf32>
    %109 = arith.addf %107, %108 : vector<8x128xf32>
    %110 = arith.negf %109 : vector<8x128xf32>
    %111 = math.exp %110 : vector<8x128xf32>
    %cst_46 = arith.constant 1.000000e+00 : f32
    %112 = vector.broadcast %cst_46 : f32 to vector<8x128xf32>
    %113 = arith.addf %112, %111 : vector<8x128xf32>
    %114 = arith.divf %112, %113 : vector<8x128xf32>
    %115 = vector.extract_strided_slice %102 {offsets = [0, 128], sizes = [8, 128], strides = [1, 1]} : vector<8x384xf32> to vector<8x128xf32>
    %116 = vector.extract_strided_slice %106 {offsets = [0, 128], sizes = [8, 128], strides = [1, 1]} : vector<8x384xf32> to vector<8x128xf32>
    %117 = arith.addf %115, %116 : vector<8x128xf32>
    %118 = arith.negf %117 : vector<8x128xf32>
    %119 = math.exp %118 : vector<8x128xf32>
    %cst_47 = arith.constant 1.000000e+00 : f32
    %120 = vector.broadcast %cst_47 : f32 to vector<8x128xf32>
    %121 = arith.addf %120, %119 : vector<8x128xf32>
    %122 = arith.divf %120, %121 : vector<8x128xf32>
    %123 = vector.extract_strided_slice %102 {offsets = [0, 256], sizes = [8, 128], strides = [1, 1]} : vector<8x384xf32> to vector<8x128xf32>
    %124 = vector.extract_strided_slice %106 {offsets = [0, 256], sizes = [8, 128], strides = [1, 1]} : vector<8x384xf32> to vector<8x128xf32>
    %125 = arith.mulf %114, %124 : vector<8x128xf32>
    %126 = arith.addf %123, %125 : vector<8x128xf32>
    %127 = math.tanh %126 : vector<8x128xf32>
    %cst_48 = arith.constant 1.000000e+00 : f32
    %128 = vector.broadcast %cst_48 : f32 to vector<8x128xf32>
    %129 = arith.subf %128, %122 : vector<8x128xf32>
    %130 = arith.mulf %129, %127 : vector<8x128xf32>
    %131 = arith.mulf %122, %55 : vector<8x128xf32>
    %132 = arith.addf %130, %131 : vector<8x128xf32>
    %133 = arith.select %101, %132, %55 : vector<8x128xi1>, vector<8x128xf32>
    %cst_49 = arith.constant 0.000000e+00 : f32
    %134 = vector.broadcast %cst_49 : f32 to vector<8x128xf32>
    %135 = arith.select %101, %133, %134 : vector<8x128xi1>, vector<8x128xf32>
    %c6_i32 = arith.constant 6 : i32
    %136 = vector.broadcast %c6_i32 : i32 to vector<8x128xi32>
    %137 = arith.cmpi sgt, %9, %136 : vector<8x128xi32>
    %c48 = arith.constant 48 : index
    %c384_50 = arith.constant 384 : index
    %138 = vector.load %arg10[%c48, %c384_50] : memref<64x768xf32, #tpu.memory_space<vmem>>, vector<8x384xf32>
    %139 = arith.truncf %91 : vector<8x128xf32> to vector<8x128xbf16>
    %c0_51 = arith.constant 0 : index
    %c0_52 = arith.constant 0 : index
    %140 = vector.load %arg5[%c0_51, %c0_52] : memref<128x384xbf16, #tpu.memory_space<vmem>>, vector<128x384xbf16>
    %cst_53 = arith.constant dense<0.000000e+00> : vector<8x384xf32>
    %141 = tpu.matmul %139, %140, %cst_53 {dimension_numbers = #tpu.dot_dimension_numbers<[1], [0], [0], [1], [0, 0, 1, 1], [], []>} : vector<8x128xbf16>, vector<128x384xbf16>, vector<8x384xf32> -> vector<8x384xf32>
    %142 = arith.addf %141, %17 : vector<8x384xf32>
    %143 = vector.extract_strided_slice %138 {offsets = [0, 0], sizes = [8, 128], strides = [1, 1]} : vector<8x384xf32> to vector<8x128xf32>
    %144 = vector.extract_strided_slice %142 {offsets = [0, 0], sizes = [8, 128], strides = [1, 1]} : vector<8x384xf32> to vector<8x128xf32>
    %145 = arith.addf %143, %144 : vector<8x128xf32>
    %146 = arith.negf %145 : vector<8x128xf32>
    %147 = math.exp %146 : vector<8x128xf32>
    %cst_54 = arith.constant 1.000000e+00 : f32
    %148 = vector.broadcast %cst_54 : f32 to vector<8x128xf32>
    %149 = arith.addf %148, %147 : vector<8x128xf32>
    %150 = arith.divf %148, %149 : vector<8x128xf32>
    %151 = vector.extract_strided_slice %138 {offsets = [0, 128], sizes = [8, 128], strides = [1, 1]} : vector<8x384xf32> to vector<8x128xf32>
    %152 = vector.extract_strided_slice %142 {offsets = [0, 128], sizes = [8, 128], strides = [1, 1]} : vector<8x384xf32> to vector<8x128xf32>
    %153 = arith.addf %151, %152 : vector<8x128xf32>
    %154 = arith.negf %153 : vector<8x128xf32>
    %155 = math.exp %154 : vector<8x128xf32>
    %cst_55 = arith.constant 1.000000e+00 : f32
    %156 = vector.broadcast %cst_55 : f32 to vector<8x128xf32>
    %157 = arith.addf %156, %155 : vector<8x128xf32>
    %158 = arith.divf %156, %157 : vector<8x128xf32>
    %159 = vector.extract_strided_slice %138 {offsets = [0, 256], sizes = [8, 128], strides = [1, 1]} : vector<8x384xf32> to vector<8x128xf32>
    %160 = vector.extract_strided_slice %142 {offsets = [0, 256], sizes = [8, 128], strides = [1, 1]} : vector<8x384xf32> to vector<8x128xf32>
    %161 = arith.mulf %150, %160 : vector<8x128xf32>
    %162 = arith.addf %159, %161 : vector<8x128xf32>
    %163 = math.tanh %162 : vector<8x128xf32>
    %cst_56 = arith.constant 1.000000e+00 : f32
    %164 = vector.broadcast %cst_56 : f32 to vector<8x128xf32>
    %165 = arith.subf %164, %158 : vector<8x128xf32>
    %166 = arith.mulf %165, %163 : vector<8x128xf32>
    %167 = arith.mulf %158, %91 : vector<8x128xf32>
    %168 = arith.addf %166, %167 : vector<8x128xf32>
    %169 = arith.select %137, %168, %91 : vector<8x128xi1>, vector<8x128xf32>
    %cst_57 = arith.constant 0.000000e+00 : f32
    %170 = vector.broadcast %cst_57 : f32 to vector<8x128xf32>
    %171 = arith.select %137, %169, %170 : vector<8x128xi1>, vector<8x128xf32>
    %c1_58 = arith.constant 1 : index
    %c0_59 = arith.constant 0 : index
    %c0_60 = arith.constant 0 : index
    %172 = vector.load %arg8[%c1_58, %c0_59, %c0_60] : memref<8x8x128xf32, #tpu.memory_space<vmem>>, vector<1x8x128xf32>
    %173 = vector.shape_cast %172 : vector<1x8x128xf32> to vector<8x128xf32>
    %174 = vector.shape_cast %135 : vector<8x128xf32> to vector<1x8x128xf32>
    tpu.vector_store %arg8[%c1_58, %c0_59, %c0_60], %174 {strides = array<i32>} : memref<8x8x128xf32, #tpu.memory_space<vmem>>, vector<1x8x128xf32>,
    %c6 = arith.constant 6 : index
    %c0_61 = arith.constant 0 : index
    %c0_62 = arith.constant 0 : index
    %175 = vector.load %arg8[%c6, %c0_61, %c0_62] : memref<8x8x128xf32, #tpu.memory_space<vmem>>, vector<1x8x128xf32>
    %176 = vector.shape_cast %175 : vector<1x8x128xf32> to vector<8x128xf32>
    %177 = vector.shape_cast %171 : vector<8x128xf32> to vector<1x8x128xf32>
    tpu.vector_store %arg8[%c6, %c0_61, %c0_62], %177 {strides = array<i32>} : memref<8x8x128xf32, #tpu.memory_space<vmem>>, vector<1x8x128xf32>,
    %c2_i32 = arith.constant 2 : i32
    %178 = vector.broadcast %c2_i32 : i32 to vector<8x128xi32>
    %179 = arith.cmpi sgt, %9, %178 : vector<8x128xi32>
    %c16 = arith.constant 16 : index
    %c0_63 = arith.constant 0 : index
    %180 = vector.load %arg10[%c16, %c0_63] : memref<64x768xf32, #tpu.memory_space<vmem>>, vector<8x384xf32>
    %181 = arith.truncf %133 : vector<8x128xf32> to vector<8x128xbf16>
    %c0_64 = arith.constant 0 : index
    %c0_65 = arith.constant 0 : index
    %182 = vector.load %arg4[%c0_64, %c0_65] : memref<128x384xbf16, #tpu.memory_space<vmem>>, vector<128x384xbf16>
    %cst_66 = arith.constant dense<0.000000e+00> : vector<8x384xf32>
    %183 = tpu.matmul %181, %182, %cst_66 {dimension_numbers = #tpu.dot_dimension_numbers<[1], [0], [0], [1], [0, 0, 1, 1], [], []>} : vector<8x128xbf16>, vector<128x384xbf16>, vector<8x384xf32> -> vector<8x384xf32>
    %184 = arith.addf %183, %13 : vector<8x384xf32>
    %185 = vector.extract_strided_slice %180 {offsets = [0, 0], sizes = [8, 128], strides = [1, 1]} : vector<8x384xf32> to vector<8x128xf32>
    %186 = vector.extract_strided_slice %184 {offsets = [0, 0], sizes = [8, 128], strides = [1, 1]} : vector<8x384xf32> to vector<8x128xf32>
    %187 = arith.addf %185, %186 : vector<8x128xf32>
    %188 = arith.negf %187 : vector<8x128xf32>
    %189 = math.exp %188 : vector<8x128xf32>
    %cst_67 = arith.constant 1.000000e+00 : f32
    %190 = vector.broadcast %cst_67 : f32 to vector<8x128xf32>
    %191 = arith.addf %190, %189 : vector<8x128xf32>
    %192 = arith.divf %190, %191 : vector<8x128xf32>
    %193 = vector.extract_strided_slice %180 {offsets = [0, 128], sizes = [8, 128], strides = [1, 1]} : vector<8x384xf32> to vector<8x128xf32>
    %194 = vector.extract_strided_slice %184 {offsets = [0, 128], sizes = [8, 128], strides = [1, 1]} : vector<8x384xf32> to vector<8x128xf32>
    %195 = arith.addf %193, %194 : vector<8x128xf32>
    %196 = arith.negf %195 : vector<8x128xf32>
    %197 = math.exp %196 : vector<8x128xf32>
    %cst_68 = arith.constant 1.000000e+00 : f32
    %198 = vector.broadcast %cst_68 : f32 to vector<8x128xf32>
    %199 = arith.addf %198, %197 : vector<8x128xf32>
    %200 = arith.divf %198, %199 : vector<8x128xf32>
    %201 = vector.extract_strided_slice %180 {offsets = [0, 256], sizes = [8, 128], strides = [1, 1]} : vector<8x384xf32> to vector<8x128xf32>
    %202 = vector.extract_strided_slice %184 {offsets = [0, 256], sizes = [8, 128], strides = [1, 1]} : vector<8x384xf32> to vector<8x128xf32>
    %203 = arith.mulf %192, %202 : vector<8x128xf32>
    %204 = arith.addf %201, %203 : vector<8x128xf32>
    %205 = math.tanh %204 : vector<8x128xf32>
    %cst_69 = arith.constant 1.000000e+00 : f32
    %206 = vector.broadcast %cst_69 : f32 to vector<8x128xf32>
    %207 = arith.subf %206, %200 : vector<8x128xf32>
    %208 = arith.mulf %207, %205 : vector<8x128xf32>
    %209 = arith.mulf %200, %133 : vector<8x128xf32>
    %210 = arith.addf %208, %209 : vector<8x128xf32>
    %211 = arith.select %179, %210, %133 : vector<8x128xi1>, vector<8x128xf32>
    %cst_70 = arith.constant 0.000000e+00 : f32
    %212 = vector.broadcast %cst_70 : f32 to vector<8x128xf32>
    %213 = arith.select %179, %211, %212 : vector<8x128xi1>, vector<8x128xf32>
    %c5_i32 = arith.constant 5 : i32
    %214 = vector.broadcast %c5_i32 : i32 to vector<8x128xi32>
    %215 = arith.cmpi sgt, %9, %214 : vector<8x128xi32>
    %c40 = arith.constant 40 : index
    %c384_71 = arith.constant 384 : index
    %216 = vector.load %arg10[%c40, %c384_71] : memref<64x768xf32, #tpu.memory_space<vmem>>, vector<8x384xf32>
    %217 = arith.truncf %169 : vector<8x128xf32> to vector<8x128xbf16>
    %c0_72 = arith.constant 0 : index
    %c0_73 = arith.constant 0 : index
    %218 = vector.load %arg5[%c0_72, %c0_73] : memref<128x384xbf16, #tpu.memory_space<vmem>>, vector<128x384xbf16>
    %cst_74 = arith.constant dense<0.000000e+00> : vector<8x384xf32>
    %219 = tpu.matmul %217, %218, %cst_74 {dimension_numbers = #tpu.dot_dimension_numbers<[1], [0], [0], [1], [0, 0, 1, 1], [], []>} : vector<8x128xbf16>, vector<128x384xbf16>, vector<8x384xf32> -> vector<8x384xf32>
    %220 = arith.addf %219, %17 : vector<8x384xf32>
    %221 = vector.extract_strided_slice %216 {offsets = [0, 0], sizes = [8, 128], strides = [1, 1]} : vector<8x384xf32> to vector<8x128xf32>
    %222 = vector.extract_strided_slice %220 {offsets = [0, 0], sizes = [8, 128], strides = [1, 1]} : vector<8x384xf32> to vector<8x128xf32>
    %223 = arith.addf %221, %222 : vector<8x128xf32>
    %224 = arith.negf %223 : vector<8x128xf32>
    %225 = math.exp %224 : vector<8x128xf32>
    %cst_75 = arith.constant 1.000000e+00 : f32
    %226 = vector.broadcast %cst_75 : f32 to vector<8x128xf32>
    %227 = arith.addf %226, %225 : vector<8x128xf32>
    %228 = arith.divf %226, %227 : vector<8x128xf32>
    %229 = vector.extract_strided_slice %216 {offsets = [0, 128], sizes = [8, 128], strides = [1, 1]} : vector<8x384xf32> to vector<8x128xf32>
    %230 = vector.extract_strided_slice %220 {offsets = [0, 128], sizes = [8, 128], strides = [1, 1]} : vector<8x384xf32> to vector<8x128xf32>
    %231 = arith.addf %229, %230 : vector<8x128xf32>
    %232 = arith.negf %231 : vector<8x128xf32>
    %233 = math.exp %232 : vector<8x128xf32>
    %cst_76 = arith.constant 1.000000e+00 : f32
    %234 = vector.broadcast %cst_76 : f32 to vector<8x128xf32>
    %235 = arith.addf %234, %233 : vector<8x128xf32>
    %236 = arith.divf %234, %235 : vector<8x128xf32>
    %237 = vector.extract_strided_slice %216 {offsets = [0, 256], sizes = [8, 128], strides = [1, 1]} : vector<8x384xf32> to vector<8x128xf32>
    %238 = vector.extract_strided_slice %220 {offsets = [0, 256], sizes = [8, 128], strides = [1, 1]} : vector<8x384xf32> to vector<8x128xf32>
    %239 = arith.mulf %228, %238 : vector<8x128xf32>
    %240 = arith.addf %237, %239 : vector<8x128xf32>
    %241 = math.tanh %240 : vector<8x128xf32>
    %cst_77 = arith.constant 1.000000e+00 : f32
    %242 = vector.broadcast %cst_77 : f32 to vector<8x128xf32>
    %243 = arith.subf %242, %236 : vector<8x128xf32>
    %244 = arith.mulf %243, %241 : vector<8x128xf32>
    %245 = arith.mulf %236, %169 : vector<8x128xf32>
    %246 = arith.addf %244, %245 : vector<8x128xf32>
    %247 = arith.select %215, %246, %169 : vector<8x128xi1>, vector<8x128xf32>
    %cst_78 = arith.constant 0.000000e+00 : f32
    %248 = vector.broadcast %cst_78 : f32 to vector<8x128xf32>
    %249 = arith.select %215, %247, %248 : vector<8x128xi1>, vector<8x128xf32>
    %c2 = arith.constant 2 : index
    %c0_79 = arith.constant 0 : index
    %c0_80 = arith.constant 0 : index
    %250 = vector.load %arg8[%c2, %c0_79, %c0_80] : memref<8x8x128xf32, #tpu.memory_space<vmem>>, vector<1x8x128xf32>
    %251 = vector.shape_cast %250 : vector<1x8x128xf32> to vector<8x128xf32>
    %252 = vector.shape_cast %213 : vector<8x128xf32> to vector<1x8x128xf32>
    tpu.vector_store %arg8[%c2, %c0_79, %c0_80], %252 {strides = array<i32>} : memref<8x8x128xf32, #tpu.memory_space<vmem>>, vector<1x8x128xf32>,
    %c5 = arith.constant 5 : index
    %c0_81 = arith.constant 0 : index
    %c0_82 = arith.constant 0 : index
    %253 = vector.load %arg8[%c5, %c0_81, %c0_82] : memref<8x8x128xf32, #tpu.memory_space<vmem>>, vector<1x8x128xf32>
    %254 = vector.shape_cast %253 : vector<1x8x128xf32> to vector<8x128xf32>
    %255 = vector.shape_cast %249 : vector<8x128xf32> to vector<1x8x128xf32>
    tpu.vector_store %arg8[%c5, %c0_81, %c0_82], %255 {strides = array<i32>} : memref<8x8x128xf32, #tpu.memory_space<vmem>>, vector<1x8x128xf32>,
    %c3_i32 = arith.constant 3 : i32
    %256 = vector.broadcast %c3_i32 : i32 to vector<8x128xi32>
    %257 = arith.cmpi sgt, %9, %256 : vector<8x128xi32>
    %c24 = arith.constant 24 : index
    %c0_83 = arith.constant 0 : index
    %258 = vector.load %arg10[%c24, %c0_83] : memref<64x768xf32, #tpu.memory_space<vmem>>, vector<8x384xf32>
    %259 = arith.truncf %211 : vector<8x128xf32> to vector<8x128xbf16>
    %c0_84 = arith.constant 0 : index
    %c0_85 = arith.constant 0 : index
    %260 = vector.load %arg4[%c0_84, %c0_85] : memref<128x384xbf16, #tpu.memory_space<vmem>>, vector<128x384xbf16>
    %cst_86 = arith.constant dense<0.000000e+00> : vector<8x384xf32>
    %261 = tpu.matmul %259, %260, %cst_86 {dimension_numbers = #tpu.dot_dimension_numbers<[1], [0], [0], [1], [0, 0, 1, 1], [], []>} : vector<8x128xbf16>, vector<128x384xbf16>, vector<8x384xf32> -> vector<8x384xf32>
    %262 = arith.addf %261, %13 : vector<8x384xf32>
    %263 = vector.extract_strided_slice %258 {offsets = [0, 0], sizes = [8, 128], strides = [1, 1]} : vector<8x384xf32> to vector<8x128xf32>
    %264 = vector.extract_strided_slice %262 {offsets = [0, 0], sizes = [8, 128], strides = [1, 1]} : vector<8x384xf32> to vector<8x128xf32>
    %265 = arith.addf %263, %264 : vector<8x128xf32>
    %266 = arith.negf %265 : vector<8x128xf32>
    %267 = math.exp %266 : vector<8x128xf32>
    %cst_87 = arith.constant 1.000000e+00 : f32
    %268 = vector.broadcast %cst_87 : f32 to vector<8x128xf32>
    %269 = arith.addf %268, %267 : vector<8x128xf32>
    %270 = arith.divf %268, %269 : vector<8x128xf32>
    %271 = vector.extract_strided_slice %258 {offsets = [0, 128], sizes = [8, 128], strides = [1, 1]} : vector<8x384xf32> to vector<8x128xf32>
    %272 = vector.extract_strided_slice %262 {offsets = [0, 128], sizes = [8, 128], strides = [1, 1]} : vector<8x384xf32> to vector<8x128xf32>
    %273 = arith.addf %271, %272 : vector<8x128xf32>
    %274 = arith.negf %273 : vector<8x128xf32>
    %275 = math.exp %274 : vector<8x128xf32>
    %cst_88 = arith.constant 1.000000e+00 : f32
    %276 = vector.broadcast %cst_88 : f32 to vector<8x128xf32>
    %277 = arith.addf %276, %275 : vector<8x128xf32>
    %278 = arith.divf %276, %277 : vector<8x128xf32>
    %279 = vector.extract_strided_slice %258 {offsets = [0, 256], sizes = [8, 128], strides = [1, 1]} : vector<8x384xf32> to vector<8x128xf32>
    %280 = vector.extract_strided_slice %262 {offsets = [0, 256], sizes = [8, 128], strides = [1, 1]} : vector<8x384xf32> to vector<8x128xf32>
    %281 = arith.mulf %270, %280 : vector<8x128xf32>
    %282 = arith.addf %279, %281 : vector<8x128xf32>
    %283 = math.tanh %282 : vector<8x128xf32>
    %cst_89 = arith.constant 1.000000e+00 : f32
    %284 = vector.broadcast %cst_89 : f32 to vector<8x128xf32>
    %285 = arith.subf %284, %278 : vector<8x128xf32>
    %286 = arith.mulf %285, %283 : vector<8x128xf32>
    %287 = arith.mulf %278, %211 : vector<8x128xf32>
    %288 = arith.addf %286, %287 : vector<8x128xf32>
    %289 = arith.select %257, %288, %211 : vector<8x128xi1>, vector<8x128xf32>
    %cst_90 = arith.constant 0.000000e+00 : f32
    %290 = vector.broadcast %cst_90 : f32 to vector<8x128xf32>
    %291 = arith.select %257, %289, %290 : vector<8x128xi1>, vector<8x128xf32>
    %c4_i32 = arith.constant 4 : i32
    %292 = vector.broadcast %c4_i32 : i32 to vector<8x128xi32>
    %293 = arith.cmpi sgt, %9, %292 : vector<8x128xi32>
    %c32 = arith.constant 32 : index
    %c384_91 = arith.constant 384 : index
    %294 = vector.load %arg10[%c32, %c384_91] : memref<64x768xf32, #tpu.memory_space<vmem>>, vector<8x384xf32>
    %295 = arith.truncf %247 : vector<8x128xf32> to vector<8x128xbf16>
    %c0_92 = arith.constant 0 : index
    %c0_93 = arith.constant 0 : index
    %296 = vector.load %arg5[%c0_92, %c0_93] : memref<128x384xbf16, #tpu.memory_space<vmem>>, vector<128x384xbf16>
    %cst_94 = arith.constant dense<0.000000e+00> : vector<8x384xf32>
    %297 = tpu.matmul %295, %296, %cst_94 {dimension_numbers = #tpu.dot_dimension_numbers<[1], [0], [0], [1], [0, 0, 1, 1], [], []>} : vector<8x128xbf16>, vector<128x384xbf16>, vector<8x384xf32> -> vector<8x384xf32>
    %298 = arith.addf %297, %17 : vector<8x384xf32>
    %299 = vector.extract_strided_slice %294 {offsets = [0, 0], sizes = [8, 128], strides = [1, 1]} : vector<8x384xf32> to vector<8x128xf32>
    %300 = vector.extract_strided_slice %298 {offsets = [0, 0], sizes = [8, 128], strides = [1, 1]} : vector<8x384xf32> to vector<8x128xf32>
    %301 = arith.addf %299, %300 : vector<8x128xf32>
    %302 = arith.negf %301 : vector<8x128xf32>
    %303 = math.exp %302 : vector<8x128xf32>
    %cst_95 = arith.constant 1.000000e+00 : f32
    %304 = vector.broadcast %cst_95 : f32 to vector<8x128xf32>
    %305 = arith.addf %304, %303 : vector<8x128xf32>
    %306 = arith.divf %304, %305 : vector<8x128xf32>
    %307 = vector.extract_strided_slice %294 {offsets = [0, 128], sizes = [8, 128], strides = [1, 1]} : vector<8x384xf32> to vector<8x128xf32>
    %308 = vector.extract_strided_slice %298 {offsets = [0, 128], sizes = [8, 128], strides = [1, 1]} : vector<8x384xf32> to vector<8x128xf32>
    %309 = arith.addf %307, %308 : vector<8x128xf32>
    %310 = arith.negf %309 : vector<8x128xf32>
    %311 = math.exp %310 : vector<8x128xf32>
    %cst_96 = arith.constant 1.000000e+00 : f32
    %312 = vector.broadcast %cst_96 : f32 to vector<8x128xf32>
    %313 = arith.addf %312, %311 : vector<8x128xf32>
    %314 = arith.divf %312, %313 : vector<8x128xf32>
    %315 = vector.extract_strided_slice %294 {offsets = [0, 256], sizes = [8, 128], strides = [1, 1]} : vector<8x384xf32> to vector<8x128xf32>
    %316 = vector.extract_strided_slice %298 {offsets = [0, 256], sizes = [8, 128], strides = [1, 1]} : vector<8x384xf32> to vector<8x128xf32>
    %317 = arith.mulf %306, %316 : vector<8x128xf32>
    %318 = arith.addf %315, %317 : vector<8x128xf32>
    %319 = math.tanh %318 : vector<8x128xf32>
    %cst_97 = arith.constant 1.000000e+00 : f32
    %320 = vector.broadcast %cst_97 : f32 to vector<8x128xf32>
    %321 = arith.subf %320, %314 : vector<8x128xf32>
    %322 = arith.mulf %321, %319 : vector<8x128xf32>
    %323 = arith.mulf %314, %247 : vector<8x128xf32>
    %324 = arith.addf %322, %323 : vector<8x128xf32>
    %325 = arith.select %293, %324, %247 : vector<8x128xi1>, vector<8x128xf32>
    %cst_98 = arith.constant 0.000000e+00 : f32
    %326 = vector.broadcast %cst_98 : f32 to vector<8x128xf32>
    %327 = arith.select %293, %325, %326 : vector<8x128xi1>, vector<8x128xf32>
    %c3 = arith.constant 3 : index
    %c0_99 = arith.constant 0 : index
    %c0_100 = arith.constant 0 : index
    %328 = vector.load %arg8[%c3, %c0_99, %c0_100] : memref<8x8x128xf32, #tpu.memory_space<vmem>>, vector<1x8x128xf32>
    %329 = vector.shape_cast %328 : vector<1x8x128xf32> to vector<8x128xf32>
    %330 = vector.shape_cast %291 : vector<8x128xf32> to vector<1x8x128xf32>
    tpu.vector_store %arg8[%c3, %c0_99, %c0_100], %330 {strides = array<i32>} : memref<8x8x128xf32, #tpu.memory_space<vmem>>, vector<1x8x128xf32>,
    %c4 = arith.constant 4 : index
    %c0_101 = arith.constant 0 : index
    %c0_102 = arith.constant 0 : index
    %331 = vector.load %arg8[%c4, %c0_101, %c0_102] : memref<8x8x128xf32, #tpu.memory_space<vmem>>, vector<1x8x128xf32>
    %332 = vector.shape_cast %331 : vector<1x8x128xf32> to vector<8x128xf32>
    %333 = vector.shape_cast %327 : vector<8x128xf32> to vector<1x8x128xf32>
    tpu.vector_store %arg8[%c4, %c0_101, %c0_102], %333 {strides = array<i32>} : memref<8x8x128xf32, #tpu.memory_space<vmem>>, vector<1x8x128xf32>,
    %c4_i32_103 = arith.constant 4 : i32
    %334 = vector.broadcast %c4_i32_103 : i32 to vector<8x128xi32>
    %335 = arith.cmpi sgt, %9, %334 : vector<8x128xi32>
    %c32_104 = arith.constant 32 : index
    %c0_105 = arith.constant 0 : index
    %336 = vector.load %arg10[%c32_104, %c0_105] : memref<64x768xf32, #tpu.memory_space<vmem>>, vector<8x384xf32>
    %337 = arith.truncf %289 : vector<8x128xf32> to vector<8x128xbf16>
    %c0_106 = arith.constant 0 : index
    %c0_107 = arith.constant 0 : index
    %338 = vector.load %arg4[%c0_106, %c0_107] : memref<128x384xbf16, #tpu.memory_space<vmem>>, vector<128x384xbf16>
    %cst_108 = arith.constant dense<0.000000e+00> : vector<8x384xf32>
    %339 = tpu.matmul %337, %338, %cst_108 {dimension_numbers = #tpu.dot_dimension_numbers<[1], [0], [0], [1], [0, 0, 1, 1], [], []>} : vector<8x128xbf16>, vector<128x384xbf16>, vector<8x384xf32> -> vector<8x384xf32>
    %340 = arith.addf %339, %13 : vector<8x384xf32>
    %341 = vector.extract_strided_slice %336 {offsets = [0, 0], sizes = [8, 128], strides = [1, 1]} : vector<8x384xf32> to vector<8x128xf32>
    %342 = vector.extract_strided_slice %340 {offsets = [0, 0], sizes = [8, 128], strides = [1, 1]} : vector<8x384xf32> to vector<8x128xf32>
    %343 = arith.addf %341, %342 : vector<8x128xf32>
    %344 = arith.negf %343 : vector<8x128xf32>
    %345 = math.exp %344 : vector<8x128xf32>
    %cst_109 = arith.constant 1.000000e+00 : f32
    %346 = vector.broadcast %cst_109 : f32 to vector<8x128xf32>
    %347 = arith.addf %346, %345 : vector<8x128xf32>
    %348 = arith.divf %346, %347 : vector<8x128xf32>
    %349 = vector.extract_strided_slice %336 {offsets = [0, 128], sizes = [8, 128], strides = [1, 1]} : vector<8x384xf32> to vector<8x128xf32>
    %350 = vector.extract_strided_slice %340 {offsets = [0, 128], sizes = [8, 128], strides = [1, 1]} : vector<8x384xf32> to vector<8x128xf32>
    %351 = arith.addf %349, %350 : vector<8x128xf32>
    %352 = arith.negf %351 : vector<8x128xf32>
    %353 = math.exp %352 : vector<8x128xf32>
    %cst_110 = arith.constant 1.000000e+00 : f32
    %354 = vector.broadcast %cst_110 : f32 to vector<8x128xf32>
    %355 = arith.addf %354, %353 : vector<8x128xf32>
    %356 = arith.divf %354, %355 : vector<8x128xf32>
    %357 = vector.extract_strided_slice %336 {offsets = [0, 256], sizes = [8, 128], strides = [1, 1]} : vector<8x384xf32> to vector<8x128xf32>
    %358 = vector.extract_strided_slice %340 {offsets = [0, 256], sizes = [8, 128], strides = [1, 1]} : vector<8x384xf32> to vector<8x128xf32>
    %359 = arith.mulf %348, %358 : vector<8x128xf32>
    %360 = arith.addf %357, %359 : vector<8x128xf32>
    %361 = math.tanh %360 : vector<8x128xf32>
    %cst_111 = arith.constant 1.000000e+00 : f32
    %362 = vector.broadcast %cst_111 : f32 to vector<8x128xf32>
    %363 = arith.subf %362, %356 : vector<8x128xf32>
    %364 = arith.mulf %363, %361 : vector<8x128xf32>
    %365 = arith.mulf %356, %289 : vector<8x128xf32>
    %366 = arith.addf %364, %365 : vector<8x128xf32>
    %367 = arith.select %335, %366, %289 : vector<8x128xi1>, vector<8x128xf32>
    %cst_112 = arith.constant 0.000000e+00 : f32
    %368 = vector.broadcast %cst_112 : f32 to vector<8x128xf32>
    %369 = arith.select %335, %367, %368 : vector<8x128xi1>, vector<8x128xf32>
    %c3_i32_113 = arith.constant 3 : i32
    %370 = vector.broadcast %c3_i32_113 : i32 to vector<8x128xi32>
    %371 = arith.cmpi sgt, %9, %370 : vector<8x128xi32>
    %c24_114 = arith.constant 24 : index
    %c384_115 = arith.constant 384 : index
    %372 = vector.load %arg10[%c24_114, %c384_115] : memref<64x768xf32, #tpu.memory_space<vmem>>, vector<8x384xf32>
    %373 = arith.truncf %325 : vector<8x128xf32> to vector<8x128xbf16>
    %c0_116 = arith.constant 0 : index
    %c0_117 = arith.constant 0 : index
    %374 = vector.load %arg5[%c0_116, %c0_117] : memref<128x384xbf16, #tpu.memory_space<vmem>>, vector<128x384xbf16>
    %cst_118 = arith.constant dense<0.000000e+00> : vector<8x384xf32>
    %375 = tpu.matmul %373, %374, %cst_118 {dimension_numbers = #tpu.dot_dimension_numbers<[1], [0], [0], [1], [0, 0, 1, 1], [], []>} : vector<8x128xbf16>, vector<128x384xbf16>, vector<8x384xf32> -> vector<8x384xf32>
    %376 = arith.addf %375, %17 : vector<8x384xf32>
    %377 = vector.extract_strided_slice %372 {offsets = [0, 0], sizes = [8, 128], strides = [1, 1]} : vector<8x384xf32> to vector<8x128xf32>
    %378 = vector.extract_strided_slice %376 {offsets = [0, 0], sizes = [8, 128], strides = [1, 1]} : vector<8x384xf32> to vector<8x128xf32>
    %379 = arith.addf %377, %378 : vector<8x128xf32>
    %380 = arith.negf %379 : vector<8x128xf32>
    %381 = math.exp %380 : vector<8x128xf32>
    %cst_119 = arith.constant 1.000000e+00 : f32
    %382 = vector.broadcast %cst_119 : f32 to vector<8x128xf32>
    %383 = arith.addf %382, %381 : vector<8x128xf32>
    %384 = arith.divf %382, %383 : vector<8x128xf32>
    %385 = vector.extract_strided_slice %372 {offsets = [0, 128], sizes = [8, 128], strides = [1, 1]} : vector<8x384xf32> to vector<8x128xf32>
    %386 = vector.extract_strided_slice %376 {offsets = [0, 128], sizes = [8, 128], strides = [1, 1]} : vector<8x384xf32> to vector<8x128xf32>
    %387 = arith.addf %385, %386 : vector<8x128xf32>
    %388 = arith.negf %387 : vector<8x128xf32>
    %389 = math.exp %388 : vector<8x128xf32>
    %cst_120 = arith.constant 1.000000e+00 : f32
    %390 = vector.broadcast %cst_120 : f32 to vector<8x128xf32>
    %391 = arith.addf %390, %389 : vector<8x128xf32>
    %392 = arith.divf %390, %391 : vector<8x128xf32>
    %393 = vector.extract_strided_slice %372 {offsets = [0, 256], sizes = [8, 128], strides = [1, 1]} : vector<8x384xf32> to vector<8x128xf32>
    %394 = vector.extract_strided_slice %376 {offsets = [0, 256], sizes = [8, 128], strides = [1, 1]} : vector<8x384xf32> to vector<8x128xf32>
    %395 = arith.mulf %384, %394 : vector<8x128xf32>
    %396 = arith.addf %393, %395 : vector<8x128xf32>
    %397 = math.tanh %396 : vector<8x128xf32>
    %cst_121 = arith.constant 1.000000e+00 : f32
    %398 = vector.broadcast %cst_121 : f32 to vector<8x128xf32>
    %399 = arith.subf %398, %392 : vector<8x128xf32>
    %400 = arith.mulf %399, %397 : vector<8x128xf32>
    %401 = arith.mulf %392, %325 : vector<8x128xf32>
    %402 = arith.addf %400, %401 : vector<8x128xf32>
    %403 = arith.select %371, %402, %325 : vector<8x128xi1>, vector<8x128xf32>
    %cst_122 = arith.constant 0.000000e+00 : f32
    %404 = vector.broadcast %cst_122 : f32 to vector<8x128xf32>
    %405 = arith.select %371, %403, %404 : vector<8x128xi1>, vector<8x128xf32>
    %c4_123 = arith.constant 4 : index
    %c0_124 = arith.constant 0 : index
    %c0_125 = arith.constant 0 : index
    %406 = vector.load %arg8[%c4_123, %c0_124, %c0_125] : memref<8x8x128xf32, #tpu.memory_space<vmem>>, vector<1x8x128xf32>
    %407 = vector.shape_cast %406 : vector<1x8x128xf32> to vector<8x128xf32>
    %408 = arith.addf %407, %369 : vector<8x128xf32>
    %c4_126 = arith.constant 4 : index
    %c0_127 = arith.constant 0 : index
    %c0_128 = arith.constant 0 : index
    %409 = vector.load %arg8[%c4_126, %c0_127, %c0_128] : memref<8x8x128xf32, #tpu.memory_space<vmem>>, vector<1x8x128xf32>
    %410 = vector.shape_cast %409 : vector<1x8x128xf32> to vector<8x128xf32>
    %411 = vector.shape_cast %408 : vector<8x128xf32> to vector<1x8x128xf32>
    tpu.vector_store %arg8[%c4_126, %c0_127, %c0_128], %411 {strides = array<i32>} : memref<8x8x128xf32, #tpu.memory_space<vmem>>, vector<1x8x128xf32>,
    %c3_129 = arith.constant 3 : index
    %c0_130 = arith.constant 0 : index
    %c0_131 = arith.constant 0 : index
    %412 = vector.load %arg8[%c3_129, %c0_130, %c0_131] : memref<8x8x128xf32, #tpu.memory_space<vmem>>, vector<1x8x128xf32>
    %413 = vector.shape_cast %412 : vector<1x8x128xf32> to vector<8x128xf32>
    %414 = arith.addf %413, %405 : vector<8x128xf32>
    %c3_132 = arith.constant 3 : index
    %c0_133 = arith.constant 0 : index
    %c0_134 = arith.constant 0 : index
    %415 = vector.load %arg8[%c3_132, %c0_133, %c0_134] : memref<8x8x128xf32, #tpu.memory_space<vmem>>, vector<1x8x128xf32>
    %416 = vector.shape_cast %415 : vector<1x8x128xf32> to vector<8x128xf32>
    %417 = vector.shape_cast %414 : vector<8x128xf32> to vector<1x8x128xf32>
    tpu.vector_store %arg8[%c3_132, %c0_133, %c0_134], %417 {strides = array<i32>} : memref<8x8x128xf32, #tpu.memory_space<vmem>>, vector<1x8x128xf32>,
    %c5_i32_135 = arith.constant 5 : i32
    %418 = vector.broadcast %c5_i32_135 : i32 to vector<8x128xi32>
    %419 = arith.cmpi sgt, %9, %418 : vector<8x128xi32>
    %c40_136 = arith.constant 40 : index
    %c0_137 = arith.constant 0 : index
    %420 = vector.load %arg10[%c40_136, %c0_137] : memref<64x768xf32, #tpu.memory_space<vmem>>, vector<8x384xf32>
    %421 = arith.truncf %367 : vector<8x128xf32> to vector<8x128xbf16>
    %c0_138 = arith.constant 0 : index
    %c0_139 = arith.constant 0 : index
    %422 = vector.load %arg4[%c0_138, %c0_139] : memref<128x384xbf16, #tpu.memory_space<vmem>>, vector<128x384xbf16>
    %cst_140 = arith.constant dense<0.000000e+00> : vector<8x384xf32>
    %423 = tpu.matmul %421, %422, %cst_140 {dimension_numbers = #tpu.dot_dimension_numbers<[1], [0], [0], [1], [0, 0, 1, 1], [], []>} : vector<8x128xbf16>, vector<128x384xbf16>, vector<8x384xf32> -> vector<8x384xf32>
    %424 = arith.addf %423, %13 : vector<8x384xf32>
    %425 = vector.extract_strided_slice %420 {offsets = [0, 0], sizes = [8, 128], strides = [1, 1]} : vector<8x384xf32> to vector<8x128xf32>
    %426 = vector.extract_strided_slice %424 {offsets = [0, 0], sizes = [8, 128], strides = [1, 1]} : vector<8x384xf32> to vector<8x128xf32>
    %427 = arith.addf %425, %426 : vector<8x128xf32>
    %428 = arith.negf %427 : vector<8x128xf32>
    %429 = math.exp %428 : vector<8x128xf32>
    %cst_141 = arith.constant 1.000000e+00 : f32
    %430 = vector.broadcast %cst_141 : f32 to vector<8x128xf32>
    %431 = arith.addf %430, %429 : vector<8x128xf32>
    %432 = arith.divf %430, %431 : vector<8x128xf32>
    %433 = vector.extract_strided_slice %420 {offsets = [0, 128], sizes = [8, 128], strides = [1, 1]} : vector<8x384xf32> to vector<8x128xf32>
    %434 = vector.extract_strided_slice %424 {offsets = [0, 128], sizes = [8, 128], strides = [1, 1]} : vector<8x384xf32> to vector<8x128xf32>
    %435 = arith.addf %433, %434 : vector<8x128xf32>
    %436 = arith.negf %435 : vector<8x128xf32>
    %437 = math.exp %436 : vector<8x128xf32>
    %cst_142 = arith.constant 1.000000e+00 : f32
    %438 = vector.broadcast %cst_142 : f32 to vector<8x128xf32>
    %439 = arith.addf %438, %437 : vector<8x128xf32>
    %440 = arith.divf %438, %439 : vector<8x128xf32>
    %441 = vector.extract_strided_slice %420 {offsets = [0, 256], sizes = [8, 128], strides = [1, 1]} : vector<8x384xf32> to vector<8x128xf32>
    %442 = vector.extract_strided_slice %424 {offsets = [0, 256], sizes = [8, 128], strides = [1, 1]} : vector<8x384xf32> to vector<8x128xf32>
    %443 = arith.mulf %432, %442 : vector<8x128xf32>
    %444 = arith.addf %441, %443 : vector<8x128xf32>
    %445 = math.tanh %444 : vector<8x128xf32>
    %cst_143 = arith.constant 1.000000e+00 : f32
    %446 = vector.broadcast %cst_143 : f32 to vector<8x128xf32>
    %447 = arith.subf %446, %440 : vector<8x128xf32>
    %448 = arith.mulf %447, %445 : vector<8x128xf32>
    %449 = arith.mulf %440, %367 : vector<8x128xf32>
    %450 = arith.addf %448, %449 : vector<8x128xf32>
    %451 = arith.select %419, %450, %367 : vector<8x128xi1>, vector<8x128xf32>
    %cst_144 = arith.constant 0.000000e+00 : f32
    %452 = vector.broadcast %cst_144 : f32 to vector<8x128xf32>
    %453 = arith.select %419, %451, %452 : vector<8x128xi1>, vector<8x128xf32>
    %c2_i32_145 = arith.constant 2 : i32
    %454 = vector.broadcast %c2_i32_145 : i32 to vector<8x128xi32>
    %455 = arith.cmpi sgt, %9, %454 : vector<8x128xi32>
    %c16_146 = arith.constant 16 : index
    %c384_147 = arith.constant 384 : index
    %456 = vector.load %arg10[%c16_146, %c384_147] : memref<64x768xf32, #tpu.memory_space<vmem>>, vector<8x384xf32>
    %457 = arith.truncf %403 : vector<8x128xf32> to vector<8x128xbf16>
    %c0_148 = arith.constant 0 : index
    %c0_149 = arith.constant 0 : index
    %458 = vector.load %arg5[%c0_148, %c0_149] : memref<128x384xbf16, #tpu.memory_space<vmem>>, vector<128x384xbf16>
    %cst_150 = arith.constant dense<0.000000e+00> : vector<8x384xf32>
    %459 = tpu.matmul %457, %458, %cst_150 {dimension_numbers = #tpu.dot_dimension_numbers<[1], [0], [0], [1], [0, 0, 1, 1], [], []>} : vector<8x128xbf16>, vector<128x384xbf16>, vector<8x384xf32> -> vector<8x384xf32>
    %460 = arith.addf %459, %17 : vector<8x384xf32>
    %461 = vector.extract_strided_slice %456 {offsets = [0, 0], sizes = [8, 128], strides = [1, 1]} : vector<8x384xf32> to vector<8x128xf32>
    %462 = vector.extract_strided_slice %460 {offsets = [0, 0], sizes = [8, 128], strides = [1, 1]} : vector<8x384xf32> to vector<8x128xf32>
    %463 = arith.addf %461, %462 : vector<8x128xf32>
    %464 = arith.negf %463 : vector<8x128xf32>
    %465 = math.exp %464 : vector<8x128xf32>
    %cst_151 = arith.constant 1.000000e+00 : f32
    %466 = vector.broadcast %cst_151 : f32 to vector<8x128xf32>
    %467 = arith.addf %466, %465 : vector<8x128xf32>
    %468 = arith.divf %466, %467 : vector<8x128xf32>
    %469 = vector.extract_strided_slice %456 {offsets = [0, 128], sizes = [8, 128], strides = [1, 1]} : vector<8x384xf32> to vector<8x128xf32>
    %470 = vector.extract_strided_slice %460 {offsets = [0, 128], sizes = [8, 128], strides = [1, 1]} : vector<8x384xf32> to vector<8x128xf32>
    %471 = arith.addf %469, %470 : vector<8x128xf32>
    %472 = arith.negf %471 : vector<8x128xf32>
    %473 = math.exp %472 : vector<8x128xf32>
    %cst_152 = arith.constant 1.000000e+00 : f32
    %474 = vector.broadcast %cst_152 : f32 to vector<8x128xf32>
    %475 = arith.addf %474, %473 : vector<8x128xf32>
    %476 = arith.divf %474, %475 : vector<8x128xf32>
    %477 = vector.extract_strided_slice %456 {offsets = [0, 256], sizes = [8, 128], strides = [1, 1]} : vector<8x384xf32> to vector<8x128xf32>
    %478 = vector.extract_strided_slice %460 {offsets = [0, 256], sizes = [8, 128], strides = [1, 1]} : vector<8x384xf32> to vector<8x128xf32>
    %479 = arith.mulf %468, %478 : vector<8x128xf32>
    %480 = arith.addf %477, %479 : vector<8x128xf32>
    %481 = math.tanh %480 : vector<8x128xf32>
    %cst_153 = arith.constant 1.000000e+00 : f32
    %482 = vector.broadcast %cst_153 : f32 to vector<8x128xf32>
    %483 = arith.subf %482, %476 : vector<8x128xf32>
    %484 = arith.mulf %483, %481 : vector<8x128xf32>
    %485 = arith.mulf %476, %403 : vector<8x128xf32>
    %486 = arith.addf %484, %485 : vector<8x128xf32>
    %487 = arith.select %455, %486, %403 : vector<8x128xi1>, vector<8x128xf32>
    %cst_154 = arith.constant 0.000000e+00 : f32
    %488 = vector.broadcast %cst_154 : f32 to vector<8x128xf32>
    %489 = arith.select %455, %487, %488 : vector<8x128xi1>, vector<8x128xf32>
    %c5_155 = arith.constant 5 : index
    %c0_156 = arith.constant 0 : index
    %c0_157 = arith.constant 0 : index
    %490 = vector.load %arg8[%c5_155, %c0_156, %c0_157] : memref<8x8x128xf32, #tpu.memory_space<vmem>>, vector<1x8x128xf32>
    %491 = vector.shape_cast %490 : vector<1x8x128xf32> to vector<8x128xf32>
    %492 = arith.addf %491, %453 : vector<8x128xf32>
    %c5_158 = arith.constant 5 : index
    %c0_159 = arith.constant 0 : index
    %c0_160 = arith.constant 0 : index
    %493 = vector.load %arg8[%c5_158, %c0_159, %c0_160] : memref<8x8x128xf32, #tpu.memory_space<vmem>>, vector<1x8x128xf32>
    %494 = vector.shape_cast %493 : vector<1x8x128xf32> to vector<8x128xf32>
    %495 = vector.shape_cast %492 : vector<8x128xf32> to vector<1x8x128xf32>
    tpu.vector_store %arg8[%c5_158, %c0_159, %c0_160], %495 {strides = array<i32>} : memref<8x8x128xf32, #tpu.memory_space<vmem>>, vector<1x8x128xf32>,
    %c2_161 = arith.constant 2 : index
    %c0_162 = arith.constant 0 : index
    %c0_163 = arith.constant 0 : index
    %496 = vector.load %arg8[%c2_161, %c0_162, %c0_163] : memref<8x8x128xf32, #tpu.memory_space<vmem>>, vector<1x8x128xf32>
    %497 = vector.shape_cast %496 : vector<1x8x128xf32> to vector<8x128xf32>
    %498 = arith.addf %497, %489 : vector<8x128xf32>
    %c2_164 = arith.constant 2 : index
    %c0_165 = arith.constant 0 : index
    %c0_166 = arith.constant 0 : index
    %499 = vector.load %arg8[%c2_164, %c0_165, %c0_166] : memref<8x8x128xf32, #tpu.memory_space<vmem>>, vector<1x8x128xf32>
    %500 = vector.shape_cast %499 : vector<1x8x128xf32> to vector<8x128xf32>
    %501 = vector.shape_cast %498 : vector<8x128xf32> to vector<1x8x128xf32>
    tpu.vector_store %arg8[%c2_164, %c0_165, %c0_166], %501 {strides = array<i32>} : memref<8x8x128xf32, #tpu.memory_space<vmem>>, vector<1x8x128xf32>,
    %c6_i32_167 = arith.constant 6 : i32
    %502 = vector.broadcast %c6_i32_167 : i32 to vector<8x128xi32>
    %503 = arith.cmpi sgt, %9, %502 : vector<8x128xi32>
    %c48_168 = arith.constant 48 : index
    %c0_169 = arith.constant 0 : index
    %504 = vector.load %arg10[%c48_168, %c0_169] : memref<64x768xf32, #tpu.memory_space<vmem>>, vector<8x384xf32>
    %505 = arith.truncf %451 : vector<8x128xf32> to vector<8x128xbf16>
    %c0_170 = arith.constant 0 : index
    %c0_171 = arith.constant 0 : index
    %506 = vector.load %arg4[%c0_170, %c0_171] : memref<128x384xbf16, #tpu.memory_space<vmem>>, vector<128x384xbf16>
    %cst_172 = arith.constant dense<0.000000e+00> : vector<8x384xf32>
    %507 = tpu.matmul %505, %506, %cst_172 {dimension_numbers = #tpu.dot_dimension_numbers<[1], [0], [0], [1], [0, 0, 1, 1], [], []>} : vector<8x128xbf16>, vector<128x384xbf16>, vector<8x384xf32> -> vector<8x384xf32>
    %508 = arith.addf %507, %13 : vector<8x384xf32>
    %509 = vector.extract_strided_slice %504 {offsets = [0, 0], sizes = [8, 128], strides = [1, 1]} : vector<8x384xf32> to vector<8x128xf32>
    %510 = vector.extract_strided_slice %508 {offsets = [0, 0], sizes = [8, 128], strides = [1, 1]} : vector<8x384xf32> to vector<8x128xf32>
    %511 = arith.addf %509, %510 : vector<8x128xf32>
    %512 = arith.negf %511 : vector<8x128xf32>
    %513 = math.exp %512 : vector<8x128xf32>
    %cst_173 = arith.constant 1.000000e+00 : f32
    %514 = vector.broadcast %cst_173 : f32 to vector<8x128xf32>
    %515 = arith.addf %514, %513 : vector<8x128xf32>
    %516 = arith.divf %514, %515 : vector<8x128xf32>
    %517 = vector.extract_strided_slice %504 {offsets = [0, 128], sizes = [8, 128], strides = [1, 1]} : vector<8x384xf32> to vector<8x128xf32>
    %518 = vector.extract_strided_slice %508 {offsets = [0, 128], sizes = [8, 128], strides = [1, 1]} : vector<8x384xf32> to vector<8x128xf32>
    %519 = arith.addf %517, %518 : vector<8x128xf32>
    %520 = arith.negf %519 : vector<8x128xf32>
    %521 = math.exp %520 : vector<8x128xf32>
    %cst_174 = arith.constant 1.000000e+00 : f32
    %522 = vector.broadcast %cst_174 : f32 to vector<8x128xf32>
    %523 = arith.addf %522, %521 : vector<8x128xf32>
    %524 = arith.divf %522, %523 : vector<8x128xf32>
    %525 = vector.extract_strided_slice %504 {offsets = [0, 256], sizes = [8, 128], strides = [1, 1]} : vector<8x384xf32> to vector<8x128xf32>
    %526 = vector.extract_strided_slice %508 {offsets = [0, 256], sizes = [8, 128], strides = [1, 1]} : vector<8x384xf32> to vector<8x128xf32>
    %527 = arith.mulf %516, %526 : vector<8x128xf32>
    %528 = arith.addf %525, %527 : vector<8x128xf32>
    %529 = math.tanh %528 : vector<8x128xf32>
    %cst_175 = arith.constant 1.000000e+00 : f32
    %530 = vector.broadcast %cst_175 : f32 to vector<8x128xf32>
    %531 = arith.subf %530, %524 : vector<8x128xf32>
    %532 = arith.mulf %531, %529 : vector<8x128xf32>
    %533 = arith.mulf %524, %451 : vector<8x128xf32>
    %534 = arith.addf %532, %533 : vector<8x128xf32>
    %535 = arith.select %503, %534, %451 : vector<8x128xi1>, vector<8x128xf32>
    %cst_176 = arith.constant 0.000000e+00 : f32
    %536 = vector.broadcast %cst_176 : f32 to vector<8x128xf32>
    %537 = arith.select %503, %535, %536 : vector<8x128xi1>, vector<8x128xf32>
    %c1_i32_177 = arith.constant 1 : i32
    %538 = vector.broadcast %c1_i32_177 : i32 to vector<8x128xi32>
    %539 = arith.cmpi sgt, %9, %538 : vector<8x128xi32>
    %c8_178 = arith.constant 8 : index
    %c384_179 = arith.constant 384 : index
    %540 = vector.load %arg10[%c8_178, %c384_179] : memref<64x768xf32, #tpu.memory_space<vmem>>, vector<8x384xf32>
    %541 = arith.truncf %487 : vector<8x128xf32> to vector<8x128xbf16>
    %c0_180 = arith.constant 0 : index
    %c0_181 = arith.constant 0 : index
    %542 = vector.load %arg5[%c0_180, %c0_181] : memref<128x384xbf16, #tpu.memory_space<vmem>>, vector<128x384xbf16>
    %cst_182 = arith.constant dense<0.000000e+00> : vector<8x384xf32>
    %543 = tpu.matmul %541, %542, %cst_182 {dimension_numbers = #tpu.dot_dimension_numbers<[1], [0], [0], [1], [0, 0, 1, 1], [], []>} : vector<8x128xbf16>, vector<128x384xbf16>, vector<8x384xf32> -> vector<8x384xf32>
    %544 = arith.addf %543, %17 : vector<8x384xf32>
    %545 = vector.extract_strided_slice %540 {offsets = [0, 0], sizes = [8, 128], strides = [1, 1]} : vector<8x384xf32> to vector<8x128xf32>
    %546 = vector.extract_strided_slice %544 {offsets = [0, 0], sizes = [8, 128], strides = [1, 1]} : vector<8x384xf32> to vector<8x128xf32>
    %547 = arith.addf %545, %546 : vector<8x128xf32>
    %548 = arith.negf %547 : vector<8x128xf32>
    %549 = math.exp %548 : vector<8x128xf32>
    %cst_183 = arith.constant 1.000000e+00 : f32
    %550 = vector.broadcast %cst_183 : f32 to vector<8x128xf32>
    %551 = arith.addf %550, %549 : vector<8x128xf32>
    %552 = arith.divf %550, %551 : vector<8x128xf32>
    %553 = vector.extract_strided_slice %540 {offsets = [0, 128], sizes = [8, 128], strides = [1, 1]} : vector<8x384xf32> to vector<8x128xf32>
    %554 = vector.extract_strided_slice %544 {offsets = [0, 128], sizes = [8, 128], strides = [1, 1]} : vector<8x384xf32> to vector<8x128xf32>
    %555 = arith.addf %553, %554 : vector<8x128xf32>
    %556 = arith.negf %555 : vector<8x128xf32>
    %557 = math.exp %556 : vector<8x128xf32>
    %cst_184 = arith.constant 1.000000e+00 : f32
    %558 = vector.broadcast %cst_184 : f32 to vector<8x128xf32>
    %559 = arith.addf %558, %557 : vector<8x128xf32>
    %560 = arith.divf %558, %559 : vector<8x128xf32>
    %561 = vector.extract_strided_slice %540 {offsets = [0, 256], sizes = [8, 128], strides = [1, 1]} : vector<8x384xf32> to vector<8x128xf32>
    %562 = vector.extract_strided_slice %544 {offsets = [0, 256], sizes = [8, 128], strides = [1, 1]} : vector<8x384xf32> to vector<8x128xf32>
    %563 = arith.mulf %552, %562 : vector<8x128xf32>
    %564 = arith.addf %561, %563 : vector<8x128xf32>
    %565 = math.tanh %564 : vector<8x128xf32>
    %cst_185 = arith.constant 1.000000e+00 : f32
    %566 = vector.broadcast %cst_185 : f32 to vector<8x128xf32>
    %567 = arith.subf %566, %560 : vector<8x128xf32>
    %568 = arith.mulf %567, %565 : vector<8x128xf32>
    %569 = arith.mulf %560, %487 : vector<8x128xf32>
    %570 = arith.addf %568, %569 : vector<8x128xf32>
    %571 = arith.select %539, %570, %487 : vector<8x128xi1>, vector<8x128xf32>
    %cst_186 = arith.constant 0.000000e+00 : f32
    %572 = vector.broadcast %cst_186 : f32 to vector<8x128xf32>
    %573 = arith.select %539, %571, %572 : vector<8x128xi1>, vector<8x128xf32>
    %c6_187 = arith.constant 6 : index
    %c0_188 = arith.constant 0 : index
    %c0_189 = arith.constant 0 : index
    %574 = vector.load %arg8[%c6_187, %c0_188, %c0_189] : memref<8x8x128xf32, #tpu.memory_space<vmem>>, vector<1x8x128xf32>
    %575 = vector.shape_cast %574 : vector<1x8x128xf32> to vector<8x128xf32>
    %576 = arith.addf %575, %537 : vector<8x128xf32>
    %c6_190 = arith.constant 6 : index
    %c0_191 = arith.constant 0 : index
    %c0_192 = arith.constant 0 : index
    %577 = vector.load %arg8[%c6_190, %c0_191, %c0_192] : memref<8x8x128xf32, #tpu.memory_space<vmem>>, vector<1x8x128xf32>
    %578 = vector.shape_cast %577 : vector<1x8x128xf32> to vector<8x128xf32>
    %579 = vector.shape_cast %576 : vector<8x128xf32> to vector<1x8x128xf32>
    tpu.vector_store %arg8[%c6_190, %c0_191, %c0_192], %579 {strides = array<i32>} : memref<8x8x128xf32, #tpu.memory_space<vmem>>, vector<1x8x128xf32>,
    %c1_193 = arith.constant 1 : index
    %c0_194 = arith.constant 0 : index
    %c0_195 = arith.constant 0 : index
    %580 = vector.load %arg8[%c1_193, %c0_194, %c0_195] : memref<8x8x128xf32, #tpu.memory_space<vmem>>, vector<1x8x128xf32>
    %581 = vector.shape_cast %580 : vector<1x8x128xf32> to vector<8x128xf32>
    %582 = arith.addf %581, %573 : vector<8x128xf32>
    %c1_196 = arith.constant 1 : index
    %c0_197 = arith.constant 0 : index
    %c0_198 = arith.constant 0 : index
    %583 = vector.load %arg8[%c1_196, %c0_197, %c0_198] : memref<8x8x128xf32, #tpu.memory_space<vmem>>, vector<1x8x128xf32>
    %584 = vector.shape_cast %583 : vector<1x8x128xf32> to vector<8x128xf32>
    %585 = vector.shape_cast %582 : vector<8x128xf32> to vector<1x8x128xf32>
    tpu.vector_store %arg8[%c1_196, %c0_197, %c0_198], %585 {strides = array<i32>} : memref<8x8x128xf32, #tpu.memory_space<vmem>>, vector<1x8x128xf32>,
    %c7_i32_199 = arith.constant 7 : i32
    %586 = vector.broadcast %c7_i32_199 : i32 to vector<8x128xi32>
    %587 = arith.cmpi sgt, %9, %586 : vector<8x128xi32>
    %c56_200 = arith.constant 56 : index
    %c0_201 = arith.constant 0 : index
    %588 = vector.load %arg10[%c56_200, %c0_201] : memref<64x768xf32, #tpu.memory_space<vmem>>, vector<8x384xf32>
    %589 = arith.truncf %535 : vector<8x128xf32> to vector<8x128xbf16>
    %c0_202 = arith.constant 0 : index
    %c0_203 = arith.constant 0 : index
    %590 = vector.load %arg4[%c0_202, %c0_203] : memref<128x384xbf16, #tpu.memory_space<vmem>>, vector<128x384xbf16>
    %cst_204 = arith.constant dense<0.000000e+00> : vector<8x384xf32>
    %591 = tpu.matmul %589, %590, %cst_204 {dimension_numbers = #tpu.dot_dimension_numbers<[1], [0], [0], [1], [0, 0, 1, 1], [], []>} : vector<8x128xbf16>, vector<128x384xbf16>, vector<8x384xf32> -> vector<8x384xf32>
    %592 = arith.addf %591, %13 : vector<8x384xf32>
    %593 = vector.extract_strided_slice %588 {offsets = [0, 0], sizes = [8, 128], strides = [1, 1]} : vector<8x384xf32> to vector<8x128xf32>
    %594 = vector.extract_strided_slice %592 {offsets = [0, 0], sizes = [8, 128], strides = [1, 1]} : vector<8x384xf32> to vector<8x128xf32>
    %595 = arith.addf %593, %594 : vector<8x128xf32>
    %596 = arith.negf %595 : vector<8x128xf32>
    %597 = math.exp %596 : vector<8x128xf32>
    %cst_205 = arith.constant 1.000000e+00 : f32
    %598 = vector.broadcast %cst_205 : f32 to vector<8x128xf32>
    %599 = arith.addf %598, %597 : vector<8x128xf32>
    %600 = arith.divf %598, %599 : vector<8x128xf32>
    %601 = vector.extract_strided_slice %588 {offsets = [0, 128], sizes = [8, 128], strides = [1, 1]} : vector<8x384xf32> to vector<8x128xf32>
    %602 = vector.extract_strided_slice %592 {offsets = [0, 128], sizes = [8, 128], strides = [1, 1]} : vector<8x384xf32> to vector<8x128xf32>
    %603 = arith.addf %601, %602 : vector<8x128xf32>
    %604 = arith.negf %603 : vector<8x128xf32>
    %605 = math.exp %604 : vector<8x128xf32>
    %cst_206 = arith.constant 1.000000e+00 : f32
    %606 = vector.broadcast %cst_206 : f32 to vector<8x128xf32>
    %607 = arith.addf %606, %605 : vector<8x128xf32>
    %608 = arith.divf %606, %607 : vector<8x128xf32>
    %609 = vector.extract_strided_slice %588 {offsets = [0, 256], sizes = [8, 128], strides = [1, 1]} : vector<8x384xf32> to vector<8x128xf32>
    %610 = vector.extract_strided_slice %592 {offsets = [0, 256], sizes = [8, 128], strides = [1, 1]} : vector<8x384xf32> to vector<8x128xf32>
    %611 = arith.mulf %600, %610 : vector<8x128xf32>
    %612 = arith.addf %609, %611 : vector<8x128xf32>
    %613 = math.tanh %612 : vector<8x128xf32>
    %cst_207 = arith.constant 1.000000e+00 : f32
    %614 = vector.broadcast %cst_207 : f32 to vector<8x128xf32>
    %615 = arith.subf %614, %608 : vector<8x128xf32>
    %616 = arith.mulf %615, %613 : vector<8x128xf32>
    %617 = arith.mulf %608, %535 : vector<8x128xf32>
    %618 = arith.addf %616, %617 : vector<8x128xf32>
    %619 = arith.select %587, %618, %535 : vector<8x128xi1>, vector<8x128xf32>
    %cst_208 = arith.constant 0.000000e+00 : f32
    %620 = vector.broadcast %cst_208 : f32 to vector<8x128xf32>
    %621 = arith.select %587, %619, %620 : vector<8x128xi1>, vector<8x128xf32>
    %c0_i32_209 = arith.constant 0 : i32
    %622 = vector.broadcast %c0_i32_209 : i32 to vector<8x128xi32>
    %623 = arith.cmpi sgt, %9, %622 : vector<8x128xi32>
    %c0_210 = arith.constant 0 : index
    %c384_211 = arith.constant 384 : index
    %624 = vector.load %arg10[%c0_210, %c384_211] : memref<64x768xf32, #tpu.memory_space<vmem>>, vector<8x384xf32>
    %625 = arith.truncf %571 : vector<8x128xf32> to vector<8x128xbf16>
    %c0_212 = arith.constant 0 : index
    %c0_213 = arith.constant 0 : index
    %626 = vector.load %arg5[%c0_212, %c0_213] : memref<128x384xbf16, #tpu.memory_space<vmem>>, vector<128x384xbf16>
    %cst_214 = arith.constant dense<0.000000e+00> : vector<8x384xf32>
    %627 = tpu.matmul %625, %626, %cst_214 {dimension_numbers = #tpu.dot_dimension_numbers<[1], [0], [0], [1], [0, 0, 1, 1], [], []>} : vector<8x128xbf16>, vector<128x384xbf16>, vector<8x384xf32> -> vector<8x384xf32>
    %628 = arith.addf %627, %17 : vector<8x384xf32>
    %629 = vector.extract_strided_slice %624 {offsets = [0, 0], sizes = [8, 128], strides = [1, 1]} : vector<8x384xf32> to vector<8x128xf32>
    %630 = vector.extract_strided_slice %628 {offsets = [0, 0], sizes = [8, 128], strides = [1, 1]} : vector<8x384xf32> to vector<8x128xf32>
    %631 = arith.addf %629, %630 : vector<8x128xf32>
    %632 = arith.negf %631 : vector<8x128xf32>
    %633 = math.exp %632 : vector<8x128xf32>
    %cst_215 = arith.constant 1.000000e+00 : f32
    %634 = vector.broadcast %cst_215 : f32 to vector<8x128xf32>
    %635 = arith.addf %634, %633 : vector<8x128xf32>
    %636 = arith.divf %634, %635 : vector<8x128xf32>
    %637 = vector.extract_strided_slice %624 {offsets = [0, 128], sizes = [8, 128], strides = [1, 1]} : vector<8x384xf32> to vector<8x128xf32>
    %638 = vector.extract_strided_slice %628 {offsets = [0, 128], sizes = [8, 128], strides = [1, 1]} : vector<8x384xf32> to vector<8x128xf32>
    %639 = arith.addf %637, %638 : vector<8x128xf32>
    %640 = arith.negf %639 : vector<8x128xf32>
    %641 = math.exp %640 : vector<8x128xf32>
    %cst_216 = arith.constant 1.000000e+00 : f32
    %642 = vector.broadcast %cst_216 : f32 to vector<8x128xf32>
    %643 = arith.addf %642, %641 : vector<8x128xf32>
    %644 = arith.divf %642, %643 : vector<8x128xf32>
    %645 = vector.extract_strided_slice %624 {offsets = [0, 256], sizes = [8, 128], strides = [1, 1]} : vector<8x384xf32> to vector<8x128xf32>
    %646 = vector.extract_strided_slice %628 {offsets = [0, 256], sizes = [8, 128], strides = [1, 1]} : vector<8x384xf32> to vector<8x128xf32>
    %647 = arith.mulf %636, %646 : vector<8x128xf32>
    %648 = arith.addf %645, %647 : vector<8x128xf32>
    %649 = math.tanh %648 : vector<8x128xf32>
    %cst_217 = arith.constant 1.000000e+00 : f32
    %650 = vector.broadcast %cst_217 : f32 to vector<8x128xf32>
    %651 = arith.subf %650, %644 : vector<8x128xf32>
    %652 = arith.mulf %651, %649 : vector<8x128xf32>
    %653 = arith.mulf %644, %571 : vector<8x128xf32>
    %654 = arith.addf %652, %653 : vector<8x128xf32>
    %655 = arith.select %623, %654, %571 : vector<8x128xi1>, vector<8x128xf32>
    %cst_218 = arith.constant 0.000000e+00 : f32
    %656 = vector.broadcast %cst_218 : f32 to vector<8x128xf32>
    %657 = arith.select %623, %655, %656 : vector<8x128xi1>, vector<8x128xf32>
    %c7_219 = arith.constant 7 : index
    %c0_220 = arith.constant 0 : index
    %c0_221 = arith.constant 0 : index
    %658 = vector.load %arg8[%c7_219, %c0_220, %c0_221] : memref<8x8x128xf32, #tpu.memory_space<vmem>>, vector<1x8x128xf32>
    %659 = vector.shape_cast %658 : vector<1x8x128xf32> to vector<8x128xf32>
    %660 = arith.addf %659, %621 : vector<8x128xf32>
    %c7_222 = arith.constant 7 : index
    %c0_223 = arith.constant 0 : index
    %c0_224 = arith.constant 0 : index
    %661 = vector.load %arg8[%c7_222, %c0_223, %c0_224] : memref<8x8x128xf32, #tpu.memory_space<vmem>>, vector<1x8x128xf32>
    %662 = vector.shape_cast %661 : vector<1x8x128xf32> to vector<8x128xf32>
    %663 = vector.shape_cast %660 : vector<8x128xf32> to vector<1x8x128xf32>
    tpu.vector_store %arg8[%c7_222, %c0_223, %c0_224], %663 {strides = array<i32>} : memref<8x8x128xf32, #tpu.memory_space<vmem>>, vector<1x8x128xf32>,
    %c0_225 = arith.constant 0 : index
    %c0_226 = arith.constant 0 : index
    %c0_227 = arith.constant 0 : index
    %664 = vector.load %arg8[%c0_225, %c0_226, %c0_227] : memref<8x8x128xf32, #tpu.memory_space<vmem>>, vector<1x8x128xf32>
    %665 = vector.shape_cast %664 : vector<1x8x128xf32> to vector<8x128xf32>
    %666 = arith.addf %665, %657 : vector<8x128xf32>
    %c0_228 = arith.constant 0 : index
    %c0_229 = arith.constant 0 : index
    %c0_230 = arith.constant 0 : index
    %667 = vector.load %arg8[%c0_228, %c0_229, %c0_230] : memref<8x8x128xf32, #tpu.memory_space<vmem>>, vector<1x8x128xf32>
    %668 = vector.shape_cast %667 : vector<1x8x128xf32> to vector<8x128xf32>
    %669 = vector.shape_cast %666 : vector<8x128xf32> to vector<1x8x128xf32>
    tpu.vector_store %arg8[%c0_228, %c0_229, %c0_230], %669 {strides = array<i32>} : memref<8x8x128xf32, #tpu.memory_space<vmem>>, vector<1x8x128xf32>,
    %c0_231 = arith.constant 0 : index
    %c0_232 = arith.constant 0 : index
    %c0_233 = arith.constant 0 : index
    %670 = vector.load %arg9[%c0_231, %c0_232, %c0_233] : memref<2x8x128xf32, #tpu.memory_space<vmem>>, vector<1x8x128xf32>
    %671 = vector.shape_cast %670 : vector<1x8x128xf32> to vector<8x128xf32>
    %672 = vector.shape_cast %619 : vector<8x128xf32> to vector<1x8x128xf32>
    tpu.vector_store %arg9[%c0_231, %c0_232, %c0_233], %672 {strides = array<i32>} : memref<2x8x128xf32, #tpu.memory_space<vmem>>, vector<1x8x128xf32>,
    %c1_234 = arith.constant 1 : index
    %c0_235 = arith.constant 0 : index
    %c0_236 = arith.constant 0 : index
    %673 = vector.load %arg9[%c1_234, %c0_235, %c0_236] : memref<2x8x128xf32, #tpu.memory_space<vmem>>, vector<1x8x128xf32>
    %674 = vector.shape_cast %673 : vector<1x8x128xf32> to vector<8x128xf32>
    %675 = vector.shape_cast %655 : vector<8x128xf32> to vector<1x8x128xf32>
    tpu.vector_store %arg9[%c1_234, %c0_235, %c0_236], %675 {strides = array<i32>} : memref<2x8x128xf32, #tpu.memory_space<vmem>>, vector<1x8x128xf32>,
    return
  }
}

</mosaic_0001>

<bundles_post_ra>
// kernel: tpu_custom_call.1
= control target key start
LH: loop header
LB: loop body
LE: loop exit
PB: predicated region body
PF: predicated region fallthrough
CT: control target
= control target key end

     0   :  { %15 = vsyncpa [#allocation4], 0  ;;  %s7935_s0 = inlined_call_operand.hbm [shape: f32[8,8,128], index: 0, kind: input, shape index: {}]   ;;  %s7936_s1 = inlined_call_operand.hbm [shape: s32[8,128], index: 1, kind: input, shape index: {}]   ;;  %s7937_s2 = inlined_call_operand.hbm [shape: f32[2,8,128], index: 2, kind: input, shape index: {}]   ;;  %s7938_s3 = inlined_call_operand.hbm [shape: bf16[128,768], index: 3, kind: input, shape index: {}]   ;;  %s7939_s4 = inlined_call_operand.hbm [shape: bf16[128,384], index: 4, kind: input, shape index: {}]   ;;  %s7940_s5 = inlined_call_operand.hbm [shape: bf16[128,384], index: 5, kind: input, shape index: {}]   ;;  %s7941_s6 = inlined_call_operand.vmem [shape: f32[1,768], index: 6, kind: input, shape index: {}]   ;;  %s7942_s7 = inlined_call_operand.vmem [shape: f32[2,1,384], index: 7, kind: input, shape index: {}]   ;;  %s7943_s8 = inlined_call_operand.hbm [shape: f32[8,8,128], index: 8, kind: output, shape index: {0}]   ;;  %s7944_s9 = inlined_call_operand.hbm [shape: f32[2,8,128], index: 9, kind: output, shape index: {1}]  }
   0x1   :  { %16 = vsyncpa [#allocation7], 0 }
   0x2   :  { %17 = vsyncpa [#allocation10], 0 }
   0x3   :  { %18 = vsyncpa [#allocation13], 0 }
   0x4   :  { %19 = vsyncpa [#allocation5], 0 }
   0x5   :  { %20 = vsyncpa [#allocation16], 0  ;;  %s6766_s30 = smov [#allocation6]   ;;  %s6767_s11 = smov [#allocation9]  }
   0x6   :  { %s39_s10 = sshll.u32 %s6766_s30, 4  ;;  %s60_s12 = sshll.u32 %s6767_s11, 4  ;;  %s40_s10 = int_to_ptr.vmem [resolvable:$true] %s39_s10  ;;  %s61_s12 = int_to_ptr.vmem [resolvable:$true] %s60_s12 }
   0x7   :  { %s6602_s13 = scalar_lea.vmem %s40_s10, 128  ;;  %p6607_p1 = scmp.lt.s32.totalorder %s40_s10, %s40_s10 }
   0x8   :  { %p6603_p0 = scmp.ne.s32.totalorder %s40_s10, %s6602_s13  ;;  %p6608_p2 = scmp.lt.s32.totalorder %s6602_s13, %s6602_s13 }
   0xa   :  { %p6609_p3 = por %p6608_p2, %p6607_p1 }
   0xc   :  { %p6610_p4 = pnand %p6609_p3, %p6603_p0 }
   0xe   :  { %6613 = shalt.err (!%p6610_p4)
}
   0xf   :  { %42 = dma.hbm_to_vmem [thread:$0]  %s7936_s1, 128, %s40_s10, [#allocation7]  }
  0x10   :  { %s6622_s16 = scalar_lea.vmem %s61_s12, 6144  ;;  %p6627_p6 = scmp.lt.s32.totalorder %s61_s12, %s61_s12 }
  0x11   :  { %p6623_p5 = scmp.ne.s32.totalorder %s61_s12, %s6622_s16  ;;  %p6628_p7 = scmp.lt.s32.totalorder %s6622_s16, %s6622_s16 }
  0x13   :  { %p6629_p8 = por %p6628_p7, %p6627_p6 }
  0x15   :  { %p6630_p9 = pnand %p6629_p8, %p6623_p5 }
  0x17   :  { %6633 = shalt.err (!%p6630_p9)
}
  0x18   :  { %s6768_s17 = smov 384   ;;  %s6769_s18 = smov 24  }
  0x19   :  { %66 = dma.hbm_to_vmem [thread:$0]  %s7938_s3, 6144, %s61_s12, [#allocation10], %s6768_s17, %s6768_s17, %s6769_s18  }
  0x1a   :  { %s6770_s21 = smov [#allocation3]  }
  0x1b   :  { %s26_s22 = sshll.u32 %s6770_s21, 4  ;;  %s27_s22 = int_to_ptr.vmem [resolvable:$true] %s26_s22 }
  0x1c   :  { %s6642_s23 = scalar_lea.vmem %s27_s22, 1024  ;;  %p6647_p11 = scmp.lt.s32.totalorder %s27_s22, %s27_s22 }
  0x1d   :  { %p6643_p10 = scmp.ne.s32.totalorder %s27_s22, %s6642_s23  ;;  %p6648_p12 = scmp.lt.s32.totalorder %s6642_s23, %s6642_s23 }
  0x1f   :  { %p6649_p13 = por %p6648_p12, %p6647_p11 }
  0x21   :  { %p6650_p0 = pnand %p6649_p13, %p6643_p10 }
  0x23   :  { %6653 = shalt.err (!%p6650_p0)
}
  0x24   :  { %s6771_s1 = smov 128   ;;  %s6772_s24 = smov 8  }
  0x25   :  { %32 = dma.hbm_to_vmem [thread:$0]  %s7935_s0, 1024, %s27_s22, [#allocation4], %s6771_s1, %s6771_s1, %s6772_s24  }
  0x26   :  { %s6773_s3 = smov [#allocation8]   ;;  %s6774_s28 = smov [#allocation11]  }
  0x27   :  { %s48_s27 = sshll.u32 %s6773_s3, 4  ;;  %s72_s29 = sshll.u32 %s6774_s28, 4  ;;  %s49_s27 = int_to_ptr.vmem [resolvable:$true] %s48_s27  ;;  %s73_s29 = int_to_ptr.vmem [resolvable:$true] %s72_s29 }
  0x28   :  { %s6662_s30 = scalar_lea.vmem %s49_s27, 256  ;;  %p6667_p2 = scmp.lt.s32.totalorder %s49_s27, %s49_s27 }
  0x29   :  { %p6663_p1 = scmp.ne.s32.totalorder %s49_s27, %s6662_s30  ;;  %p6668_p3 = scmp.lt.s32.totalorder %s6662_s30, %s6662_s30 }
  0x2b   :  { %p6669_p4 = por %p6668_p3, %p6667_p2 }
  0x2d   :  { %p6670_p5 = pnand %p6669_p4, %p6663_p1 }
  0x2f   :  { %6673 = shalt.err (!%p6670_p5)
}
  0x30   :  { %54 = dma.hbm_to_vmem [thread:$0]  %s7937_s2, 256, %s49_s27, [#allocation7], %s6771_s1, %s6771_s1, %s6772_s24  }
  0x31   :  { %s6682_s0 = scalar_lea.vmem %s73_s29, 3072  ;;  %p6687_p7 = scmp.lt.s32.totalorder %s73_s29, %s73_s29 }
  0x32   :  { %p6683_p6 = scmp.ne.s32.totalorder %s73_s29, %s6682_s0  ;;  %p6688_p8 = scmp.lt.s32.totalorder %s6682_s0, %s6682_s0 }
  0x34   :  { %p6689_p9 = por %p6688_p8, %p6687_p7 }
  0x36   :  { %p6690_p10 = pnand %p6689_p9, %p6683_p6 }
  0x38   :  { %6693 = shalt.err (!%p6690_p10)
}
  0x39   :  { %s6775_s12 = smov 192   ;;  %s6776_s13 = smov 12  }
  0x3a   :  { %78 = dma.hbm_to_vmem [thread:$0]  %s7939_s4, 3072, %s73_s29, [#allocation10], %s6775_s12, %s6775_s12, %s6776_s13  }
  0x3b   :  { %s6777_s16 = smov [#allocation12]  }
  0x3c   :  { %s84_s17 = sshll.u32 %s6777_s16, 4  ;;  %s85_s17 = int_to_ptr.vmem [resolvable:$true] %s84_s17 }
  0x3d   :  { %s6702_s18 = scalar_lea.vmem %s85_s17, 3072  ;;  %p6707_p12 = scmp.lt.s32.totalorder %s85_s17, %s85_s17 }
  0x3e   :  { %p6703_p11 = scmp.ne.s32.totalorder %s85_s17, %s6702_s18  ;;  %p6708_p13 = scmp.lt.s32.totalorder %s6702_s18, %s6702_s18 }
  0x40   :  { %p6709_p0 = por %p6708_p13, %p6707_p12 }
  0x42   :  { %p6710_p1 = pnand %p6709_p0, %p6703_p11 }
  0x44   :  { %6713 = shalt.err (!%p6710_p1)
}
  0x45   :  { %90 = dma.hbm_to_vmem [thread:$0]  %s7940_s5, 3072, %s85_s17, [#allocation13], %s6775_s12, %s6775_s12, %s6776_s13  }
  0x46   :  { %6754 = dma.done.wait [#allocation4], 1024  }
  0x47   :  { %6755 = vsyncadd [#allocation4], 4294966272 }
  0x48   :  { %6756 = dma.done.wait [#allocation7], 384  }
  0x49   :  { %6757 = vsyncadd [#allocation7], 4294966912 }
  0x4a   :  { %6758 = dma.done.wait [#allocation10], 9216  }
  0x4b   :  { %6759 = vsyncadd [#allocation10], 4294958080 }
  0x4c   :  { %6760 = dma.done.wait [#allocation13], 3072  }
  0x4d   :  { %6761 = vsyncadd [#allocation13], 4294964224  ;;  %v7945_v0 = vmov 0   ;;  %v6072_v1 = vld [vmem:[#allocation9 + $0x154] ss:$24 sps:$4 sm:$0xff]   ;;  %v116_v44 = vld [vmem:[#allocation3 + $0x10] sm:$0xff] }
  0x4e   :  { %478 = vmatprep.mubr.bf16.mxu0 %v7945_v0  ;;  %551 = vmatprep.mubr.bf16.mxu1 %v7945_v0  ;;  %v6074_v2 = vld [vmem:[#allocation9 + $0x15c] ss:$24 sps:$4 sm:$0xff]   ;;  %v6076_v3 = vld [vmem:[#allocation9 + $0x150] ss:$24 sps:$4 sm:$0xff]   ;;  %v6080_v6 = vld [vmem:[#allocation9 + $0x12c] ss:$24 sps:$4 sm:$0xff]  }
  0x4f   :  { %446 = vmatprep.subr.bf16.mxu0 %v6072_v1  ;;  %v6077_v4 = vld [vmem:[#allocation9 + $0x158] ss:$24 sps:$4 sm:$0xff]   ;;  %519 = vmatprep.subr.bf16.mxu1 %v6074_v2  ;;  %v6078_v5 = vld [vmem:[#allocation9 + $0x124] ss:$24 sps:$4 sm:$0xff]   ;;  %v6083_v8 = vld [vmem:[#allocation9 + $0x128] ss:$24 sps:$4 sm:$0xff]  }
  0x50   :  { %447 = vmatpush1.bf16.msra.mxu0 %v6076_v3  ;;  %520 = vmatpush1.bf16.msra.mxu1 %v6077_v4  ;;  %v6082_v7 = vld [vmem:[#allocation9 + $0x120] ss:$24 sps:$4 sm:$0xff]   ;;  %v6084_v9 = vld [vmem:[#allocation9 + $0xf4] ss:$24 sps:$4 sm:$0xff]   ;;  %v6088_v11 = vld [vmem:[#allocation9 + $0xf0] ss:$24 sps:$4 sm:$0xff]  }
  0x51   :  { %448 = vmatprep.subr.bf16.mxu0 %v6078_v5  ;;  %521 = vmatprep.subr.bf16.mxu1 %v6080_v6  ;;  %v6086_v10 = vld [vmem:[#allocation9 + $0xfc] ss:$24 sps:$4 sm:$0xff]   ;;  %v6089_v12 = vld [vmem:[#allocation9 + $0xf8] ss:$24 sps:$4 sm:$0xff]   ;;  %v6092_v14 = vld [vmem:[#allocation9 + $0xcc] ss:$24 sps:$4 sm:$0xff]  }
  0x52   :  { %v6090_v13 = vld [vmem:[#allocation9 + $0xc4] ss:$24 sps:$4 sm:$0xff]   ;;  %v6094_v15 = vld [vmem:[#allocation9 + $0xc0] ss:$24 sps:$4 sm:$0xff]   ;;  %v6096_v17 = vld [vmem:[#allocation9 + $0x94] ss:$24 sps:$4 sm:$0xff]  }
  0x53   :  { %v6095_v16 = vld [vmem:[#allocation9 + $0xc8] ss:$24 sps:$4 sm:$0xff]   ;;  %v6098_v18 = vld [vmem:[#allocation9 + $0x9c] ss:$24 sps:$4 sm:$0xff]   ;;  %v6101_v20 = vld [vmem:[#allocation9 + $0x98] ss:$24 sps:$4 sm:$0xff]  }
  0x54   :  { %449 = vmatpush1.bf16.msra.mxu0 %v6082_v7  ;;  %522 = vmatpush1.bf16.msra.mxu1 %v6083_v8  ;;  %v6100_v19 = vld [vmem:[#allocation9 + $0x90] ss:$24 sps:$4 sm:$0xff]   ;;  %v6102_v21 = vld [vmem:[#allocation9 + $0x64] ss:$24 sps:$4 sm:$0xff]   ;;  %v6106_v23 = vld [vmem:[#allocation9 + $0x60] ss:$24 sps:$4 sm:$0xff]  }
  0x55   :  { %450 = vmatprep.subr.bf16.mxu0 %v6084_v9  ;;  %523 = vmatprep.subr.bf16.mxu1 %v6086_v10  ;;  %v6104_v22 = vld [vmem:[#allocation9 + $0x6c] ss:$24 sps:$4 sm:$0xff]   ;;  %v6107_v24 = vld [vmem:[#allocation9 + $0x68] ss:$24 sps:$4 sm:$0xff]   ;;  %v6110_v26 = vld [vmem:[#allocation9 + $0x3c] ss:$24 sps:$4 sm:$0xff]  }
  0x56   :  { %v6108_v25 = vld [vmem:[#allocation9 + $0x34] ss:$24 sps:$4 sm:$0xff]   ;;  %v6112_v27 = vld [vmem:[#allocation9 + $0x30] ss:$24 sps:$4 sm:$0xff]   ;;  %v6114_v29 = vld [vmem:[#allocation9 + $0x4] ss:$24 sps:$4 sm:$0xff]  }
  0x57   :  { %v6113_v28 = vld [vmem:[#allocation9 + $0x38] ss:$24 sps:$4 sm:$0xff]   ;;  %v6116_v30 = vld [vmem:[#allocation9 + $0xc] ss:$24 sps:$4 sm:$0xff]   ;;  %v6119_v32 = vld [vmem:[#allocation9 + $0x8] ss:$24 sps:$4 sm:$0xff]  }
  0x58   :  { %451 = vmatpush1.bf16.msra.mxu0 %v6088_v11  ;;  %524 = vmatpush1.bf16.msra.mxu1 %v6089_v12  ;;  %v6118_v31 = vld [vmem:[#allocation9] ss:$24 sps:$4 sm:$0xff]   ;;  %v114_v33 = vld [vmem:[#allocation3] sm:$0xff]  ;;  %v115_v34 = vld [vmem:[#allocation3 + $0x8] sm:$0xff]  ;;  %vm6780_vm0 = vmmov 0   ;;  %s6782_s25 = smov [#allocation14]  }
  0x59   :  { %452 = vmatprep.subr.bf16.mxu0 %v6090_v13  ;;  %525 = vmatprep.subr.bf16.mxu1 %v6092_v14  ;;  %v6122_v35 = vld [vmem:[#allocation9 + $0x164] ss:$24 sps:$4 sm:$0xff]   ;;  %v6859_v36 = vld [vmem:[#allocation11 + $0xac] ss:$12 sps:$4 sm:$0xff]   ;;  %v6861_v37 = vpack.c.bf16 %v115_v34, %v114_v33  ;;  %v6863_v39 = vld [vmem:[#allocation11 + $0xa8] ss:$12 sps:$4 sm:$0xff]  }
  0x5a   :  { %v6120_v38 = vld [vmem:[#allocation9 + $0x160] ss:$24 sps:$4 sm:$0xff]   ;;  %v6128_v40 = vld [vmem:[#allocation9 + $0x134] ss:$24 sps:$4 sm:$0xff]   ;;  %v6126_v42 = vld [vmem:[#allocation9 + $0x130] ss:$24 sps:$4 sm:$0xff]  }
  0x5b   :  { %v6866_v41 = vld [vmem:[#allocation11 + $0x94] ss:$12 sps:$4 sm:$0xff]   ;;  %v6870_v43 = vld [vmem:[#allocation11 + $0x90] ss:$12 sps:$4 sm:$0xff]   ;;  %v6880_v50 = vld [vmem:[#allocation11 + $0x78] ss:$12 sps:$4 sm:$0xff]  }
  0x5c   :  { %453 = vmatpush1.bf16.msra.mxu0 %v6094_v15  ;;  %526 = vmatpush1.bf16.msra.mxu1 %v6095_v16  ;;  %v117_v45 = vld [vmem:[#allocation3 + $0x18] sm:$0xff]  ;;  %v6874_v47 = vld [vmem:[#allocation11 + $0x7c] ss:$12 sps:$4 sm:$0xff]   ;;  %v6140_v51 = vld [vmem:[#allocation9 + $0xd4] ss:$24 sps:$4 sm:$0xff]   ;;  %s5095_s26 = sshll.u32 %s6782_s25, 4  ;;  %s5096_s26 = int_to_ptr.vmem [resolvable:$true] %s5095_s26 }
  0x5d   :  { %454 = vmatprep.subr.bf16.mxu0 %v6096_v17  ;;  %527 = vmatprep.subr.bf16.mxu1 %v6098_v18  ;;  %v6134_v46 = vld [vmem:[#allocation9 + $0x104] ss:$24 sps:$4 sm:$0xff]   ;;  %v6878_v48 = vpack.c.bf16 %v117_v45, %v116_v44  ;;  %v6132_v49 = vld [vmem:[#allocation9 + $0x100] ss:$24 sps:$4 sm:$0xff]   ;;  %v6138_v53 = vld [vmem:[#allocation9 + $0xd0] ss:$24 sps:$4 sm:$0xff]  }
  0x5e   :  { %v6884_v52 = vld [vmem:[#allocation11 + $0x64] ss:$12 sps:$4 sm:$0xff]   ;;  %v6888_v54 = vld [vmem:[#allocation11 + $0x60] ss:$12 sps:$4 sm:$0xff]   ;;  %v6898_v61 = vld [vmem:[#allocation11 + $0x48] ss:$12 sps:$4 sm:$0xff]  }
  0x5f   :  { %v118_v55 = vld [vmem:[#allocation3 + $0x20] sm:$0xff]  ;;  %v119_v56 = vld [vmem:[#allocation3 + $0x28] sm:$0xff]  ;;  %v6146_v57 = vld [vmem:[#allocation9 + $0xa4] ss:$24 sps:$4 sm:$0xff]  }
  0x60   :  { %455 = vmatpush1.bf16.msra.mxu0 %v6100_v19  ;;  %528 = vmatpush1.bf16.msra.mxu1 %v6101_v20  ;;  %v6892_v58 = vld [vmem:[#allocation11 + $0x4c] ss:$12 sps:$4 sm:$0xff]   ;;  %v6896_v60 = vpack.c.bf16 %v119_v56, %v118_v55  ;;  %v6902_v63 = vld [vmem:[#allocation11 + $0x34] ss:$12 sps:$4 sm:$0xff]   ;;  %v6150_v1 = vld [vmem:[#allocation9 + $0x70] ss:$24 sps:$4 sm:$0xff]  }
  0x61   :  { %456 = vmatprep.subr.bf16.mxu0 %v6102_v21  ;;  %529 = vmatprep.subr.bf16.mxu1 %v6104_v22  ;;  %v6144_v59 = vld [vmem:[#allocation9 + $0xa0] ss:$24 sps:$4 sm:$0xff]   ;;  %v6152_v62 = vld [vmem:[#allocation9 + $0x74] ss:$24 sps:$4 sm:$0xff]   ;;  %v6906_v2 = vld [vmem:[#allocation11 + $0x30] ss:$12 sps:$4 sm:$0xff]  }
  0x62   :  { %v120_v3 = vld [vmem:[#allocation3 + $0x30] sm:$0xff]  ;;  %v121_v4 = vld [vmem:[#allocation3 + $0x38] sm:$0xff]  ;;  %v6164_v10 = vld [vmem:[#allocation9 + $0x14] ss:$24 sps:$4 sm:$0xff]   ;;  %v7947_v19 = vmov 0.0  }
  0x63   :  { %v6158_v5 = vld [vmem:[#allocation9 + $0x44] ss:$24 sps:$4 sm:$0xff]   ;;  %v6156_v7 = vld [vmem:[#allocation9 + $0x40] ss:$24 sps:$4 sm:$0xff]   ;;  %v6914_v8 = vpack.c.bf16 %v121_v4, %v120_v3  ;;  %v6162_v12 = vld [vmem:[#allocation9 + $0x10] ss:$24 sps:$4 sm:$0xff]  }
  0x64   :  { %457 = vmatpush1.bf16.msra.mxu0 %v6106_v23  ;;  %530 = vmatpush1.bf16.msra.mxu1 %v6107_v24  ;;  %v6910_v6 = vld [vmem:[#allocation11 + $0x1c] ss:$12 sps:$4 sm:$0xff]   ;;  %v6916_v9 = vld [vmem:[#allocation11 + $0x18] ss:$12 sps:$4 sm:$0xff]   ;;  %v6925_v13 = vld [vmem:[#allocation11] ss:$12 sps:$4 sm:$0xff]  }
  0x65   :  { %458 = vmatprep.subr.bf16.mxu0 %v6108_v25  ;;  %531 = vmatprep.subr.bf16.mxu1 %v6110_v26  ;;  %v6920_v11 = vld [vmem:[#allocation11 + $0x4] ss:$12 sps:$4 sm:$0xff]   ;;  %v6928_v15 = vld [vmem:[#allocation12 + $0xac] ss:$12 sps:$4 sm:$0xff]   ;;  %v6168_v17 = vld [vmem:[#allocation12 + $0xa8] ss:$12 sps:$4 sm:$0xff]  }
  0x66   :  { %v749_v14 = vld [vmem:[#allocation8] sm:$0xff]  ;;  %v6175_v22 = vld [vmem:[#allocation11 + $0x98] ss:$12 sps:$4 sm:$0xff]   ;;  %v6178_v23 = vld [vmem:[#allocation12 + $0x7c] ss:$12 sps:$4 sm:$0xff]  }
  0x67   :  { %v6932_v16 = vpack.c.bf16 %v749_v14, %v749_v14  ;;  %v6171_v18 = vld [vmem:[#allocation11 + $0xb0] ss:$12 sps:$4 sm:$0xff]   ;;  %v6174_v20 = vld [vmem:[#allocation12 + $0x94] ss:$12 sps:$4 sm:$0xff]   ;;  %v6176_v24 = vld [vmem:[#allocation12 + $0x78] ss:$12 sps:$4 sm:$0xff]  }
  0x68   :  { %459 = vmatpush1.bf16.msra.mxu0 %v6112_v27  ;;  %532 = vmatpush1.bf16.msra.mxu1 %v6113_v28  ;;  %v6172_v21 = vld [vmem:[#allocation12 + $0x90] ss:$12 sps:$4 sm:$0xff]   ;;  %v6179_v25 = vld [vmem:[#allocation11 + $0x80] ss:$12 sps:$4 sm:$0xff]   ;;  %v6183_v28 = vld [vmem:[#allocation11 + $0x68] ss:$12 sps:$4 sm:$0xff]  }
  0x69   :  { %460 = vmatprep.subr.bf16.mxu0 %v6114_v29  ;;  %533 = vmatprep.subr.bf16.mxu1 %v6116_v30  ;;  %v6182_v26 = vld [vmem:[#allocation12 + $0x64] ss:$12 sps:$4 sm:$0xff]   ;;  %v6180_v27 = vld [vmem:[#allocation12 + $0x60] ss:$12 sps:$4 sm:$0xff]   ;;  %v6184_v30 = vld [vmem:[#allocation12 + $0x48] ss:$12 sps:$4 sm:$0xff]  }
  0x6a   :  { %v6186_v29 = vld [vmem:[#allocation12 + $0x4c] ss:$12 sps:$4 sm:$0xff]   ;;  %v6188_v33 = vld [vmem:[#allocation12 + $0x30] ss:$12 sps:$4 sm:$0xff]   ;;  %v6199_v44 = vld [vmem:[#allocation11 + $0x8] ss:$12 sps:$4 sm:$0xff]  }
  0x6b   :  { %v6191_v34 = vld [vmem:[#allocation11 + $0x38] ss:$12 sps:$4 sm:$0xff]   ;;  %v6212_v55 = vld [vmem:[#allocation11 + $0x50] ss:$12 sps:$4 sm:$0xff]  }
  0x6c   :  { %461 = vmatpush1.bf16.msra.mxu0 %v6118_v31  ;;  %534 = vmatpush1.bf16.msra.mxu1 %v6119_v32  ;;  %v6187_v31 = vld [vmem:[#allocation11 + $0x50] ss:$12 sps:$4 sm:$0xff]   ;;  %v6190_v32 = vld [vmem:[#allocation12 + $0x34] ss:$12 sps:$4 sm:$0xff]   ;;  %v6213_v56 = vld [vmem:[#allocation11 + $0x38] ss:$12 sps:$4 sm:$0xff]  }
  0x6d   :  { %592 = vmatprep.subr.bf16.mxu0 %v6122_v35  ;;  %917 = vmatprep.subr.bf16.mxu1 %v6859_v36  ;;  %v6194_v35 = vld [vmem:[#allocation12 + $0x1c] ss:$12 sps:$4 sm:$0xff]  }
  0x6e   :  { %v751_v45 = vld [vmem:[#allocation8 + $0x8] sm:$0xff] }
  0x6f   :  { %479 = vmatmul.mubr.bf16.vlgmr.msra.gmra.mxu0 %v6861_v37  ;;  %552 = vmatmul.mubr.bf16.vlgmr.msra.gmra.mxu1 %v6861_v37 }
  0x70   :  { %593 = vmatpush1.bf16.msra.mxu0 %v6120_v38  ;;  %918 = vmatpush1.bf16.msra.mxu1 %v6863_v39  ;;  %v6195_v38 = vld [vmem:[#allocation11 + $0x20] ss:$12 sps:$4 sm:$0xff]  }
  0x71   :  { %594 = vmatprep.subr.bf16.mxu0 %v6128_v40  ;;  %919 = vmatprep.subr.bf16.mxu1 %v6866_v41  ;;  %v6198_v40 = vld [vmem:[#allocation12 + $0x4] ss:$12 sps:$4 sm:$0xff]  }
  0x72   :  { %488 = vmatprep.mubr.bf16.mxu0 %v7945_v0  ;;  %561 = vmatprep.mubr.bf16.mxu1 %v7945_v0 }
  0x74   :  { %595 = vmatpush1.bf16.msra.mxu0 %v6126_v42  ;;  %920 = vmatpush1.bf16.msra.mxu1 %v6870_v43  ;;  %v6196_v42 = vld [vmem:[#allocation12] ss:$12 sps:$4 sm:$0xff]  }
  0x75   :  { %596 = vmatprep.subr.bf16.mxu0 %v6134_v46  ;;  %921 = vmatprep.subr.bf16.mxu1 %v6874_v47  ;;  %v6200_v46 = vld [vmem:[#allocation12 + $0xb0] ss:$12 sps:$4 sm:$0xff]  }
  0x77   :  { %489 = vmatmul.mubr.bf16.gmra.mxu0 %v6878_v48  ;;  %562 = vmatmul.mubr.bf16.gmra.mxu1 %v6878_v48 }
  0x78   :  { %597 = vmatpush1.bf16.msra.mxu0 %v6132_v49  ;;  %922 = vmatpush1.bf16.msra.mxu1 %v6880_v50  ;;  %v6201_v49 = vld [vmem:[#allocation12 + $0x98] ss:$12 sps:$4 sm:$0xff]  }
  0x79   :  { %598 = vmatprep.subr.bf16.mxu0 %v6140_v51  ;;  %923 = vmatprep.subr.bf16.mxu1 %v6884_v52  ;;  %v6202_v51 = vld [vmem:[#allocation12 + $0x80] ss:$12 sps:$4 sm:$0xff]  }
  0x7a   :  { %498 = vmatprep.mubr.bf16.mxu0 %v7945_v0  ;;  %571 = vmatprep.mubr.bf16.mxu1 %v7945_v0 }
  0x7c   :  { %599 = vmatpush1.bf16.msra.mxu0 %v6138_v53  ;;  %924 = vmatpush1.bf16.msra.mxu1 %v6888_v54  ;;  %v6204_v53 = vld [vmem:[#allocation12 + $0x50] ss:$12 sps:$4 sm:$0xff]  }
  0x7d   :  { %600 = vmatprep.subr.bf16.mxu0 %v6146_v57  ;;  %925 = vmatprep.subr.bf16.mxu1 %v6892_v58  ;;  %v6214_v57 = vld [vmem:[#allocation11 + $0x20] ss:$12 sps:$4 sm:$0xff]  }
  0x7f   :  { %499 = vmatmul.mubr.bf16.gmra.mxu0 %v6896_v60  ;;  %572 = vmatmul.mubr.bf16.gmra.mxu1 %v6896_v60 }
  0x80   :  { %601 = vmatpush1.bf16.msra.mxu0 %v6144_v59  ;;  %926 = vmatpush1.bf16.msra.mxu1 %v6898_v61  ;;  %v176_v59 = vlaneseq }
  0x81   :  { %602 = vmatprep.subr.bf16.mxu0 %v6152_v62  ;;  %927 = vmatprep.subr.bf16.mxu1 %v6902_v63  ;;  %v7001_v62 = vld [vmem:[%s7941_s6] sm:$0x3f] }
  0x82   :  { %508 = vmatprep.mubr.bf16.mxu0 %v7945_v0  ;;  %581 = vmatprep.mubr.bf16.mxu1 %v7945_v0 }
  0x84   :  { %603 = vmatpush1.bf16.msra.mxu0 %v6150_v1  ;;  %928 = vmatpush1.bf16.msra.mxu1 %v6906_v2 }
  0x85   :  { %604 = vmatprep.subr.bf16.mxu0 %v6158_v5  ;;  %929 = vmatprep.subr.bf16.mxu1 %v6910_v6 }
  0x87   :  { %509 = vmatmul.mubr.bf16.gmra.mxu0 %v6914_v8  ;;  %582 = vmatmul.mubr.bf16.gmra.mxu1 %v6914_v8 }
  0x88   :  { %605 = vmatpush1.bf16.msra.mxu0 %v6156_v7  ;;  %930 = vmatpush1.bf16.msra.mxu1 %v6916_v9 }
  0x89   :  { %606 = vmatprep.subr.bf16.mxu0 %v6164_v10  ;;  %931 = vmatprep.subr.bf16.mxu1 %v6920_v11 }
  0x8a   :  { %624 = vmatprep.mubr.bf16.mxu0 %v7945_v0  ;;  %949 = vmatprep.mubr.bf16.mxu1 %v7945_v0 }
  0x8c   :  { %607 = vmatpush1.bf16.msra.mxu0 %v6162_v12  ;;  %932 = vmatpush1.bf16.msra.mxu1 %v6925_v13 }
  0x8d   :  { %5735 = vmatprep.subr.bf16.mxu0 %v7947_v19  ;;  %1186 = vmatprep.subr.bf16.mxu1 %v6928_v15 }
  0x8f   :  { %625 = vmatmul.mubr.bf16.vlgmr.msra.gmra.mxu0 %v6861_v37  ;;  %950 = vmatmul.mubr.bf16.vlgmr.msra.gmra.mxu1 %v6932_v16  ;;  %v6192_v37 = vld [vmem:[#allocation12 + $0x18] ss:$12 sps:$4 sm:$0xff]  }
  0x90   :  { %5736 = vmatpush3.bf16.msra.mxu0 %v6171_v18  ;;  %1187 = vmatpush1.bf16.msra.mxu1 %v6168_v17 }
  0x91   :  { %5737 = vmatprep.subr.bf16.mxu0 %v7947_v19  ;;  %1188 = vmatprep.subr.bf16.mxu1 %v6174_v20 }
  0x92   :  { %634 = vmatprep.mubr.bf16.mxu0 %v7945_v0  ;;  %1218 = vmatprep.mubr.bf16.mxu1 %v7945_v0 }
  0x94   :  { %5738 = vmatpush3.bf16.msra.mxu0 %v6175_v22  ;;  %1189 = vmatpush1.bf16.msra.mxu1 %v6172_v21 }
  0x95   :  { %5739 = vmatprep.subr.bf16.mxu0 %v7947_v19  ;;  %1190 = vmatprep.subr.bf16.mxu1 %v6178_v23 }
  0x97   :  { %635 = vmatmul.mubr.bf16.gmra.mxu0 %v6878_v48  ;;  %v1025_v48 = vpack.c.bf16 %v751_v45, %v751_v45 }
  0x98   :  { %5740 = vmatpush3.bf16.msra.mxu0 %v6179_v25  ;;  %1191 = vmatpush1.bf16.msra.mxu1 %v6176_v24 }
  0x99   :  { %5741 = vmatprep.subr.bf16.mxu0 %v7947_v19  ;;  %1192 = vmatprep.subr.bf16.mxu1 %v6182_v26 }
  0x9a   :  { %644 = vmatprep.mubr.bf16.mxu0 %v7945_v0 }
  0x9c   :  { %5742 = vmatpush3.bf16.msra.mxu0 %v6183_v28  ;;  %1193 = vmatpush1.bf16.msra.mxu1 %v6180_v27 }
  0x9d   :  { %5743 = vmatprep.subr.bf16.mxu0 %v7947_v19  ;;  %1194 = vmatprep.subr.bf16.mxu1 %v6186_v29 }
  0x9f   :  { %645 = vmatmul.mubr.bf16.gmra.mxu0 %v6896_v60  ;;  %v6995_v60 = vshrl.u32 %v176_v59, 7 }
  0xa0   :  { %5744 = vmatpush3.bf16.msra.mxu0 %v6187_v31  ;;  %1195 = vmatpush1.bf16.msra.mxu1 %v6184_v30 }
  0xa1   :  { %5745 = vmatprep.subr.bf16.mxu0 %v7947_v19  ;;  %1196 = vmatprep.subr.bf16.mxu1 %v6190_v32  ;;  %v7007_v1 = vsub.s32 2, %v6995_v60 }
  0xa2   :  { %654 = vmatprep.mubr.bf16.mxu0 %v7945_v0 }
  0xa4   :  { %5746 = vmatpush3.bf16.msra.mxu0 %v6191_v34  ;;  %1197 = vmatpush1.bf16.msra.mxu1 %v6188_v33 }
  0xa5   :  { %5747 = vmatprep.subr.bf16.mxu0 %v7947_v19  ;;  %1198 = vmatprep.subr.bf16.mxu1 %v6194_v35 }
  0xa7   :  { %655 = vmatmul.mubr.bf16.gmra.mxu0 %v6914_v8 }
  0xa8   :  { %5748 = vmatpush3.bf16.msra.mxu0 %v6195_v38  ;;  %1199 = vmatpush1.bf16.msra.mxu1 %v6192_v37 }
  0xa9   :  { %5749 = vmatprep.subr.bf16.mxu0 %v7947_v19  ;;  %1200 = vmatprep.subr.bf16.mxu1 %v6198_v40 }
  0xaa   :  { %5751 = vmatprep.mubr.msk.bf16.mxu0 %vm6780_vm0, %v7947_v19 }
  0xac   :  { %5750 = vmatpush3.bf16.msra.mxu0 %v6199_v44  ;;  %1201 = vmatpush1.bf16.msra.mxu1 %v6196_v42 }
  0xad   :  { %5755 = vmatprep.subr.bf16.mxu0 %v7947_v19  ;;  %1458 = vmatprep.subr.bf16.mxu1 %v6859_v36  ;;  %v6203_v36 = vld [vmem:[#allocation12 + $0x68] ss:$12 sps:$4 sm:$0xff]  }
  0xaf   :  { %5752 = vmatmul.mubr.bf16.vlgmr.msra.gmra.mxu0 %v6932_v16  ;;  %1219 = vmatmul.mubr.bf16.vlgmr.msra.gmra.mxu1 %v1025_v48 }
  0xb0   :  { %5756 = vmatpush3.bf16.msra.mxu0 %v6200_v46  ;;  %5771 = vmatprep.mubr.msk.bf16.mxu0 %vm6780_vm0, %v7947_v19 }
  0xb1   :  { %5757 = vmatprep.subr.bf16.mxu0 %v7947_v19  ;;  %1459 = vmatpush1.bf16.msra.mxu1 %v6863_v39  ;;  %v6205_v39 = vld [vmem:[#allocation12 + $0x38] ss:$12 sps:$4 sm:$0xff]  }
  0xb2   :  { %1460 = vmatprep.subr.bf16.mxu1 %v6866_v41  ;;  %1490 = vmatprep.mubr.bf16.mxu1 %v7945_v0  ;;  %v6206_v41 = vld [vmem:[#allocation12 + $0x20] ss:$12 sps:$4 sm:$0xff]  }
  0xb4   :  { %5758 = vmatpush3.bf16.msra.mxu0 %v6201_v49 }
  0xb5   :  { %5759 = vmatprep.subr.bf16.mxu0 %v7947_v19  ;;  %1461 = vmatpush1.bf16.msra.mxu1 %v6870_v43  ;;  %v6207_v43 = vld [vmem:[#allocation12 + $0x8] ss:$12 sps:$4 sm:$0xff]  }
  0xb6   :  { %1462 = vmatprep.subr.bf16.mxu1 %v6874_v47  ;;  %v6208_v47 = vld [vmem:[#allocation11 + $0xb0] ss:$12 sps:$4 sm:$0xff]  }
  0xb8   :  { %5760 = vmatpush3.bf16.msra.mxu0 %v6202_v51 }
  0xb9   :  { %5761 = vmatprep.subr.bf16.mxu0 %v7947_v19  ;;  %1463 = vmatpush1.bf16.msra.mxu1 %v6880_v50  ;;  %v6209_v50 = vld [vmem:[#allocation11 + $0x98] ss:$12 sps:$4 sm:$0xff]  }
  0xba   :  { %1464 = vmatprep.subr.bf16.mxu1 %v6884_v52  ;;  %v6210_v52 = vld [vmem:[#allocation11 + $0x80] ss:$12 sps:$4 sm:$0xff]  }
  0xbc   :  { %5762 = vmatpush3.bf16.msra.mxu0 %v6203_v36 }
  0xbd   :  { %5763 = vmatprep.subr.bf16.mxu0 %v7947_v19  ;;  %1465 = vmatpush1.bf16.msra.mxu1 %v6888_v54  ;;  %v6211_v54 = vld [vmem:[#allocation11 + $0x68] ss:$12 sps:$4 sm:$0xff]  }
  0xbe   :  { %1466 = vmatprep.subr.bf16.mxu1 %v6892_v58  ;;  %v6215_v58 = vld [vmem:[#allocation11 + $0x8] ss:$12 sps:$4 sm:$0xff]  }
  0xc0   :  { %5764 = vmatpush3.bf16.msra.mxu0 %v6204_v53 }
  0xc1   :  { %5765 = vmatprep.subr.bf16.mxu0 %v7947_v19  ;;  %1467 = vmatpush1.bf16.msra.mxu1 %v6898_v61  ;;  %v190_v61 = vsub.s32 3, %v6995_v60 }
  0xc2   :  { %1468 = vmatprep.subr.bf16.mxu1 %v6902_v63  ;;  %v7004_v63 = vsub.s32 0, %v6995_v60 }
  0xc4   :  { %5766 = vmatpush3.bf16.msra.mxu0 %v6205_v39  ;;  %v7018_v5 = vrot.slane %v7001_v62, %v7004_v63 }
  0xc5   :  { %5767 = vmatprep.subr.bf16.mxu0 %v7947_v19  ;;  %1469 = vmatpush1.bf16.msra.mxu1 %v6906_v2  ;;  %v7010_v2 = vrot.slane %v7001_v62, %v190_v61  ;;  %v714_v61 = vld [vmem:[%s7942_s7] sm:$0x7] }
  0xc6   :  { %1470 = vmatprep.subr.bf16.mxu1 %v6910_v6  ;;  %v7021_v6 = vsub.s32 1, %v6995_v60 }
  0xc8   :  { %5768 = vmatpush3.bf16.msra.mxu0 %v6206_v41 }
  0xc9   :  { %5769 = vmatprep.subr.bf16.mxu0 %v7947_v19  ;;  %1471 = vmatpush1.bf16.msra.mxu1 %v6916_v9  ;;  %v7027_v9 = vrot.slane %v7001_v62, %v7007_v1 }
  0xca   :  { %1472 = vmatprep.subr.bf16.mxu1 %v6920_v11 }
  0xcc   :  { %5770 = vmatpush3.bf16.msra.mxu0 %v6207_v43 }
  0xcd   :  { %5775 = vmatprep.subr.bf16.mxu0 %v7947_v19  ;;  %1473 = vmatpush1.bf16.msra.mxu1 %v6925_v13  ;;  %v7034_v13 = vrot.slane %v7001_v62, %v7021_v6 }
  0xce   :  { %1727 = vmatprep.subr.bf16.mxu1 %v6928_v15 }
  0xcf   :  { %5772 = vmatmul.mubr.bf16.vlgmr.msra.gmra.mxu0 %v1025_v48 }
  0xd0   :  { %5791 = vmatprep.mubr.msk.bf16.mxu0 %vm6780_vm0, %v7947_v19  ;;  %5776 = vmatpush3.bf16.msra.mxu0 %v6208_v47 }
  0xd1   :  { %5777 = vmatprep.subr.bf16.mxu0 %v7947_v19 }
  0xd4   :  { %5778 = vmatpush3.bf16.msra.mxu0 %v6209_v50 }
  0xd5   :  { %5779 = vmatprep.subr.bf16.mxu0 %v7947_v19 }
  0xd8   :  { %5780 = vmatpush3.bf16.msra.mxu0 %v6210_v52 }
  0xd9   :  { %5781 = vmatprep.subr.bf16.mxu0 %v7947_v19 }
  0xdc   :  { %5782 = vmatpush3.bf16.msra.mxu0 %v6211_v54 }
  0xdd   :  { %5783 = vmatprep.subr.bf16.mxu0 %v7947_v19 }
  0xe0   :  { %5784 = vmatpush3.bf16.msra.mxu0 %v6212_v55 }
  0xe1   :  { %5785 = vmatprep.subr.bf16.mxu0 %v7947_v19 }
  0xe4   :  { %5786 = vmatpush3.bf16.msra.mxu0 %v6213_v56 }
  0xe5   :  { %5787 = vmatprep.subr.bf16.mxu0 %v7947_v19 }
  0xe8   :  { %5788 = vmatpush3.bf16.msra.mxu0 %v6214_v57  ;;  %v194_v57 = vsub.s32 4, %v6995_v60 }
  0xe9   :  { %5789 = vmatprep.subr.bf16.mxu0 %v7947_v19 }
  0xec   :  { %5790 = vmatpush3.bf16.msra.mxu0 %v6215_v58 }
  0xed   :  { %5795 = vmatprep.subr.bf16.mxu0 %v7947_v19 }
 0x12f   :  { %v7012_v3 = vpop.f32.mrf.mxu0  ;;  %v7014_v4 = vpop.f32.mrf.mxu1 }
 0x131   :  { %v7023_v7 = vpop.f32.mrf.mxu0  ;;  %v555_v8 = vpop.f32.mrf.mxu1 }
 0x132   :  { %v7030_v10 = vadd.f32 %v555_v8, %v7010_v2 }
 0x133   :  { %v484_v11 = vpop.f32.mrf.mxu0  ;;  %v557_v12 = vpop.f32.mrf.mxu1 }
 0x134   :  { %7953 = vst [vmem:[#allocation23_spill] sm:$0xff] %v7030_v10  ;;  %v7037_v14 = vadd.f32 %v484_v11, %v7018_v5  ;;  %v7040_v15 = vadd.f32 %v557_v12, %v7027_v9  ;;  %v198_v12 = vsub.s32 5, %v6995_v60 }
 0x135   :  { %v486_v16 = vpop.f32.mrf.mxu0  ;;  %v559_v17 = vpop.f32.mrf.mxu1 }
 0x136   :  { %v7043_v18 = vadd.f32 %v486_v16, %v7034_v13  ;;  %v7046_v20 = vadd.f32 %v559_v17, %v7010_v2  ;;  %v7129_v60 = vrot.slane %v7001_v62, %v198_v12  ;;  %v483_v12 = vadd.f32 %v7023_v7, %v7034_v13 }
 0x137   :  { %v490_v21 = vpop.f32.mrf.mxu0  ;;  %v563_v22 = vpop.f32.mrf.mxu1 }
 0x138   :  { %7954 = vst [vmem:[#allocation24_spill] sm:$0xff] %v7046_v20  ;;  %v7049_v23 = vadd.f32 %v490_v21, %v7018_v5  ;;  %v7052_v24 = vadd.f32 %v563_v22, %v7027_v9 }
 0x139   :  { %v492_v25 = vpop.f32.mrf.mxu0  ;;  %v565_v26 = vpop.f32.mrf.mxu1 }
 0x13a   :  { %v7055_v27 = vadd.f32 %v492_v25, %v7034_v13  ;;  %v7058_v28 = vadd.f32 %v565_v26, %v7010_v2  ;;  %v7120_v25 = vrot.slane %v7001_v62, %v194_v57  ;;  %v7123_v26 = vrot.slane %v714_v61, %v7004_v63 }
 0x13b   :  { %v494_v29 = vpop.f32.mrf.mxu0  ;;  %v567_v30 = vpop.f32.mrf.mxu1 }
 0x13c   :  { %7955 = vst [vmem:[#allocation25_spill] sm:$0xff] %v7058_v28  ;;  %v7061_v31 = vadd.f32 %v494_v29, %v7018_v5  ;;  %v7064_v32 = vadd.f32 %v567_v30, %v7027_v9  ;;  %7972 = vst [vmem:[#allocation42_spill] sm:$0xff] %v7123_v26 }
 0x13d   :  { %v496_v33 = vpop.f32.mrf.mxu0  ;;  %v569_v34 = vpop.f32.mrf.mxu1 }
 0x13e   :  { %7956 = vst [vmem:[#allocation26_spill] sm:$0xff] %v7061_v31  ;;  %7957 = vst [vmem:[#allocation27_spill] sm:$0xff] %v7064_v32  ;;  %v7067_v35 = vadd.f32 %v496_v33, %v7034_v13  ;;  %v7070_v37 = vadd.f32 %v569_v34, %v7010_v2 }
 0x13f   :  { %v500_v38 = vpop.f32.mrf.mxu0  ;;  %v573_v40 = vpop.f32.mrf.mxu1 }
 0x140   :  { %7958 = vst [vmem:[#allocation28_spill] sm:$0xff] %v7067_v35  ;;  %7959 = vst [vmem:[#allocation29_spill] sm:$0xff] %v7070_v37  ;;  %v7073_v42 = vadd.f32 %v500_v38, %v7018_v5  ;;  %v7076_v44 = vadd.f32 %v573_v40, %v7027_v9  ;;  %v481_v40 = vadd.f32 %v7012_v3, %v7018_v5 }
 0x141   :  { %v502_v45 = vpop.f32.mrf.mxu0  ;;  %v575_v46 = vpop.f32.mrf.mxu1 }
 0x142   :  { %7960 = vst [vmem:[#allocation30_spill] sm:$0xff] %v7073_v42  ;;  %7961 = vst [vmem:[#allocation31_spill] sm:$0xff] %v7076_v44  ;;  %v7079_v48 = vadd.f32 %v502_v45, %v7034_v13  ;;  %v7082_v49 = vadd.f32 %v575_v46, %v7010_v2 }
 0x143   :  { %v504_v51 = vpop.f32.mrf.mxu0  ;;  %v577_v36 = vpop.f32.mrf.mxu1 }
 0x144   :  { %7962 = vst [vmem:[#allocation32_spill] sm:$0xff] %v7079_v48  ;;  %7963 = vst [vmem:[#allocation33_spill] sm:$0xff] %v7082_v49  ;;  %v7085_v53 = vadd.f32 %v504_v51, %v7018_v5  ;;  %v7088_v39 = vadd.f32 %v577_v36, %v7027_v9  ;;  %v7138_v51 = vrot.slane %v714_v61, %v7021_v6 }
 0x145   :  { %v506_v41 = vpop.f32.mrf.mxu0  ;;  %v579_v43 = vpop.f32.mrf.mxu1 }
 0x146   :  { %7964 = vst [vmem:[#allocation34_spill] sm:$0xff] %v7085_v53  ;;  %7965 = vst [vmem:[#allocation35_spill] sm:$0xff] %v7088_v39  ;;  %v7091_v47 = vadd.f32 %v506_v41, %v7034_v13  ;;  %v7094_v50 = vadd.f32 %v579_v43, %v7010_v2 }
 0x147   :  { %v510_v52 = vpop.f32.mrf.mxu0  ;;  %v583_v54 = vpop.f32.mrf.mxu1 }
 0x148   :  { %7966 = vst [vmem:[#allocation36_spill] sm:$0xff] %v7091_v47  ;;  %v7097_v55 = vadd.f32 %v510_v52, %v7018_v5  ;;  %v7100_v56 = vadd.f32 %v583_v54, %v7027_v9 }
 0x149   :  { %v512_v58 = vpop.f32.mrf.mxu0  ;;  %v585_v59 = vpop.f32.mrf.mxu1 }
 0x14a   :  { %7967 = vst [vmem:[#allocation37_spill] sm:$0xff] %v7097_v55  ;;  %7968 = vst [vmem:[#allocation38_spill] sm:$0xff] %v7100_v56  ;;  %v7107_v8 = vadd.f32 %v512_v58, %v7034_v13  ;;  %v7110_v11 = vadd.f32 %v585_v59, %v7010_v2 }
 0x14b   :  { %v514_v16 = vpop.f32.mrf.mxu0  ;;  %v587_v17 = vpop.f32.mrf.mxu1 }
 0x14c   :  { %7969 = vst [vmem:[#allocation39_spill] sm:$0xff] %v7107_v8  ;;  %v7114_v21 = vadd.f32 %v514_v16, %v7018_v5  ;;  %v7117_v22 = vadd.f32 %v587_v17, %v7027_v9 }
 0x14d   :  { %v516_v29 = vpop.f32.mrf.mxu0  ;;  %v589_v30 = vpop.f32.mrf.mxu1 }
 0x14e   :  { %7970 = vst [vmem:[#allocation40_spill] sm:$0xff] %v7114_v21  ;;  %7971 = vst [vmem:[#allocation41_spill] sm:$0xff] %v7117_v22  ;;  %v7126_v33 = vadd.f32 %v516_v29, %v7034_v13  ;;  %v554_v21 = vadd.f32 %v7014_v4, %v7027_v9  ;;  %v7203_v9 = vld [vmem:[#allocation6] sm:$0xff] }
 0x14f   :  { %v626_v34 = vpop.f32.mrf.mxu0  ;;  %v951_v38 = vpop.f32.mrf.mxu1  ;;  %vm752_vm1 = vcmp.gt.s32.totalorder %v7203_v9, 0  ;;  %vm1021_vm2 = vcmp.gt.s32.totalorder %v7203_v9, 7  ;;  %vm1293_vm3 = vcmp.gt.s32.totalorder %v7203_v9, 1  ;;  %vm1562_vm4 = vcmp.gt.s32.totalorder %v7203_v9, 6 }
 0x150   :  { %7973 = vst [vmem:[#allocation43_spill] sm:$0xff] %v7126_v33  ;;  %v7134_v45 = vadd.f32 %v626_v34, %v7120_v25  ;;  %v952_v46 = vadd.f32 %v951_v38, %v7123_v26  ;;  %vm1835_vm5 = vcmp.gt.s32.totalorder %v7203_v9, 2  ;;  %vm2104_vm6 = vcmp.gt.s32.totalorder %v7203_v9, 5 }
 0x151   :  { %v628_v36 = vpop.f32.mrf.mxu0  ;;  %v953_v41 = vpop.f32.mrf.mxu1 }
 0x152   :  { %7974 = vst [vmem:[#allocation44_spill] sm:$0xff] %v7134_v45  ;;  %v998_v43 = vadd.f32 %v952_v46, %v481_v40  ;;  %v7141_v52 = vadd.f32 %v628_v36, %v7129_v60  ;;  %v954_v58 = vadd.f32 %v953_v41, %v7138_v51 }
 0x153   :  { %v630_v62 = vpop.f32.mrf.mxu0  ;;  %v955_v54 = vpop.f32.mrf.mxu1 }
 0x154   :  { %7975 = vst [vmem:[#allocation45_spill] sm:$0xff] %v7141_v52  ;;  %v5199_v57 = vmul.f32 -1.442695, %v998_v43  ;;  %v7145_v3 = vadd.f32 %v630_v62, %v7120_v25  ;;  %v1005_v29 = vadd.f32 %v954_v58, %v483_v12  ;;  %v590_v52 = vadd.f32 %v589_v30, %v7010_v2 }
 0x155   :  { %v632_v5 = vpop.f32.mrf.mxu0  ;;  %v956_v59 = vpop.f32.mrf.mxu1 }
 0x156   :  { %7976 = vst [vmem:[#allocation46_spill] sm:$0xff] %v7145_v3  ;;  %6416 = vpow2.f32 %v5199_v57  ;;  %v7150_v16 = vadd.f32 %v632_v5, %v7129_v60  ;;  %v5200_v36 = vmul.f32 -1.442695, %v1005_v29 }
 0x157   :  { %v636_v17 = vpop.f32.mrf.mxu0 }
 0x158   :  { %7977 = vst [vmem:[#allocation47_spill] sm:$0xff] %v7150_v16  ;;  %v7153_v34 = vadd.f32 %v636_v17, %v7120_v25  ;;  %6418 = vpow2.f32 %v5200_v36 }
 0x159   :  { %v638_v38 = vpop.f32.mrf.mxu0 }
 0x15a   :  { %7978 = vst [vmem:[#allocation48_spill] sm:$0xff] %v7153_v34  ;;  %v7156_v40 = vadd.f32 %v638_v38, %v7129_v60 }
 0x15b   :  { %v640_v46 = vpop.f32.mrf.mxu0 }
 0x15c   :  { %7979 = vst [vmem:[#allocation49_spill] sm:$0xff] %v7156_v40  ;;  %v7159_v41 = vadd.f32 %v640_v46, %v7120_v25 }
 0x15d   :  { %v642_v43 = vpop.f32.mrf.mxu0 }
 0x15e   :  { %7980 = vst [vmem:[#allocation50_spill] sm:$0xff] %v7159_v41  ;;  %v7162_v7 = vadd.f32 %v642_v43, %v7129_v60  ;;  %v5174_v43 = vld [vmem:[%s7942_s7 + $0x3] sm:$0x7]  ;;  %s6781_s7 = smov [#allocation15]  }
 0x15f   :  { %v646_v13 = vpop.f32.mrf.mxu0  ;;  %v7194_v19 = vrot.slane %v5174_v43, %v7021_v6  ;;  %s5107_s23 = sshll.u32 %s6781_s7, 4  ;;  %s5108_s23 = int_to_ptr.vmem [resolvable:$true] %s5107_s23 }
 0x160   :  { %7981 = vst [vmem:[#allocation51_spill] sm:$0xff] %v7162_v7  ;;  %v7165_v62 = vadd.f32 %v646_v13, %v7120_v25  ;;  %s6714_s3 = scalar_lea.vmem %s5108_s23, 256  ;;  %p6719_p3 = scmp.lt.s32.totalorder %s5108_s23, %s5108_s23 }
 0x161   :  { %v648_v54 = vpop.f32.mrf.mxu0  ;;  %p6715_p2 = scmp.ne.s32.totalorder %s5108_s23, %s6714_s3  ;;  %p6720_p4 = scmp.lt.s32.totalorder %s6714_s3, %s6714_s3 }
 0x162   :  { %7982 = vst [vmem:[#allocation52_spill] sm:$0xff] %v7165_v62  ;;  %v7168_v57 = vadd.f32 %v648_v54, %v7129_v60 }
 0x163   :  { %v6417_v58 = vpop.eup %6416  ;;  %v650_v5 = vpop.f32.mrf.mxu0  ;;  %p6721_p5 = por %p6720_p4, %p6719_p3 }
 0x164   :  { %7983 = vst [vmem:[#allocation53_spill] sm:$0xff] %v7168_v57  ;;  %v1002_v59 = vadd.f32 1.0, %v6417_v58  ;;  %v7171_v12 = vadd.f32 %v650_v5, %v7120_v25  ;;  %v7186_v58 = vrot.slane %v714_v61, %v7007_v1  ;;  %v7189_v5 = vrot.slane %v5174_v43, %v7004_v63 }
 0x165   :  { %v652_v17 = vpop.f32.mrf.mxu0  ;;  %p6722_p6 = pnand %p6721_p5, %p6715_p2 }
 0x166   :  { %6420 = vrcp.f32 %v1002_v59  ;;  %v7174_v29 = vadd.f32 %v652_v17, %v7129_v60  ;;  %v6419_v59 = vpop.eup %6418 }
 0x167   :  { %v656_v38 = vpop.f32.mrf.mxu0  ;;  %v1009_v45 = vadd.f32 1.0, %v6419_v59 }
 0x168   :  { %v7177_v46 = vadd.f32 %v656_v38, %v7120_v25 }
 0x169   :  { %v658_v36 = vpop.f32.mrf.mxu0  ;;  %6422 = vrcp.f32 %v1009_v45 }
 0x16a   :  { %v7183_v13 = vadd.f32 %v658_v36, %v7129_v60 }
 0x16b   :  { %v660_v54 = vpop.f32.mrf.mxu0 }
 0x16c   :  { %v661_v59 = vadd.f32 %v660_v54, %v7120_v25 }
 0x16d   :  { %v7191_v17 = vpop.f32.mrf.mxu0 }
 0x16f   :  { %v992_v38 = vpop.f32.mrf.mxu0  ;;  %v1220_v0 = vpop.f32.mrf.mxu1 }
 0x170   :  { %v993_v36 = vadd.f32 %v992_v38, %v7186_v58  ;;  %v1221_v22 = vadd.f32 %v1220_v0, %v7189_v5 }
 0x171   :  { %v5753_v61 = vpop.f32.mrf.mxu0  ;;  %v1222_v10 = vpop.f32.mrf.mxu1 }
 0x172   :  { %v1267_v33 = vadd.f32 %v1221_v22, %v590_v52  ;;  %v1223_v20 = vadd.f32 %v1222_v10, %v7194_v19  ;;  %v6576_v10 = vld [vmem:[#allocation8] sm:$0xff] }
 0x173   :  { %v6421_v63 = vpop.eup %6420  ;;  %v995_v16 = vpop.f32.mrf.mxu0 }
 0x174   :  { %v1224_v3 = vpop.f32.mrf.mxu1  ;;  %v1012_v56 = vmul.f32 %v6421_v63, %v993_v36  ;;  %v5225_v6 = vmul.f32 -1.442695, %v1267_v33  ;;  %v1274_v0 = vadd.f32 %v1223_v20, %v661_v59  ;;  %v7215_v36 = vrot.slane %v5174_v43, %v7007_v1  ;;  %v6578_v59 = vld [vmem:[#allocation12 + $0x94] ss:$12 sps:$4 sm:$0xff]   ;;  %v6579_v43 = vld [vmem:[#allocation12 + $0x90] ss:$12 sps:$4 sm:$0xff]  }
 0x175   :  { %v5754_v2 = vpop.f32.mrf.mxu0 }
 0x176   :  { %v1225_v30 = vpop.f32.mrf.mxu1  ;;  %v1013_v38 = vadd.f32 %v1012_v56, %v554_v21  ;;  %6424 = vpow2.f32 %v5225_v6  ;;  %v5226_v22 = vmul.f32 -1.442695, %v1274_v0  ;;  %v6423_v52 = vpop.eup %6422  ;;  %v6216_v21 = vld [vmem:[#allocation12 + $0xb0] ss:$12 sps:$4 sm:$0xff]   ;;  %v6577_v6 = vld [vmem:[#allocation12 + $0xa8] ss:$12 sps:$4 sm:$0xff]  }
 0x177   :  { %v1015_v45 = vsub.f32 1.0, %v6423_v52  ;;  %v1017_v16 = vmul.f32 %v6576_v10, %v6423_v52  ;;  %v6217_v2 = vld [vmem:[#allocation12 + $0x98] ss:$12 sps:$4 sm:$0xff]   ;;  %v7985_v52 = vmov 0  }
 0x178   :  { %6426 = vtanh.f32 %v1013_v38  ;;  %v7984_v38 = vmov 0.0  }
 0x179   :  { %6428 = vpow2.f32 %v5226_v22 }
 0x183   :  { %v6425_v61 = vpop.eup %6424 }
 0x184   :  { %v1271_v4 = vadd.f32 1.0, %v6425_v61  ;;  %v6218_v61 = vld [vmem:[#allocation12 + $0x80] ss:$12 sps:$4 sm:$0xff]  }
 0x185   :  { %v6427_v3 = vpop.eup %6426 }
 0x186   :  { %6430 = vrcp.f32 %v1271_v4  ;;  %v1016_v33 = vmul.f32 %v6427_v3, %v1015_v45  ;;  %v6429_v63 = vpop.eup %6428  ;;  %v6580_v3 = vld [vmem:[#allocation12 + $0x7c] ss:$12 sps:$4 sm:$0xff]  }
 0x187   :  { %v1278_v0 = vadd.f32 1.0, %v6429_v63  ;;  %v6583_v63 = vld [vmem:[#allocation12 + $0x60] ss:$12 sps:$4 sm:$0xff]  }
 0x188   :  { %v1018_v25 = vadd.f32 %v1017_v16, %v1016_v33  ;;  %v663_v33 = vadd.f32 %v7191_v17, %v7129_v60  ;;  %v6585_v60 = vld [vmem:[#allocation12 + $0x48] ss:$12 sps:$4 sm:$0xff]   ;;  %v6221_v17 = vld [vmem:[#allocation12 + $0x38] ss:$12 sps:$4 sm:$0xff]  }
 0x189   :  { %6432 = vrcp.f32 %v1278_v0  ;;  %v6587_v0 = vld [vmem:[#allocation12 + $0x30] ss:$12 sps:$4 sm:$0xff]  }
 0x18a   :  { %v7208_v56 = vsel %vm752_vm1, %v1018_v25, %v6576_v10  ;;  %v1020_v20 = vsel %vm752_vm1, %v1018_v25, 0.0 }
 0x18b   :  { %1290 = vst [vmem:[#allocation14] sm:$0xff] %v1020_v20  ;;  %v1297_v54 = vpack.c.bf16 %v7208_v56, %v7208_v56  ;;  %v6581_v20 = vld [vmem:[#allocation12 + $0x78] ss:$12 sps:$4 sm:$0xff]  }
 0x18d   :  { %1491 = vmatmul.mubr.bf16.vlgmr.msra.gmra.mxu1 %v1297_v54  ;;  %5792 = vmatmul.mubr.bf16.vlgmr.msra.gmra.mxu0 %v1297_v54  ;;  %v6582_v54 = vld [vmem:[#allocation12 + $0x64] ss:$12 sps:$4 sm:$0xff]  }
 0x18e   :  { %1728 = vmatpush1.bf16.msra.mxu1 %v6577_v6  ;;  %5796 = vmatpush3.bf16.msra.mxu0 %v6216_v21  ;;  %v6219_v21 = vld [vmem:[#allocation12 + $0x68] ss:$12 sps:$4 sm:$0xff]   ;;  %v6220_v6 = vld [vmem:[#allocation12 + $0x50] ss:$12 sps:$4 sm:$0xff]  }
 0x18f   :  { %v1261_v30 = vpop.f32.mrf.mxu0  ;;  %1729 = vmatprep.subr.bf16.mxu1 %v6578_v59  ;;  %5797 = vmatprep.subr.bf16.mxu0 %v7984_v38 }
 0x190   :  { %v1262_v22 = vadd.f32 %v1261_v30, %v7215_v36  ;;  %1759 = vmatprep.mubr.bf16.mxu1 %v7985_v52  ;;  %5811 = vmatprep.mubr.msk.bf16.mxu0 %vm6780_vm0, %v7984_v38  ;;  %v6586_v30 = vld [vmem:[#allocation12 + $0x34] ss:$12 sps:$4 sm:$0xff]  }
 0x191   :  { %v5773_v1 = vpop.f32.mrf.mxu0 }
 0x192   :  { %1730 = vmatpush1.bf16.msra.mxu1 %v6579_v43  ;;  %5798 = vmatpush3.bf16.msra.mxu0 %v6217_v2  ;;  %v6584_v2 = vld [vmem:[#allocation12 + $0x4c] ss:$12 sps:$4 sm:$0xff]   ;;  %v6588_v1 = vld [vmem:[#allocation12 + $0x1c] ss:$12 sps:$4 sm:$0xff]  }
 0x193   :  { %v6431_v4 = vpop.eup %6430  ;;  %v1264_v45 = vpop.f32.mrf.mxu0  ;;  %1731 = vmatprep.subr.bf16.mxu1 %v6580_v3  ;;  %5799 = vmatprep.subr.bf16.mxu0 %v7984_v38 }
 0x194   :  { %v1281_v10 = vmul.f32 %v6431_v4, %v1262_v22  ;;  %v6222_v22 = vld [vmem:[#allocation12 + $0x20] ss:$12 sps:$4 sm:$0xff]   ;;  %v6589_v4 = vld [vmem:[#allocation12 + $0x18] ss:$12 sps:$4 sm:$0xff]   ;;  %v6223_v45 = vld [vmem:[#allocation12 + $0x8] ss:$12 sps:$4 sm:$0xff]  }
 0x195   :  { %v5774_v16 = vpop.f32.mrf.mxu0 }
 0x196   :  { %v1282_v25 = vadd.f32 %v1281_v10, %v663_v33  ;;  %1732 = vmatpush1.bf16.msra.mxu1 %v6581_v20  ;;  %5800 = vmatpush3.bf16.msra.mxu0 %v6218_v61  ;;  %v6433_v59 = vpop.eup %6432  ;;  %v6590_v33 = vld [vmem:[#allocation8 + $0x8] sm:$0xff]  ;;  %v6591_v16 = vld [vmem:[#allocation12 + $0x4] ss:$12 sps:$4 sm:$0xff]   ;;  %v6592_v20 = vld [vmem:[#allocation12] ss:$12 sps:$4 sm:$0xff]  }
 0x197   :  { %1733 = vmatprep.subr.bf16.mxu1 %v6582_v54  ;;  %5801 = vmatprep.subr.bf16.mxu0 %v7984_v38  ;;  %v1284_v43 = vsub.f32 1.0, %v6433_v59  ;;  %v1286_v10 = vmul.f32 %v6590_v33, %v6433_v59  ;;  %v6231_v59 = vld [vmem:[#allocation11 + $0x98] ss:$12 sps:$4 sm:$0xff]  }
 0x198   :  { %6434 = vtanh.f32 %v1282_v25 }
 0x19a   :  { %1734 = vmatpush1.bf16.msra.mxu1 %v6583_v63  ;;  %5802 = vmatpush3.bf16.msra.mxu0 %v6219_v21 }
 0x19b   :  { %1735 = vmatprep.subr.bf16.mxu1 %v6584_v2  ;;  %5803 = vmatprep.subr.bf16.mxu0 %v7984_v38  ;;  %v7245_v2 = vld [vmem:[#allocation11 + $0xa8] ss:$12 sps:$4 sm:$0xff]  }
 0x19e   :  { %1736 = vmatpush1.bf16.msra.mxu1 %v6585_v60  ;;  %5804 = vmatpush3.bf16.msra.mxu0 %v6220_v6  ;;  %v7243_v6 = vld [vmem:[#allocation11 + $0xac] ss:$12 sps:$4 sm:$0xff]   ;;  %v6227_v60 = vld [vmem:[#allocation11 + $0xb0] ss:$12 sps:$4 sm:$0xff]  }
 0x19f   :  { %1737 = vmatprep.subr.bf16.mxu1 %v6586_v30  ;;  %5805 = vmatprep.subr.bf16.mxu0 %v7984_v38  ;;  %v7252_v30 = vld [vmem:[#allocation11 + $0x90] ss:$12 sps:$4 sm:$0xff]  }
 0x1a2   :  { %1738 = vmatpush1.bf16.msra.mxu1 %v6587_v0  ;;  %5806 = vmatpush3.bf16.msra.mxu0 %v6221_v17  ;;  %v7249_v17 = vld [vmem:[#allocation11 + $0x94] ss:$12 sps:$4 sm:$0xff]   ;;  %v7256_v0 = vld [vmem:[#allocation11 + $0x7c] ss:$12 sps:$4 sm:$0xff]  }
 0x1a3   :  { %1739 = vmatprep.subr.bf16.mxu1 %v6588_v1  ;;  %5807 = vmatprep.subr.bf16.mxu0 %v7984_v38  ;;  %v6235_v1 = vld [vmem:[#allocation11 + $0x80] ss:$12 sps:$4 sm:$0xff]  }
 0x1a5   :  { %v6435_v61 = vpop.eup %6434 }
 0x1a6   :  { %1740 = vmatpush1.bf16.msra.mxu1 %v6589_v4  ;;  %5808 = vmatpush3.bf16.msra.mxu0 %v6222_v22  ;;  %v1285_v3 = vmul.f32 %v6435_v61, %v1284_v43  ;;  %v7259_v22 = vld [vmem:[#allocation11 + $0x78] ss:$12 sps:$4 sm:$0xff]   ;;  %v7266_v61 = vld [vmem:[#allocation11 + $0x60] ss:$12 sps:$4 sm:$0xff]   ;;  %v6239_v4 = vld [vmem:[#allocation11 + $0x68] ss:$12 sps:$4 sm:$0xff]  }
 0x1a7   :  { %1741 = vmatprep.subr.bf16.mxu1 %v6591_v16  ;;  %5809 = vmatprep.subr.bf16.mxu0 %v7984_v38  ;;  %v7263_v43 = vld [vmem:[#allocation11 + $0x64] ss:$12 sps:$4 sm:$0xff]  }
 0x1a8   :  { %v1287_v25 = vadd.f32 %v1286_v10, %v1285_v3  ;;  %v7273_v3 = vld [vmem:[#allocation11 + $0x48] ss:$12 sps:$4 sm:$0xff]   ;;  %v7280_v16 = vld [vmem:[#allocation11 + $0x30] ss:$12 sps:$4 sm:$0xff]  }
 0x1a9   :  { %v7277_v10 = vld [vmem:[#allocation11 + $0x34] ss:$12 sps:$4 sm:$0xff]  }
 0x1aa   :  { %1742 = vmatpush1.bf16.msra.mxu1 %v6592_v20  ;;  %5810 = vmatpush3.bf16.msra.mxu0 %v6223_v45  ;;  %v7233_v21 = vsel %vm1021_vm2, %v1287_v25, %v6590_v33  ;;  %v1289_v54 = vsel %vm1021_vm2, %v1287_v25, 0.0  ;;  %v7270_v45 = vld [vmem:[#allocation11 + $0x4c] ss:$12 sps:$4 sm:$0xff]   ;;  %v6243_v33 = vld [vmem:[#allocation11 + $0x50] ss:$12 sps:$4 sm:$0xff]  }
 0x1ab   :  { %1292 = vst [vmem:[#allocation14 + $0x38] sm:$0xff] %v1289_v54  ;;  %v1566_v63 = vpack.c.bf16 %v7233_v21, %v7233_v21  ;;  %5815 = vmatprep.subr.bf16.mxu0 %v7984_v38  ;;  %2000 = vmatprep.subr.bf16.mxu1 %v7243_v6  ;;  %v6247_v25 = vld [vmem:[#allocation11 + $0x38] ss:$12 sps:$4 sm:$0xff]   ;;  %v7284_v20 = vld [vmem:[#allocation11 + $0x1c] ss:$12 sps:$4 sm:$0xff]  }
 0x1ac   :  { %v7287_v54 = vld [vmem:[#allocation11 + $0x18] ss:$12 sps:$4 sm:$0xff]  }
 0x1ad   :  { %1760 = vmatmul.mubr.bf16.vlgmr.msra.gmra.mxu1 %v1566_v63  ;;  %5812 = vmatmul.mubr.bf16.vlgmr.msra.gmra.mxu0 %v1566_v63  ;;  %v6251_v63 = vld [vmem:[#allocation11 + $0x20] ss:$12 sps:$4 sm:$0xff]  }
 0x1ae   :  { %2032 = vmatprep.mubr.bf16.mxu1 %v7985_v52  ;;  %5831 = vmatprep.mubr.msk.bf16.mxu0 %vm6780_vm0, %v7984_v38 }
 0x1af   :  { %2001 = vmatpush1.bf16.msra.mxu1 %v7245_v2  ;;  %5816 = vmatpush3.bf16.msra.mxu0 %v6227_v60  ;;  %v7291_v60 = vld [vmem:[#allocation11 + $0x4] ss:$12 sps:$4 sm:$0xff]  }
 0x1b0   :  { %5817 = vmatprep.subr.bf16.mxu0 %v7984_v38  ;;  %2002 = vmatprep.subr.bf16.mxu1 %v7249_v17 }
 0x1b3   :  { %2003 = vmatpush1.bf16.msra.mxu1 %v7252_v30  ;;  %5818 = vmatpush3.bf16.msra.mxu0 %v6231_v59  ;;  %v7294_v59 = vld [vmem:[#allocation11] ss:$12 sps:$4 sm:$0xff]  }
 0x1b4   :  { %5819 = vmatprep.subr.bf16.mxu0 %v7984_v38  ;;  %2004 = vmatprep.subr.bf16.mxu1 %v7256_v0  ;;  %7986 = vst [vmem:[#allocation54_spill] sm:$0xff] %v7294_v59 }
 0x1b7   :  { %2005 = vmatpush1.bf16.msra.mxu1 %v7259_v22  ;;  %5820 = vmatpush3.bf16.msra.mxu0 %v6235_v1  ;;  %v6255_v1 = vld [vmem:[#allocation11 + $0x8] ss:$12 sps:$4 sm:$0xff]  }
 0x1b8   :  { %5821 = vmatprep.subr.bf16.mxu0 %v7984_v38  ;;  %2006 = vmatprep.subr.bf16.mxu1 %v7263_v43 }
 0x1bb   :  { %2007 = vmatpush1.bf16.msra.mxu1 %v7266_v61  ;;  %5822 = vmatpush3.bf16.msra.mxu0 %v6239_v4  ;;  %v7298_v4 = vld [vmem:[#allocation12 + $0xac] ss:$12 sps:$4 sm:$0xff]  }
 0x1bc   :  { %5823 = vmatprep.subr.bf16.mxu0 %v7984_v38  ;;  %2008 = vmatprep.subr.bf16.mxu1 %v7270_v45  ;;  %7987 = vst [vmem:[#allocation55_spill] sm:$0xff] %v7298_v4 }
 0x1bf   :  { %2009 = vmatpush1.bf16.msra.mxu1 %v7273_v3  ;;  %5824 = vmatpush3.bf16.msra.mxu0 %v6243_v33 }
 0x1c0   :  { %5825 = vmatprep.subr.bf16.mxu0 %v7984_v38  ;;  %2010 = vmatprep.subr.bf16.mxu1 %v7277_v10 }
 0x1c3   :  { %2011 = vmatpush1.bf16.msra.mxu1 %v7280_v16  ;;  %5826 = vmatpush3.bf16.msra.mxu0 %v6247_v25 }
 0x1c4   :  { %5827 = vmatprep.subr.bf16.mxu0 %v7984_v38  ;;  %2012 = vmatprep.subr.bf16.mxu1 %v7284_v20 }
 0x1c7   :  { %2013 = vmatpush1.bf16.msra.mxu1 %v7287_v54  ;;  %5828 = vmatpush3.bf16.msra.mxu0 %v6251_v63 }
 0x1c8   :  { %5829 = vmatprep.subr.bf16.mxu0 %v7984_v38  ;;  %2014 = vmatprep.subr.bf16.mxu1 %v7291_v60 }
 0x1cb   :  { %2015 = vmatpush1.bf16.msra.mxu1 %v7294_v59  ;;  %5830 = vmatpush3.bf16.msra.mxu0 %v6255_v1 }
 0x1cc   :  { %5835 = vmatprep.subr.bf16.mxu0 %v7984_v38  ;;  %2269 = vmatprep.subr.bf16.mxu1 %v7298_v4 }
 0x24d   :  { %v1492_v33 = vpop.f32.mrf.mxu1  ;;  %v1533_v25 = vpop.f32.mrf.mxu0 }
 0x24e   :  { %v1493_v63 = vadd.f32 %v1492_v33, %v7123_v26 }
 0x24f   :  { %v1494_v8 = vpop.f32.mrf.mxu1  ;;  %v5793_v55 = vpop.f32.mrf.mxu0 }
 0x250   :  { %v1539_v40 = vadd.f32 %v1493_v63, %v7037_v14  ;;  %v1495_v47 = vadd.f32 %v1494_v8, %v7138_v51  ;;  %v1534_v8 = vadd.f32 %v1533_v25, %v7186_v58 }
 0x251   :  { %v1496_v34 = vpop.f32.mrf.mxu1  ;;  %v1536_v39 = vpop.f32.mrf.mxu0 }
 0x252   :  { %v5251_v28 = vmul.f32 -1.442695, %v1539_v40  ;;  %v1546_v7 = vadd.f32 %v1495_v47, %v7043_v18 }
 0x253   :  { %v1497_v1 = vpop.f32.mrf.mxu1  ;;  %v5794_v53 = vpop.f32.mrf.mxu0 }
 0x254   :  { %6436 = vpow2.f32 %v5251_v28  ;;  %v5252_v41 = vmul.f32 -1.442695, %v1546_v7 }
 0x256   :  { %6438 = vpow2.f32 %v5252_v41 }
 0x261   :  { %v6437_v44 = vpop.eup %6436 }
 0x262   :  { %v1543_v37 = vadd.f32 1.0, %v6437_v44 }
 0x263   :  { %v6439_v33 = vpop.eup %6438 }
 0x264   :  { %6440 = vrcp.f32 %v1543_v37  ;;  %v1550_v42 = vadd.f32 1.0, %v6439_v33 }
 0x266   :  { %6442 = vrcp.f32 %v1550_v42 }
 0x26d   :  { %v1761_v48 = vpop.f32.mrf.mxu1  ;;  %v1802_v55 = vpop.f32.mrf.mxu0 }
 0x26e   :  { %v1762_v14 = vadd.f32 %v1761_v48, %v7189_v5 }
 0x26f   :  { %v1763_v39 = vpop.f32.mrf.mxu1  ;;  %v5813_v34 = vpop.f32.mrf.mxu0 }
 0x270   :  { %v1808_v53 = vadd.f32 %v1762_v14, %v7110_v11  ;;  %v1764_v37 = vadd.f32 %v1763_v39, %v7194_v19 }
 0x271   :  { %v6441_v28 = vpop.eup %6440  ;;  %v1765_v40 = vpop.f32.mrf.mxu1 }
 0x272   :  { %v1805_v18 = vpop.f32.mrf.mxu0  ;;  %v1553_v47 = vmul.f32 %v6441_v28, %v1534_v8  ;;  %v5277_v41 = vmul.f32 -1.442695, %v1808_v53  ;;  %v1815_v48 = vadd.f32 %v1764_v37, %v7177_v46  ;;  %v7321_v53 = vld [vmem:[#allocation12 + $0xa8] ss:$12 sps:$4 sm:$0xff]   ;;  %v6259_v28 = vld [vmem:[#allocation12 + $0xb0] ss:$12 sps:$4 sm:$0xff]  }
 0x273   :  { %v1766_v44 = vpop.f32.mrf.mxu1  ;;  %v6443_v25 = vpop.eup %6442  ;;  %v7325_v18 = vld [vmem:[#allocation12 + $0x94] ss:$12 sps:$4 sm:$0xff]   ;;  %v7332_v37 = vld [vmem:[#allocation12 + $0x7c] ss:$12 sps:$4 sm:$0xff]  }
 0x274   :  { %v5814_v7 = vpop.f32.mrf.mxu0  ;;  %v1554_v63 = vadd.f32 %v1553_v47, %v7040_v15  ;;  %6444 = vpow2.f32 %v5277_v41  ;;  %v5278_v1 = vmul.f32 -1.442695, %v1815_v48  ;;  %v1556_v14 = vsub.f32 1.0, %v6443_v25  ;;  %v6263_v41 = vld [vmem:[#allocation12 + $0x98] ss:$12 sps:$4 sm:$0xff]  }
 0x275   :  { %v1558_v8 = vmul.f32 %v6443_v25, %v7208_v56  ;;  %v1803_v7 = vadd.f32 %v1802_v55, %v7215_v36  ;;  %v6267_v48 = vld [vmem:[#allocation12 + $0x80] ss:$12 sps:$4 sm:$0xff]   ;;  %v7343_v25 = vld [vmem:[#allocation12 + $0x64] ss:$12 sps:$4 sm:$0xff]  }
 0x276   :  { %6446 = vtanh.f32 %v1554_v63  ;;  %v7339_v63 = vld [vmem:[#allocation12 + $0x78] ss:$12 sps:$4 sm:$0xff]   ;;  %v7347_v55 = vld [vmem:[#allocation12 + $0x60] ss:$12 sps:$4 sm:$0xff]  }
 0x277   :  { %6448 = vpow2.f32 %v5278_v1 }
 0x281   :  { %v6445_v11 = vpop.eup %6444 }
 0x282   :  { %v1812_v33 = vadd.f32 1.0, %v6445_v11 }
 0x283   :  { %v6447_v34 = vpop.eup %6446 }
 0x284   :  { %6450 = vrcp.f32 %v1812_v33  ;;  %v1557_v42 = vmul.f32 %v6447_v34, %v1556_v14  ;;  %v6449_v47 = vpop.eup %6448  ;;  %v6271_v14 = vld [vmem:[#allocation12 + $0x68] ss:$12 sps:$4 sm:$0xff]   ;;  %v7351_v34 = vld [vmem:[#allocation12 + $0x4c] ss:$12 sps:$4 sm:$0xff]  }
 0x285   :  { %v1819_v44 = vadd.f32 1.0, %v6449_v47  ;;  %v7368_v47 = vld [vmem:[#allocation12 + $0x18] ss:$12 sps:$4 sm:$0xff]  }
 0x286   :  { %v1559_v39 = vadd.f32 %v1558_v8, %v1557_v42  ;;  %v7354_v42 = vld [vmem:[#allocation12 + $0x48] ss:$12 sps:$4 sm:$0xff]   ;;  %v6275_v8 = vld [vmem:[#allocation12 + $0x50] ss:$12 sps:$4 sm:$0xff]  }
 0x287   :  { %6452 = vrcp.f32 %v1819_v44  ;;  %v7372_v44 = vld [vmem:[#allocation12 + $0x4] ss:$12 sps:$4 sm:$0xff]  }
 0x288   :  { %v7317_v15 = vsel %vm1293_vm3, %v1559_v39, %v7208_v56  ;;  %v1561_v46 = vsel %vm1293_vm3, %v1559_v39, 0.0  ;;  %v7328_v56 = vld [vmem:[#allocation12 + $0x90] ss:$12 sps:$4 sm:$0xff]  }
 0x289   :  { %1832 = vst [vmem:[#allocation14 + $0x8] sm:$0xff] %v1561_v46  ;;  %v1839_v40 = vpack.c.bf16 %v7317_v15, %v7317_v15  ;;  %v7361_v39 = vld [vmem:[#allocation12 + $0x30] ss:$12 sps:$4 sm:$0xff]   ;;  %v6279_v46 = vld [vmem:[#allocation12 + $0x38] ss:$12 sps:$4 sm:$0xff]  }
 0x28b   :  { %2033 = vmatmul.mubr.bf16.vlgmr.msra.gmra.mxu1 %v1839_v40  ;;  %5832 = vmatmul.mubr.bf16.vlgmr.msra.gmra.mxu0 %v1839_v40 }
 0x28c   :  { %2270 = vmatpush1.bf16.msra.mxu1 %v7321_v53  ;;  %5836 = vmatpush3.bf16.msra.mxu0 %v6259_v28  ;;  %v7365_v28 = vld [vmem:[#allocation12 + $0x1c] ss:$12 sps:$4 sm:$0xff]  }
 0x28d   :  { %2271 = vmatprep.subr.bf16.mxu1 %v7325_v18  ;;  %5837 = vmatprep.subr.bf16.mxu0 %v7984_v38 }
 0x28e   :  { %2301 = vmatprep.mubr.bf16.mxu1 %v7985_v52  ;;  %5851 = vmatprep.mubr.msk.bf16.mxu0 %vm6780_vm0, %v7984_v38 }
 0x290   :  { %2272 = vmatpush1.bf16.msra.mxu1 %v7328_v56  ;;  %5838 = vmatpush3.bf16.msra.mxu0 %v6263_v41  ;;  %v6283_v41 = vld [vmem:[#allocation12 + $0x20] ss:$12 sps:$4 sm:$0xff]  }
 0x291   :  { %v6451_v1 = vpop.eup %6450  ;;  %2273 = vmatprep.subr.bf16.mxu1 %v7332_v37  ;;  %5839 = vmatprep.subr.bf16.mxu0 %v7984_v38 }
 0x292   :  { %v1822_v11 = vmul.f32 %v6451_v1, %v1803_v7  ;;  %v7375_v1 = vld [vmem:[#allocation12] ss:$12 sps:$4 sm:$0xff]  }
 0x294   :  { %v1823_v33 = vadd.f32 %v1822_v11, %v7183_v13  ;;  %2274 = vmatpush1.bf16.msra.mxu1 %v7339_v63  ;;  %5840 = vmatpush3.bf16.msra.mxu0 %v6267_v48  ;;  %v7358_v13 = vld [vmem:[#allocation12 + $0x34] ss:$12 sps:$4 sm:$0xff]   ;;  %v6453_v40 = vpop.eup %6452 }
 0x295   :  { %2275 = vmatprep.subr.bf16.mxu1 %v7343_v25  ;;  %5841 = vmatprep.subr.bf16.mxu0 %v7984_v38  ;;  %v1825_v7 = vsub.f32 1.0, %v6453_v40  ;;  %v6287_v11 = vld [vmem:[#allocation12 + $0x8] ss:$12 sps:$4 sm:$0xff]  }
 0x296   :  { %6454 = vtanh.f32 %v1823_v33 }
 0x298   :  { %2276 = vmatpush1.bf16.msra.mxu1 %v7347_v55  ;;  %5842 = vmatpush3.bf16.msra.mxu0 %v6271_v14  ;;  %v1827_v14 = vmul.f32 %v6453_v40, %v7233_v21 }
 0x299   :  { %2277 = vmatprep.subr.bf16.mxu1 %v7351_v34  ;;  %5843 = vmatprep.subr.bf16.mxu0 %v7984_v38 }
 0x29c   :  { %2278 = vmatpush1.bf16.msra.mxu1 %v7354_v42  ;;  %5844 = vmatpush3.bf16.msra.mxu0 %v6275_v8 }
 0x29d   :  { %2279 = vmatprep.subr.bf16.mxu1 %v7358_v13  ;;  %5845 = vmatprep.subr.bf16.mxu0 %v7984_v38 }
 0x2a0   :  { %2280 = vmatpush1.bf16.msra.mxu1 %v7361_v39  ;;  %5846 = vmatpush3.bf16.msra.mxu0 %v6279_v46 }
 0x2a1   :  { %2281 = vmatprep.subr.bf16.mxu1 %v7365_v28  ;;  %5847 = vmatprep.subr.bf16.mxu0 %v7984_v38 }
 0x2a3   :  { %v6455_v48 = vpop.eup %6454 }
 0x2a4   :  { %2282 = vmatpush1.bf16.msra.mxu1 %v7368_v47  ;;  %5848 = vmatpush3.bf16.msra.mxu0 %v6283_v41  ;;  %v1826_v33 = vmul.f32 %v6455_v48, %v1825_v7  ;;  %v6289_v7 = vld [vmem:[#allocation11 + $0x98] ss:$12 sps:$4 sm:$0xff]   ;;  %v6290_v48 = vld [vmem:[#allocation11 + $0x80] ss:$12 sps:$4 sm:$0xff]  }
 0x2a5   :  { %2283 = vmatprep.subr.bf16.mxu1 %v7372_v44  ;;  %5849 = vmatprep.subr.bf16.mxu0 %v7984_v38 }
 0x2a6   :  { %v1828_v8 = vadd.f32 %v1827_v14, %v1826_v33  ;;  %v6292_v33 = vld [vmem:[#allocation11 + $0x50] ss:$12 sps:$4 sm:$0xff]   ;;  %v6293_v14 = vld [vmem:[#allocation11 + $0x38] ss:$12 sps:$4 sm:$0xff]  }
 0x2a8   :  { %2284 = vmatpush1.bf16.msra.mxu1 %v7375_v1  ;;  %5850 = vmatpush3.bf16.msra.mxu0 %v6287_v11  ;;  %v7385_v46 = vsel %vm1562_vm4, %v1828_v8, %v7233_v21  ;;  %v1830_v41 = vsel %vm1562_vm4, %v1828_v8, 0.0  ;;  %v6288_v21 = vld [vmem:[#allocation11 + $0xb0] ss:$12 sps:$4 sm:$0xff]   ;;  %v6291_v11 = vld [vmem:[#allocation11 + $0x68] ss:$12 sps:$4 sm:$0xff]  }
 0x2a9   :  { %1834 = vst [vmem:[#allocation14 + $0x30] sm:$0xff] %v1830_v41  ;;  %v2108_v40 = vpack.c.bf16 %v7385_v46, %v7385_v46  ;;  %2542 = vmatprep.subr.bf16.mxu1 %v7243_v6  ;;  %5855 = vmatprep.subr.bf16.mxu0 %v7984_v38  ;;  %v6294_v8 = vld [vmem:[#allocation11 + $0x20] ss:$12 sps:$4 sm:$0xff]   ;;  %v6295_v41 = vld [vmem:[#allocation11 + $0x8] ss:$12 sps:$4 sm:$0xff]  }
 0x2ab   :  { %2302 = vmatmul.mubr.bf16.vlgmr.msra.gmra.mxu1 %v2108_v40  ;;  %5852 = vmatmul.mubr.bf16.vlgmr.msra.gmra.mxu0 %v2108_v40 }
 0x2ac   :  { %2543 = vmatpush1.bf16.msra.mxu1 %v7245_v2  ;;  %2574 = vmatprep.mubr.bf16.mxu1 %v7985_v52 }
 0x2ad   :  { %2544 = vmatprep.subr.bf16.mxu1 %v7249_v17  ;;  %5871 = vmatprep.mubr.msk.bf16.mxu0 %vm6780_vm0, %v7984_v38 }
 0x2ae   :  { %5856 = vmatpush3.bf16.msra.mxu0 %v6288_v21 }
 0x2af   :  { %5857 = vmatprep.subr.bf16.mxu0 %v7984_v38 }
 0x2b0   :  { %2545 = vmatpush1.bf16.msra.mxu1 %v7252_v30 }
 0x2b1   :  { %2546 = vmatprep.subr.bf16.mxu1 %v7256_v0 }
 0x2b2   :  { %5858 = vmatpush3.bf16.msra.mxu0 %v6289_v7 }
 0x2b3   :  { %5859 = vmatprep.subr.bf16.mxu0 %v7984_v38 }
 0x2b4   :  { %2547 = vmatpush1.bf16.msra.mxu1 %v7259_v22 }
 0x2b5   :  { %2548 = vmatprep.subr.bf16.mxu1 %v7263_v43 }
 0x2b6   :  { %5860 = vmatpush3.bf16.msra.mxu0 %v6290_v48 }
 0x2b7   :  { %5861 = vmatprep.subr.bf16.mxu0 %v7984_v38 }
 0x2b8   :  { %2549 = vmatpush1.bf16.msra.mxu1 %v7266_v61 }
 0x2b9   :  { %2550 = vmatprep.subr.bf16.mxu1 %v7270_v45 }
 0x2ba   :  { %5862 = vmatpush3.bf16.msra.mxu0 %v6291_v11 }
 0x2bb   :  { %5863 = vmatprep.subr.bf16.mxu0 %v7984_v38 }
 0x2bc   :  { %2551 = vmatpush1.bf16.msra.mxu1 %v7273_v3 }
 0x2bd   :  { %2552 = vmatprep.subr.bf16.mxu1 %v7277_v10 }
 0x2be   :  { %5864 = vmatpush3.bf16.msra.mxu0 %v6292_v33 }
 0x2bf   :  { %5865 = vmatprep.subr.bf16.mxu0 %v7984_v38 }
 0x2c0   :  { %2553 = vmatpush1.bf16.msra.mxu1 %v7280_v16 }
 0x2c1   :  { %2554 = vmatprep.subr.bf16.mxu1 %v7284_v20 }
 0x2c2   :  { %5866 = vmatpush3.bf16.msra.mxu0 %v6293_v14 }
 0x2c3   :  { %5867 = vmatprep.subr.bf16.mxu0 %v7984_v38 }
 0x2c4   :  { %2555 = vmatpush1.bf16.msra.mxu1 %v7287_v54 }
 0x2c5   :  { %2556 = vmatprep.subr.bf16.mxu1 %v7291_v60 }
 0x2c6   :  { %5868 = vmatpush3.bf16.msra.mxu0 %v6294_v8 }
 0x2c7   :  { %5869 = vmatprep.subr.bf16.mxu0 %v7984_v38 }
 0x2c8   :  { %2557 = vmatpush1.bf16.msra.mxu1 %v7294_v59 }
 0x2c9   :  { %2811 = vmatprep.subr.bf16.mxu1 %v7298_v4 }
 0x2ca   :  { %5870 = vmatpush3.bf16.msra.mxu0 %v6295_v41 }
 0x2cb   :  { %5875 = vmatprep.subr.bf16.mxu0 %v7984_v38 }
 0x34b   :  { %v2034_v40 = vpop.f32.mrf.mxu1  ;;  %v2075_v21 = vpop.f32.mrf.mxu0 }
 0x34c   :  { %v2035_v7 = vadd.f32 %v2034_v40, %v7123_v26 }
 0x34d   :  { %v2036_v48 = vpop.f32.mrf.mxu1  ;;  %v5833_v11 = vpop.f32.mrf.mxu0 }
 0x34e   :  { %v2081_v33 = vadd.f32 %v2035_v7, %v7049_v23  ;;  %v2037_v32 = vadd.f32 %v2036_v48, %v7138_v51  ;;  %v2076_v48 = vadd.f32 %v2075_v21, %v7186_v58 }
 0x34f   :  { %v2038_v57 = vpop.f32.mrf.mxu1  ;;  %v2078_v14 = vpop.f32.mrf.mxu0 }
 0x350   :  { %v5303_v62 = vmul.f32 -1.442695, %v2081_v33  ;;  %v2088_v41 = vadd.f32 %v2037_v32, %v7055_v27 }
 0x351   :  { %v2039_v8 = vpop.f32.mrf.mxu1  ;;  %v5834_v49 = vpop.f32.mrf.mxu0 }
 0x352   :  { %6456 = vpow2.f32 %v5303_v62  ;;  %v5304_v35 = vmul.f32 -1.442695, %v2088_v41 }
 0x354   :  { %6458 = vpow2.f32 %v5304_v35 }
 0x35f   :  { %v6457_v31 = vpop.eup %6456 }
 0x360   :  { %v2085_v4 = vadd.f32 1.0, %v6457_v31 }
 0x361   :  { %v6459_v40 = vpop.eup %6458 }
 0x362   :  { %6460 = vrcp.f32 %v2085_v4  ;;  %v2092_v59 = vadd.f32 1.0, %v6459_v40 }
 0x364   :  { %6462 = vrcp.f32 %v2092_v59 }
 0x36b   :  { %v2303_v26 = vpop.f32.mrf.mxu1  ;;  %v2344_v11 = vpop.f32.mrf.mxu0 }
 0x36c   :  { %v2304_v23 = vadd.f32 %v2303_v26, %v7189_v5 }
 0x36d   :  { %v2305_v57 = vpop.f32.mrf.mxu1  ;;  %v5853_v7 = vpop.f32.mrf.mxu0 }
 0x36e   :  { %v2350_v49 = vadd.f32 %v2304_v23, %v7094_v50  ;;  %v2306_v31 = vadd.f32 %v2305_v57, %v7194_v19 }
 0x36f   :  { %v6461_v62 = vpop.eup %6460  ;;  %v2307_v33 = vpop.f32.mrf.mxu1 }
 0x370   :  { %v2347_v27 = vpop.f32.mrf.mxu0  ;;  %v2095_v32 = vmul.f32 %v6461_v62, %v2076_v48  ;;  %v5329_v35 = vmul.f32 -1.442695, %v2350_v49  ;;  %v2357_v26 = vadd.f32 %v2306_v31, %v7171_v12  ;;  %v6296_v49 = vld [vmem:[#allocation12 + $0xb0] ss:$12 sps:$4 sm:$0xff]  }
 0x371   :  { %v2308_v4 = vpop.f32.mrf.mxu1  ;;  %v6463_v21 = vpop.eup %6462  ;;  %v6297_v27 = vld [vmem:[#allocation12 + $0x98] ss:$12 sps:$4 sm:$0xff]  }
 0x372   :  { %v5854_v14 = vpop.f32.mrf.mxu0  ;;  %v2096_v8 = vadd.f32 %v2095_v32, %v7052_v24  ;;  %6464 = vpow2.f32 %v5329_v35  ;;  %v5330_v41 = vmul.f32 -1.442695, %v2357_v26  ;;  %v2098_v23 = vsub.f32 1.0, %v6463_v21  ;;  %v6298_v35 = vld [vmem:[#allocation12 + $0x80] ss:$12 sps:$4 sm:$0xff]  }
 0x373   :  { %v2100_v48 = vmul.f32 %v6463_v21, %v7317_v15  ;;  %v2345_v32 = vadd.f32 %v2344_v11, %v7215_v36  ;;  %v6300_v11 = vld [vmem:[#allocation12 + $0x50] ss:$12 sps:$4 sm:$0xff]  }
 0x374   :  { %6466 = vtanh.f32 %v2096_v8  ;;  %v6299_v8 = vld [vmem:[#allocation12 + $0x68] ss:$12 sps:$4 sm:$0xff]  }
 0x375   :  { %6468 = vpow2.f32 %v5330_v41  ;;  %v6302_v41 = vld [vmem:[#allocation12 + $0x20] ss:$12 sps:$4 sm:$0xff]  }
 0x37f   :  { %v6465_v50 = vpop.eup %6464 }
 0x380   :  { %v2354_v40 = vadd.f32 1.0, %v6465_v50 }
 0x381   :  { %v6467_v7 = vpop.eup %6466 }
 0x382   :  { %6470 = vrcp.f32 %v2354_v40  ;;  %v2099_v59 = vmul.f32 %v6467_v7, %v2098_v23  ;;  %v6469_v33 = vpop.eup %6468  ;;  %v6303_v40 = vld [vmem:[#allocation12 + $0x8] ss:$12 sps:$4 sm:$0xff]  }
 0x384   :  { %v2101_v57 = vadd.f32 %v2100_v48, %v2099_v59 }
 0x386   :  { %v7435_v24 = vsel %vm1835_vm5, %v2101_v57, %v7317_v15  ;;  %v2103_v12 = vsel %vm1835_vm5, %v2101_v57, 0.0  ;;  %v2361_v15 = vadd.f32 1.0, %v6469_v33 }
 0x387   :  { %2374 = vst [vmem:[#allocation14 + $0x10] sm:$0xff] %v2103_v12  ;;  %v2381_v62 = vpack.c.bf16 %v7435_v24, %v7435_v24 }
 0x388   :  { %6472 = vrcp.f32 %v2361_v15 }
 0x389   :  { %2575 = vmatmul.mubr.bf16.vlgmr.msra.gmra.mxu1 %v2381_v62  ;;  %5872 = vmatmul.mubr.bf16.vlgmr.msra.gmra.mxu0 %v2381_v62 }
 0x38a   :  { %2812 = vmatpush1.bf16.msra.mxu1 %v7321_v53  ;;  %5876 = vmatpush3.bf16.msra.mxu0 %v6296_v49  ;;  %v7991_v49 = vld [vmem:[#allocation26_spill] sm:$0xff] }
 0x38b   :  { %2813 = vmatprep.subr.bf16.mxu1 %v7325_v18  ;;  %5877 = vmatprep.subr.bf16.mxu0 %v7984_v38 }
 0x38c   :  { %2843 = vmatprep.mubr.bf16.mxu1 %v7985_v52  ;;  %5891 = vmatprep.mubr.msk.bf16.mxu0 %vm6780_vm0, %v7984_v38 }
 0x38e   :  { %2814 = vmatpush1.bf16.msra.mxu1 %v7328_v56  ;;  %5878 = vmatpush3.bf16.msra.mxu0 %v6297_v27 }
 0x38f   :  { %v6471_v31 = vpop.eup %6470  ;;  %2815 = vmatprep.subr.bf16.mxu1 %v7332_v37  ;;  %5879 = vmatprep.subr.bf16.mxu0 %v7984_v38 }
 0x390   :  { %v2364_v4 = vmul.f32 %v6471_v31, %v2345_v32 }
 0x392   :  { %v2365_v14 = vadd.f32 %v2364_v4, %v7174_v29  ;;  %2816 = vmatpush1.bf16.msra.mxu1 %v7339_v63  ;;  %5880 = vmatpush3.bf16.msra.mxu0 %v6298_v35  ;;  %v6301_v29 = vld [vmem:[#allocation12 + $0x38] ss:$12 sps:$4 sm:$0xff]  }
 0x393   :  { %2817 = vmatprep.subr.bf16.mxu1 %v7343_v25  ;;  %5881 = vmatprep.subr.bf16.mxu0 %v7984_v38  ;;  %v7992_v4 = vld [vmem:[#allocation28_spill] sm:$0xff] }
 0x394   :  { %6474 = vtanh.f32 %v2365_v14 }
 0x395   :  { %v6473_v26 = vpop.eup %6472 }
 0x396   :  { %2818 = vmatpush1.bf16.msra.mxu1 %v7347_v55  ;;  %5882 = vmatpush3.bf16.msra.mxu0 %v6299_v8  ;;  %v2367_v21 = vsub.f32 1.0, %v6473_v26  ;;  %v2369_v7 = vmul.f32 %v6473_v26, %v7385_v46 }
 0x397   :  { %2819 = vmatprep.subr.bf16.mxu1 %v7351_v34  ;;  %5883 = vmatprep.subr.bf16.mxu0 %v7984_v38 }
 0x39a   :  { %2820 = vmatpush1.bf16.msra.mxu1 %v7354_v42  ;;  %5884 = vmatpush3.bf16.msra.mxu0 %v6300_v11 }
 0x39b   :  { %2821 = vmatprep.subr.bf16.mxu1 %v7358_v13  ;;  %5885 = vmatprep.subr.bf16.mxu0 %v7984_v38 }
 0x39e   :  { %2822 = vmatpush1.bf16.msra.mxu1 %v7361_v39  ;;  %5886 = vmatpush3.bf16.msra.mxu0 %v6301_v29 }
 0x39f   :  { %2823 = vmatprep.subr.bf16.mxu1 %v7365_v28  ;;  %5887 = vmatprep.subr.bf16.mxu0 %v7984_v38 }
 0x3a1   :  { %v6475_v50 = vpop.eup %6474 }
 0x3a2   :  { %2824 = vmatpush1.bf16.msra.mxu1 %v7368_v47  ;;  %5888 = vmatpush3.bf16.msra.mxu0 %v6302_v41  ;;  %v2368_v23 = vmul.f32 %v6475_v50, %v2367_v21 }
 0x3a3   :  { %2825 = vmatprep.subr.bf16.mxu1 %v7372_v44  ;;  %5889 = vmatprep.subr.bf16.mxu0 %v7984_v38 }
 0x3a4   :  { %v2370_v59 = vadd.f32 %v2369_v7, %v2368_v23 }
 0x3a6   :  { %2826 = vmatpush1.bf16.msra.mxu1 %v7375_v1  ;;  %5890 = vmatpush3.bf16.msra.mxu0 %v6303_v40  ;;  %v7473_v48 = vsel %vm2104_vm6, %v2370_v59, %v7385_v46  ;;  %v2372_v57 = vsel %vm2104_vm6, %v2370_v59, 0.0 }
 0x3a7   :  { %2376 = vst [vmem:[#allocation14 + $0x28] sm:$0xff] %v2372_v57  ;;  %v2650_v12 = vpack.c.bf16 %v7473_v48, %v7473_v48  ;;  %3083 = vmatprep.subr.bf16.mxu1 %v7243_v6  ;;  %5895 = vmatprep.subr.bf16.mxu0 %v7984_v38  ;;  %v7988_v6 = vld [vmem:[#allocation54_spill] sm:$0xff]  ;;  %v7993_v57 = vld [vmem:[#allocation33_spill] sm:$0xff] }
 0x3a9   :  { %2844 = vmatmul.mubr.bf16.vlgmr.msra.gmra.mxu1 %v2650_v12  ;;  %5892 = vmatmul.mubr.bf16.vlgmr.msra.gmra.mxu0 %v2650_v12 }
 0x3aa   :  { %3084 = vmatpush1.bf16.msra.mxu1 %v7245_v2  ;;  %3115 = vmatprep.mubr.bf16.mxu1 %v7985_v52  ;;  %v7989_v2 = vld [vmem:[#allocation55_spill] sm:$0xff] }
 0x3ab   :  { %3085 = vmatprep.subr.bf16.mxu1 %v7249_v17  ;;  %5911 = vmatprep.mubr.msk.bf16.mxu0 %vm6780_vm0, %v7984_v38  ;;  %v6304_v17 = vld [vmem:[#allocation11 + $0xb0] ss:$12 sps:$4 sm:$0xff]  }
 0x3ac   :  { %5896 = vmatpush3.bf16.msra.mxu0 %v6304_v17 }
 0x3ad   :  { %5897 = vmatprep.subr.bf16.mxu0 %v7984_v38 }
 0x3ae   :  { %3086 = vmatpush1.bf16.msra.mxu1 %v7252_v30  ;;  %v6305_v30 = vld [vmem:[#allocation11 + $0x98] ss:$12 sps:$4 sm:$0xff]  }
 0x3af   :  { %3087 = vmatprep.subr.bf16.mxu1 %v7256_v0  ;;  %v6306_v0 = vld [vmem:[#allocation11 + $0x80] ss:$12 sps:$4 sm:$0xff]  }
 0x3b0   :  { %5898 = vmatpush3.bf16.msra.mxu0 %v6305_v30 }
 0x3b1   :  { %5899 = vmatprep.subr.bf16.mxu0 %v7984_v38 }
 0x3b2   :  { %3088 = vmatpush1.bf16.msra.mxu1 %v7259_v22  ;;  %v6307_v22 = vld [vmem:[#allocation11 + $0x68] ss:$12 sps:$4 sm:$0xff]  }
 0x3b3   :  { %3089 = vmatprep.subr.bf16.mxu1 %v7263_v43  ;;  %v6308_v43 = vld [vmem:[#allocation11 + $0x50] ss:$12 sps:$4 sm:$0xff]  }
 0x3b4   :  { %5900 = vmatpush3.bf16.msra.mxu0 %v6306_v0 }
 0x3b5   :  { %5901 = vmatprep.subr.bf16.mxu0 %v7984_v38 }
 0x3b6   :  { %3090 = vmatpush1.bf16.msra.mxu1 %v7266_v61  ;;  %v6309_v61 = vld [vmem:[#allocation11 + $0x38] ss:$12 sps:$4 sm:$0xff]  }
 0x3b7   :  { %3091 = vmatprep.subr.bf16.mxu1 %v7270_v45  ;;  %v6310_v45 = vld [vmem:[#allocation11 + $0x20] ss:$12 sps:$4 sm:$0xff]  }
 0x3b8   :  { %5902 = vmatpush3.bf16.msra.mxu0 %v6307_v22 }
 0x3b9   :  { %5903 = vmatprep.subr.bf16.mxu0 %v7984_v38 }
 0x3ba   :  { %3092 = vmatpush1.bf16.msra.mxu1 %v7273_v3  ;;  %v6311_v3 = vld [vmem:[#allocation11 + $0x8] ss:$12 sps:$4 sm:$0xff]  }
 0x3bb   :  { %3093 = vmatprep.subr.bf16.mxu1 %v7277_v10 }
 0x3bc   :  { %5904 = vmatpush3.bf16.msra.mxu0 %v6308_v43 }
 0x3bd   :  { %5905 = vmatprep.subr.bf16.mxu0 %v7984_v38 }
 0x3be   :  { %3094 = vmatpush1.bf16.msra.mxu1 %v7280_v16 }
 0x3bf   :  { %3095 = vmatprep.subr.bf16.mxu1 %v7284_v20  ;;  %v7990_v20 = vld [vmem:[#allocation42_spill] sm:$0xff] }
 0x3c0   :  { %5906 = vmatpush3.bf16.msra.mxu0 %v6309_v61 }
 0x3c1   :  { %5907 = vmatprep.subr.bf16.mxu0 %v7984_v38 }
 0x3c2   :  { %3096 = vmatpush1.bf16.msra.mxu1 %v7287_v54 }
 0x3c3   :  { %3097 = vmatprep.subr.bf16.mxu1 %v7291_v60 }
 0x3c4   :  { %5908 = vmatpush3.bf16.msra.mxu0 %v6310_v45  ;;  %v7994_v45 = vld [vmem:[#allocation27_spill] sm:$0xff] }
 0x3c5   :  { %5909 = vmatprep.subr.bf16.mxu0 %v7984_v38 }
 0x3c6   :  { %3098 = vmatpush1.bf16.msra.mxu1 %v7988_v6 }
 0x3c7   :  { %3351 = vmatprep.subr.bf16.mxu1 %v7989_v2 }
 0x3c8   :  { %5910 = vmatpush3.bf16.msra.mxu0 %v6311_v3 }
 0x3c9   :  { %5915 = vmatprep.subr.bf16.mxu0 %v7984_v38 }
 0x449   :  { %v2576_v10 = vpop.f32.mrf.mxu1  ;;  %v2617_v16 = vpop.f32.mrf.mxu0 }
 0x44a   :  { %v2577_v54 = vadd.f32 %v2576_v10, %v7990_v20  ;;  %v2618_v59 = vadd.f32 %v2617_v16, %v7186_v58  ;;  %v7995_v10 = vld [vmem:[#allocation52_spill] sm:$0xff] }
 0x44b   :  { %v2578_v60 = vpop.f32.mrf.mxu1  ;;  %v5873_v46 = vpop.f32.mrf.mxu0 }
 0x44c   :  { %v2623_v62 = vadd.f32 %v2577_v54, %v7991_v49  ;;  %v2579_v32 = vadd.f32 %v2578_v60, %v7138_v51 }
 0x44d   :  { %v2580_v33 = vpop.f32.mrf.mxu1  ;;  %v2620_v27 = vpop.f32.mrf.mxu0 }
 0x44e   :  { %v5355_v15 = vmul.f32 -1.442695, %v2623_v62  ;;  %v2630_v14 = vadd.f32 %v2579_v32, %v7992_v4  ;;  %v7519_v32 = vld [vmem:[#allocation6] sm:$0xff]  ;;  %v6312_v4 = vld [vmem:[#allocation12 + $0xb0] ss:$12 sps:$4 sm:$0xff]  }
 0x44f   :  { %v2581_v35 = vpop.f32.mrf.mxu1  ;;  %v5874_v31 = vpop.f32.mrf.mxu0  ;;  %vm2377_vm7 = vcmp.gt.s32.totalorder %v7519_v32, 3  ;;  %vm2646_vm8 = vcmp.gt.s32.totalorder %v7519_v32, 4  ;;  %v6384_v32 = vld [vmem:[#allocation11 + $0xb0] ss:$12 sps:$4 sm:$0xff]  }
 0x450   :  { %6476 = vpow2.f32 %v5355_v15  ;;  %v5356_v8 = vmul.f32 -1.442695, %v2630_v14 }
 0x452   :  { %6478 = vpow2.f32 %v5356_v8 }
 0x45d   :  { %v6477_v11 = vpop.eup %6476 }
 0x45e   :  { %v2627_v29 = vadd.f32 1.0, %v6477_v11  ;;  %v6313_v11 = vld [vmem:[#allocation12 + $0x98] ss:$12 sps:$4 sm:$0xff]  }
 0x45f   :  { %v6479_v26 = vpop.eup %6478 }
 0x460   :  { %6480 = vrcp.f32 %v2627_v29  ;;  %v2634_v50 = vadd.f32 1.0, %v6479_v26  ;;  %v6314_v26 = vld [vmem:[#allocation12 + $0x80] ss:$12 sps:$4 sm:$0xff]  }
 0x462   :  { %6482 = vrcp.f32 %v2634_v50 }
 0x469   :  { %v2845_v41 = vpop.f32.mrf.mxu1  ;;  %v2886_v21 = vpop.f32.mrf.mxu0 }
 0x46a   :  { %v2846_v40 = vadd.f32 %v2845_v41, %v7189_v5 }
 0x46b   :  { %v2847_v23 = vpop.f32.mrf.mxu1  ;;  %v5893_v7 = vpop.f32.mrf.mxu0 }
 0x46c   :  { %v2892_v12 = vadd.f32 %v2846_v40, %v7993_v57  ;;  %v2848_v22 = vadd.f32 %v2847_v23, %v7194_v19  ;;  %v6315_v40 = vld [vmem:[#allocation12 + $0x68] ss:$12 sps:$4 sm:$0xff]   ;;  %v6323_v23 = vld [vmem:[#allocation11 + $0xb0] ss:$12 sps:$4 sm:$0xff]  }
 0x46d   :  { %v6481_v6 = vpop.eup %6480  ;;  %v2849_v2 = vpop.f32.mrf.mxu1  ;;  %v7584_v7 = vld [vmem:[#allocation11 + $0x90] ss:$12 sps:$4 sm:$0xff]  }
 0x46e   :  { %v2889_v17 = vpop.f32.mrf.mxu0  ;;  %v2637_v30 = vmul.f32 %v6481_v6, %v2618_v59  ;;  %v5381_v0 = vmul.f32 -1.442695, %v2892_v12  ;;  %v2899_v54 = vadd.f32 %v2848_v22, %v7995_v10  ;;  %v6327_v59 = vld [vmem:[#allocation11 + $0x98] ss:$12 sps:$4 sm:$0xff]   ;;  %v7588_v57 = vld [vmem:[#allocation11 + $0x7c] ss:$12 sps:$4 sm:$0xff]  }
 0x46f   :  { %v2850_v43 = vpop.f32.mrf.mxu1  ;;  %v6483_v16 = vpop.eup %6482  ;;  %v7591_v12 = vld [vmem:[#allocation11 + $0x78] ss:$12 sps:$4 sm:$0xff]   ;;  %v6331_v6 = vld [vmem:[#allocation11 + $0x80] ss:$12 sps:$4 sm:$0xff]   ;;  %v7605_v22 = vld [vmem:[#allocation11 + $0x48] ss:$12 sps:$4 sm:$0xff]  }
 0x470   :  { %v5894_v61 = vpop.f32.mrf.mxu0  ;;  %v2638_v3 = vadd.f32 %v2637_v30, %v7994_v45  ;;  %6484 = vpow2.f32 %v5381_v0  ;;  %v5382_v60 = vmul.f32 -1.442695, %v2899_v54  ;;  %v2640_v62 = vsub.f32 1.0, %v6483_v16  ;;  %v7595_v2 = vld [vmem:[#allocation11 + $0x64] ss:$12 sps:$4 sm:$0xff]  }
 0x471   :  { %v2642_v15 = vmul.f32 %v6483_v16, %v7435_v24  ;;  %v7598_v17 = vld [vmem:[#allocation11 + $0x60] ss:$12 sps:$4 sm:$0xff]   ;;  %v6335_v30 = vld [vmem:[#allocation11 + $0x68] ss:$12 sps:$4 sm:$0xff]   ;;  %v6339_v43 = vld [vmem:[#allocation11 + $0x50] ss:$12 sps:$4 sm:$0xff]  }
 0x472   :  { %6486 = vtanh.f32 %v2638_v3  ;;  %v7602_v0 = vld [vmem:[#allocation11 + $0x4c] ss:$12 sps:$4 sm:$0xff]   ;;  %v7609_v61 = vld [vmem:[#allocation11 + $0x34] ss:$12 sps:$4 sm:$0xff]   ;;  %v7612_v45 = vld [vmem:[#allocation11 + $0x30] ss:$12 sps:$4 sm:$0xff]  }
 0x473   :  { %6488 = vpow2.f32 %v5382_v60  ;;  %v6343_v3 = vld [vmem:[#allocation11 + $0x38] ss:$12 sps:$4 sm:$0xff]   ;;  %v7616_v10 = vld [vmem:[#allocation11 + $0x1c] ss:$12 sps:$4 sm:$0xff]   ;;  %v6347_v60 = vld [vmem:[#allocation11 + $0x20] ss:$12 sps:$4 sm:$0xff]  }
 0x474   :  { %v7619_v54 = vld [vmem:[#allocation11 + $0x18] ss:$12 sps:$4 sm:$0xff]  }
 0x475   :  { %v7623_v16 = vld [vmem:[#allocation11 + $0x4] ss:$12 sps:$4 sm:$0xff]  }
 0x47d   :  { %v6485_v46 = vpop.eup %6484 }
 0x47e   :  { %v2896_v49 = vadd.f32 1.0, %v6485_v46  ;;  %v7626_v46 = vld [vmem:[#allocation11] ss:$12 sps:$4 sm:$0xff]  }
 0x47f   :  { %v6487_v33 = vpop.eup %6486 }
 0x480   :  { %6490 = vrcp.f32 %v2896_v49  ;;  %v2641_v27 = vmul.f32 %v6487_v33, %v2640_v62  ;;  %v6489_v8 = vpop.eup %6488  ;;  %v6351_v49 = vld [vmem:[#allocation11 + $0x8] ss:$12 sps:$4 sm:$0xff]   ;;  %v7630_v62 = vld [vmem:[#allocation12 + $0xac] ss:$12 sps:$4 sm:$0xff]  }
 0x481   :  { %v2903_v29 = vadd.f32 1.0, %v6489_v8  ;;  %v7997_v8 = vld [vmem:[#allocation30_spill] sm:$0xff] }
 0x482   :  { %v7522_v35 = vadd.f32 %v2642_v15, %v2641_v27 }
 0x483   :  { %6492 = vrcp.f32 %v2903_v29 }
 0x484   :  { %v7528_v31 = vsel %vm2377_vm7, %v7522_v35, %v7435_v24  ;;  %v2887_v24 = vadd.f32 %v2886_v21, %v7215_v36 }
 0x485   :  { %v2922_v14 = vpack.c.bf16 %v7528_v31, %v7528_v31 }
 0x487   :  { %3116 = vmatmul.mubr.bf16.vlgmr.msra.gmra.mxu1 %v2922_v14  ;;  %5912 = vmatmul.mubr.bf16.vlgmr.msra.gmra.mxu0 %v2922_v14 }
 0x488   :  { %3352 = vmatpush1.bf16.msra.mxu1 %v7321_v53  ;;  %5916 = vmatpush3.bf16.msra.mxu0 %v6312_v4 }
 0x489   :  { %3353 = vmatprep.subr.bf16.mxu1 %v7325_v18  ;;  %5917 = vmatprep.subr.bf16.mxu0 %v7984_v38  ;;  %v7996_v18 = vld [vmem:[#allocation53_spill] sm:$0xff] }
 0x48a   :  { %3383 = vmatprep.mubr.bf16.mxu1 %v7985_v52  ;;  %5931 = vmatprep.mubr.msk.bf16.mxu0 %vm6780_vm0, %v7984_v38 }
 0x48c   :  { %3354 = vmatpush1.bf16.msra.mxu1 %v7328_v56  ;;  %5918 = vmatpush3.bf16.msra.mxu0 %v6313_v11  ;;  %v6316_v56 = vld [vmem:[#allocation12 + $0x50] ss:$12 sps:$4 sm:$0xff]  }
 0x48d   :  { %v6491_v41 = vpop.eup %6490  ;;  %3355 = vmatprep.subr.bf16.mxu1 %v7332_v37  ;;  %5919 = vmatprep.subr.bf16.mxu0 %v7984_v38  ;;  %v6317_v37 = vld [vmem:[#allocation12 + $0x38] ss:$12 sps:$4 sm:$0xff]  }
 0x48e   :  { %v2906_v53 = vmul.f32 %v6491_v41, %v2887_v24 }
 0x490   :  { %v2907_v50 = vadd.f32 %v2906_v53, %v7996_v18  ;;  %3356 = vmatpush1.bf16.msra.mxu1 %v7339_v63  ;;  %5920 = vmatpush3.bf16.msra.mxu0 %v6314_v26  ;;  %v6493_v63 = vpop.eup %6492 }
 0x491   :  { %3357 = vmatprep.subr.bf16.mxu1 %v7343_v25  ;;  %5921 = vmatprep.subr.bf16.mxu0 %v7984_v38  ;;  %v6318_v25 = vld [vmem:[#allocation12 + $0x20] ss:$12 sps:$4 sm:$0xff]  }
 0x492   :  { %6494 = vtanh.f32 %v2907_v50  ;;  %v7998_v50 = vld [vmem:[#allocation32_spill] sm:$0xff] }
 0x494   :  { %3358 = vmatpush1.bf16.msra.mxu1 %v7347_v55  ;;  %5922 = vmatpush3.bf16.msra.mxu0 %v6315_v40  ;;  %v2909_v55 = vsub.f32 1.0, %v6493_v63 }
 0x495   :  { %3359 = vmatprep.subr.bf16.mxu1 %v7351_v34  ;;  %5923 = vmatprep.subr.bf16.mxu0 %v7984_v38 }
 0x498   :  { %3360 = vmatpush1.bf16.msra.mxu1 %v7354_v42  ;;  %5924 = vmatpush3.bf16.msra.mxu0 %v6316_v56  ;;  %v6319_v42 = vld [vmem:[#allocation12 + $0x8] ss:$12 sps:$4 sm:$0xff]  }
 0x499   :  { %3361 = vmatprep.subr.bf16.mxu1 %v7358_v13  ;;  %5925 = vmatprep.subr.bf16.mxu0 %v7984_v38  ;;  %v2911_v13 = vmul.f32 %v6493_v63, %v7473_v48 }
 0x49c   :  { %3362 = vmatpush1.bf16.msra.mxu1 %v7361_v39  ;;  %5926 = vmatpush3.bf16.msra.mxu0 %v6317_v37 }
 0x49d   :  { %3363 = vmatprep.subr.bf16.mxu1 %v7365_v28  ;;  %5927 = vmatprep.subr.bf16.mxu0 %v7984_v38 }
 0x49f   :  { %v6495_v34 = vpop.eup %6494 }
 0x4a0   :  { %3364 = vmatpush1.bf16.msra.mxu1 %v7368_v47  ;;  %5928 = vmatpush3.bf16.msra.mxu0 %v6318_v25  ;;  %v2910_v21 = vmul.f32 %v6495_v34, %v2909_v55 }
 0x4a1   :  { %3365 = vmatprep.subr.bf16.mxu1 %v7372_v44  ;;  %5929 = vmatprep.subr.bf16.mxu0 %v7984_v38  ;;  %v7575_v44 = vld [vmem:[#allocation11 + $0xac] ss:$12 sps:$4 sm:$0xff]  }
 0x4a2   :  { %v7560_v39 = vadd.f32 %v2911_v13, %v2910_v21 }
 0x4a4   :  { %3366 = vmatpush1.bf16.msra.mxu1 %v7375_v1  ;;  %5930 = vmatpush3.bf16.msra.mxu0 %v6319_v42  ;;  %v7567_v28 = vsel %vm2646_vm8, %v7560_v39, %v7473_v48  ;;  %v7577_v1 = vld [vmem:[#allocation11 + $0xa8] ss:$12 sps:$4 sm:$0xff]  }
 0x4a5   :  { %v3190_v47 = vpack.c.bf16 %v7567_v28, %v7567_v28  ;;  %5935 = vmatprep.subr.bf16.mxu0 %v7984_v38  ;;  %3625 = vmatprep.subr.bf16.mxu1 %v7575_v44  ;;  %v7581_v48 = vld [vmem:[#allocation11 + $0x94] ss:$12 sps:$4 sm:$0xff]  }
 0x4a7   :  { %3384 = vmatmul.mubr.bf16.vlgmr.msra.gmra.mxu1 %v3190_v47  ;;  %5932 = vmatmul.mubr.bf16.vlgmr.msra.gmra.mxu0 %v3190_v47 }
 0x4a8   :  { %3657 = vmatprep.mubr.bf16.mxu1 %v7985_v52  ;;  %5951 = vmatprep.mubr.msk.bf16.mxu0 %vm6780_vm0, %v7984_v38 }
 0x4a9   :  { %3626 = vmatpush1.bf16.msra.mxu1 %v7577_v1  ;;  %5936 = vmatpush3.bf16.msra.mxu0 %v6323_v23 }
 0x4aa   :  { %5937 = vmatprep.subr.bf16.mxu0 %v7984_v38  ;;  %3627 = vmatprep.subr.bf16.mxu1 %v7581_v48 }
 0x4ad   :  { %3628 = vmatpush1.bf16.msra.mxu1 %v7584_v7  ;;  %5938 = vmatpush3.bf16.msra.mxu0 %v6327_v59  ;;  %v7999_v59 = vld [vmem:[#allocation29_spill] sm:$0xff] }
 0x4ae   :  { %5939 = vmatprep.subr.bf16.mxu0 %v7984_v38  ;;  %3629 = vmatprep.subr.bf16.mxu1 %v7588_v57 }
 0x4b1   :  { %3630 = vmatpush1.bf16.msra.mxu1 %v7591_v12  ;;  %5940 = vmatpush3.bf16.msra.mxu0 %v6331_v6 }
 0x4b2   :  { %5941 = vmatprep.subr.bf16.mxu0 %v7984_v38  ;;  %3631 = vmatprep.subr.bf16.mxu1 %v7595_v2 }
 0x4b5   :  { %3632 = vmatpush1.bf16.msra.mxu1 %v7598_v17  ;;  %5942 = vmatpush3.bf16.msra.mxu0 %v6335_v30 }
 0x4b6   :  { %5943 = vmatprep.subr.bf16.mxu0 %v7984_v38  ;;  %3633 = vmatprep.subr.bf16.mxu1 %v7602_v0 }
 0x4b9   :  { %3634 = vmatpush1.bf16.msra.mxu1 %v7605_v22  ;;  %5944 = vmatpush3.bf16.msra.mxu0 %v6339_v43 }
 0x4ba   :  { %5945 = vmatprep.subr.bf16.mxu0 %v7984_v38  ;;  %3635 = vmatprep.subr.bf16.mxu1 %v7609_v61 }
 0x4bd   :  { %3636 = vmatpush1.bf16.msra.mxu1 %v7612_v45  ;;  %5946 = vmatpush3.bf16.msra.mxu0 %v6343_v3 }
 0x4be   :  { %5947 = vmatprep.subr.bf16.mxu0 %v7984_v38  ;;  %3637 = vmatprep.subr.bf16.mxu1 %v7616_v10 }
 0x4c1   :  { %3638 = vmatpush1.bf16.msra.mxu1 %v7619_v54  ;;  %5948 = vmatpush3.bf16.msra.mxu0 %v6347_v60 }
 0x4c2   :  { %5949 = vmatprep.subr.bf16.mxu0 %v7984_v38  ;;  %3639 = vmatprep.subr.bf16.mxu1 %v7623_v16 }
 0x4c5   :  { %3640 = vmatpush1.bf16.msra.mxu1 %v7626_v46  ;;  %5950 = vmatpush3.bf16.msra.mxu0 %v6351_v49 }
 0x4c6   :  { %5955 = vmatprep.subr.bf16.mxu0 %v7984_v38  ;;  %3893 = vmatprep.subr.bf16.mxu1 %v7630_v62 }
 0x547   :  { %v3117_v33 = vpop.f32.mrf.mxu1  ;;  %v3158_v27 = vpop.f32.mrf.mxu0 }
 0x548   :  { %v3118_v15 = vadd.f32 %v3117_v33, %v7990_v20  ;;  %v3159_v23 = vadd.f32 %v3158_v27, %v7186_v58 }
 0x549   :  { %v3119_v4 = vpop.f32.mrf.mxu1  ;;  %v5913_v14 = vpop.f32.mrf.mxu0 }
 0x54a   :  { %v3164_v11 = vadd.f32 %v3118_v15, %v7997_v8  ;;  %v3120_v41 = vadd.f32 %v3119_v4, %v7138_v51  ;;  %v8000_v14 = vld [vmem:[#allocation31_spill] sm:$0xff] }
 0x54b   :  { %v3121_v29 = vpop.f32.mrf.mxu1  ;;  %v3161_v24 = vpop.f32.mrf.mxu0 }
 0x54c   :  { %v5407_v26 = vmul.f32 -1.442695, %v3164_v11  ;;  %v3171_v40 = vadd.f32 %v3120_v41, %v7998_v50  ;;  %v8001_v11 = vld [vmem:[#allocation50_spill] sm:$0xff] }
 0x54d   :  { %v3122_v53 = vpop.f32.mrf.mxu1  ;;  %v5914_v18 = vpop.f32.mrf.mxu0 }
 0x54e   :  { %6496 = vpow2.f32 %v5407_v26  ;;  %v5408_v56 = vmul.f32 -1.442695, %v3171_v40 }
 0x550   :  { %6498 = vpow2.f32 %v5408_v56 }
 0x55b   :  { %v6497_v37 = vpop.eup %6496 }
 0x55c   :  { %v3168_v63 = vadd.f32 1.0, %v6497_v37  ;;  %v2914_v37 = vsel %vm2646_vm8, %v7560_v39, 0.0  ;;  %v6359_v39 = vld [vmem:[#allocation12 + $0x98] ss:$12 sps:$4 sm:$0xff]  }
 0x55d   :  { %v6499_v25 = vpop.eup %6498 }
 0x55e   :  { %6500 = vrcp.f32 %v3168_v63  ;;  %v3175_v42 = vadd.f32 1.0, %v6499_v25 }
 0x560   :  { %6502 = vrcp.f32 %v3175_v42  ;;  %v6355_v42 = vld [vmem:[#allocation12 + $0xb0] ss:$12 sps:$4 sm:$0xff]  }
 0x567   :  { %v3385_v55 = vpop.f32.mrf.mxu1  ;;  %v3426_v34 = vpop.f32.mrf.mxu0 }
 0x568   :  { %v3386_v21 = vadd.f32 %v3385_v55, %v7189_v5  ;;  %v7655_v55 = vld [vmem:[#allocation12 + $0xa8] ss:$12 sps:$4 sm:$0xff]  }
 0x569   :  { %v3387_v13 = vpop.f32.mrf.mxu1  ;;  %v5933_v47 = vpop.f32.mrf.mxu0 }
 0x56a   :  { %v3432_v6 = vadd.f32 %v3386_v21, %v7999_v59  ;;  %v3388_v33 = vadd.f32 %v3387_v13, %v7194_v19  ;;  %v7659_v47 = vld [vmem:[#allocation12 + $0x94] ss:$12 sps:$4 sm:$0xff]   ;;  %v7666_v59 = vld [vmem:[#allocation12 + $0x7c] ss:$12 sps:$4 sm:$0xff]  }
 0x56b   :  { %v6501_v30 = vpop.eup %6500  ;;  %v3389_v43 = vpop.f32.mrf.mxu1 }
 0x56c   :  { %v3429_v3 = vpop.f32.mrf.mxu0  ;;  %v3178_v60 = vmul.f32 %v6501_v30, %v3159_v23  ;;  %v5433_v49 = vmul.f32 -1.442695, %v3432_v6  ;;  %v3439_v29 = vadd.f32 %v3388_v33, %v8001_v11  ;;  %v3427_v30 = vadd.f32 %v3426_v34, %v7215_v36  ;;  %v7673_v43 = vld [vmem:[#allocation12 + $0x78] ss:$12 sps:$4 sm:$0xff]   ;;  %v7681_v34 = vld [vmem:[#allocation12 + $0x60] ss:$12 sps:$4 sm:$0xff]  }
 0x56d   :  { %v3390_v15 = vpop.f32.mrf.mxu1  ;;  %v6503_v27 = vpop.eup %6502  ;;  %v6363_v3 = vld [vmem:[#allocation12 + $0x80] ss:$12 sps:$4 sm:$0xff]   ;;  %v7688_v11 = vld [vmem:[#allocation12 + $0x48] ss:$12 sps:$4 sm:$0xff]  }
 0x56e   :  { %v5934_v4 = vpop.f32.mrf.mxu0  ;;  %v3179_v8 = vadd.f32 %v3178_v60, %v8000_v14  ;;  %6504 = vpow2.f32 %v5433_v49  ;;  %v5434_v24 = vmul.f32 -1.442695, %v3439_v29  ;;  %v3181_v53 = vsub.f32 1.0, %v6503_v27  ;;  %v7677_v49 = vld [vmem:[#allocation12 + $0x64] ss:$12 sps:$4 sm:$0xff]  }
 0x56f   :  { %v3183_v40 = vmul.f32 %v6503_v27, %v7528_v31  ;;  %v8002_v15 = vld [vmem:[#allocation51_spill] sm:$0xff] }
 0x570   :  { %6506 = vtanh.f32 %v3179_v8  ;;  %v6367_v14 = vld [vmem:[#allocation12 + $0x68] ss:$12 sps:$4 sm:$0xff]   ;;  %v7685_v8 = vld [vmem:[#allocation12 + $0x4c] ss:$12 sps:$4 sm:$0xff]   ;;  %v6371_v29 = vld [vmem:[#allocation12 + $0x50] ss:$12 sps:$4 sm:$0xff]  }
 0x571   :  { %6508 = vpow2.f32 %v5434_v24  ;;  %v7692_v24 = vld [vmem:[#allocation12 + $0x34] ss:$12 sps:$4 sm:$0xff]   ;;  %v7695_v27 = vld [vmem:[#allocation12 + $0x30] ss:$12 sps:$4 sm:$0xff]  }
 0x57b   :  { %v6505_v26 = vpop.eup %6504 }
 0x57c   :  { %v3436_v41 = vadd.f32 1.0, %v6505_v26  ;;  %v6375_v26 = vld [vmem:[#allocation12 + $0x38] ss:$12 sps:$4 sm:$0xff]  }
 0x57d   :  { %v6507_v18 = vpop.eup %6506 }
 0x57e   :  { %6510 = vrcp.f32 %v3436_v41  ;;  %v3182_v50 = vmul.f32 %v6507_v18, %v3181_v53  ;;  %v6509_v23 = vpop.eup %6508  ;;  %v7699_v41 = vld [vmem:[#allocation12 + $0x1c] ss:$12 sps:$4 sm:$0xff]   ;;  %v7702_v18 = vld [vmem:[#allocation12 + $0x18] ss:$12 sps:$4 sm:$0xff]  }
 0x57f   :  { %v3443_v6 = vadd.f32 1.0, %v6509_v23 }
 0x580   :  { %v3184_v56 = vadd.f32 %v3183_v40, %v3182_v50  ;;  %v6379_v50 = vld [vmem:[#allocation12 + $0x20] ss:$12 sps:$4 sm:$0xff]   ;;  %v7706_v40 = vld [vmem:[#allocation12 + $0x4] ss:$12 sps:$4 sm:$0xff]  }
 0x581   :  { %6512 = vrcp.f32 %v3443_v6 }
 0x582   :  { %v7651_v63 = vsel %vm2646_vm8, %v3184_v56, %v7528_v31  ;;  %v3186_v25 = vsel %vm2646_vm8, %v3184_v56, 0.0  ;;  %v7662_v31 = vld [vmem:[#allocation12 + $0x90] ss:$12 sps:$4 sm:$0xff]  }
 0x583   :  { %v3456_v21 = vadd.f32 %v3186_v25, %v2914_v37  ;;  %v3464_v13 = vpack.c.bf16 %v7651_v63, %v7651_v63  ;;  %v7709_v25 = vld [vmem:[#allocation12] ss:$12 sps:$4 sm:$0xff]  }
 0x585   :  { %3457 = vst [vmem:[#allocation14 + $0x20] sm:$0xff] %v3456_v21  ;;  %3658 = vmatmul.mubr.bf16.vlgmr.msra.gmra.mxu1 %v3464_v13  ;;  %5952 = vmatmul.mubr.bf16.vlgmr.msra.gmra.mxu0 %v3464_v13 }
 0x586   :  { %3894 = vmatpush1.bf16.msra.mxu1 %v7655_v55  ;;  %5956 = vmatpush3.bf16.msra.mxu0 %v6355_v42  ;;  %v6383_v42 = vld [vmem:[#allocation12 + $0x8] ss:$12 sps:$4 sm:$0xff]  }
 0x587   :  { %3895 = vmatprep.subr.bf16.mxu1 %v7659_v47  ;;  %5957 = vmatprep.subr.bf16.mxu0 %v7984_v38 }
 0x588   :  { %3925 = vmatprep.mubr.bf16.mxu1 %v7985_v52  ;;  %5971 = vmatprep.mubr.msk.bf16.mxu0 %vm6780_vm0, %v7984_v38 }
 0x58a   :  { %3896 = vmatpush1.bf16.msra.mxu1 %v7662_v31  ;;  %5958 = vmatpush3.bf16.msra.mxu0 %v6359_v39  ;;  %v2645_v39 = vsel %vm2377_vm7, %v7522_v35, 0.0  ;;  %v6385_v35 = vld [vmem:[#allocation11 + $0x98] ss:$12 sps:$4 sm:$0xff]  }
 0x58b   :  { %v6511_v60 = vpop.eup %6510  ;;  %3897 = vmatprep.subr.bf16.mxu1 %v7666_v59  ;;  %5959 = vmatprep.subr.bf16.mxu0 %v7984_v38 }
 0x58c   :  { %v3446_v33 = vmul.f32 %v6511_v60, %v3427_v30 }
 0x58e   :  { %v3447_v4 = vadd.f32 %v3446_v33, %v8002_v15  ;;  %3898 = vmatpush1.bf16.msra.mxu1 %v7673_v43  ;;  %5960 = vmatpush3.bf16.msra.mxu0 %v6363_v3  ;;  %v6513_v53 = vpop.eup %6512  ;;  %v6387_v33 = vld [vmem:[#allocation11 + $0x68] ss:$12 sps:$4 sm:$0xff]   ;;  %v6388_v15 = vld [vmem:[#allocation11 + $0x50] ss:$12 sps:$4 sm:$0xff]  }
 0x58f   :  { %3899 = vmatprep.subr.bf16.mxu1 %v7677_v49  ;;  %5961 = vmatprep.subr.bf16.mxu0 %v7984_v38  ;;  %v3449_v56 = vsub.f32 1.0, %v6513_v53  ;;  %v3451_v13 = vmul.f32 %v6513_v53, %v7567_v28 }
 0x590   :  { %6514 = vtanh.f32 %v3447_v4  ;;  %v6389_v4 = vld [vmem:[#allocation11 + $0x38] ss:$12 sps:$4 sm:$0xff]  }
 0x592   :  { %3900 = vmatpush1.bf16.msra.mxu1 %v7681_v34  ;;  %5962 = vmatpush3.bf16.msra.mxu0 %v6367_v14  ;;  %v6390_v14 = vld [vmem:[#allocation11 + $0x20] ss:$12 sps:$4 sm:$0xff]  }
 0x593   :  { %3901 = vmatprep.subr.bf16.mxu1 %v7685_v8  ;;  %5963 = vmatprep.subr.bf16.mxu0 %v7984_v38 }
 0x596   :  { %3902 = vmatpush1.bf16.msra.mxu1 %v7688_v11  ;;  %5964 = vmatpush3.bf16.msra.mxu0 %v6371_v29  ;;  %v6391_v29 = vld [vmem:[#allocation11 + $0x8] ss:$12 sps:$4 sm:$0xff]  }
 0x597   :  { %3903 = vmatprep.subr.bf16.mxu1 %v7692_v24  ;;  %5965 = vmatprep.subr.bf16.mxu0 %v7984_v38 }
 0x59a   :  { %3904 = vmatpush1.bf16.msra.mxu1 %v7695_v27  ;;  %5966 = vmatpush3.bf16.msra.mxu0 %v6375_v26 }
 0x59b   :  { %3905 = vmatprep.subr.bf16.mxu1 %v7699_v41  ;;  %5967 = vmatprep.subr.bf16.mxu0 %v7984_v38 }
 0x59d   :  { %v6515_v37 = vpop.eup %6514 }
 0x59e   :  { %3906 = vmatpush1.bf16.msra.mxu1 %v7702_v18  ;;  %5968 = vmatpush3.bf16.msra.mxu0 %v6379_v50  ;;  %v3450_v21 = vmul.f32 %v6515_v37, %v3449_v56 }
 0x59f   :  { %3907 = vmatprep.subr.bf16.mxu1 %v7706_v40  ;;  %5969 = vmatprep.subr.bf16.mxu0 %v7984_v38 }
 0x5a0   :  { %v3452_v23 = vadd.f32 %v3451_v13, %v3450_v21 }
 0x5a2   :  { %3908 = vmatpush1.bf16.msra.mxu1 %v7709_v25  ;;  %5970 = vmatpush3.bf16.msra.mxu0 %v6383_v42  ;;  %v7721_v6 = vsel %vm2377_vm7, %v3452_v23, %v7567_v28  ;;  %v3454_v30 = vsel %vm2377_vm7, %v3452_v23, 0.0  ;;  %v6386_v28 = vld [vmem:[#allocation11 + $0x80] ss:$12 sps:$4 sm:$0xff]  }
 0x5a3   :  { %v3459_v3 = vadd.f32 %v3454_v30, %v2645_v39  ;;  %v3732_v60 = vpack.c.bf16 %v7721_v6, %v7721_v6  ;;  %4167 = vmatprep.subr.bf16.mxu1 %v7575_v44  ;;  %5975 = vmatprep.subr.bf16.mxu0 %v7984_v38  ;;  %v8003_v42 = vld [vmem:[#allocation34_spill] sm:$0xff] }
 0x5a5   :  { %3460 = vst [vmem:[#allocation14 + $0x18] sm:$0xff] %v3459_v3  ;;  %3926 = vmatmul.mubr.bf16.vlgmr.msra.gmra.mxu1 %v3732_v60  ;;  %5972 = vmatmul.mubr.bf16.vlgmr.msra.gmra.mxu0 %v3732_v60 }
 0x5a6   :  { %4168 = vmatpush1.bf16.msra.mxu1 %v7577_v1  ;;  %4199 = vmatprep.mubr.bf16.mxu1 %v7985_v52 }
 0x5a7   :  { %4169 = vmatprep.subr.bf16.mxu1 %v7581_v48  ;;  %5991 = vmatprep.mubr.msk.bf16.mxu0 %vm6780_vm0, %v7984_v38 }
 0x5a8   :  { %5976 = vmatpush3.bf16.msra.mxu0 %v6384_v32  ;;  %v8004_v32 = vld [vmem:[#allocation36_spill] sm:$0xff] }
 0x5a9   :  { %5977 = vmatprep.subr.bf16.mxu0 %v7984_v38 }
 0x5aa   :  { %4170 = vmatpush1.bf16.msra.mxu1 %v7584_v7 }
 0x5ab   :  { %4171 = vmatprep.subr.bf16.mxu1 %v7588_v57 }
 0x5ac   :  { %5978 = vmatpush3.bf16.msra.mxu0 %v6385_v35 }
 0x5ad   :  { %5979 = vmatprep.subr.bf16.mxu0 %v7984_v38 }
 0x5ae   :  { %4172 = vmatpush1.bf16.msra.mxu1 %v7591_v12 }
 0x5af   :  { %4173 = vmatprep.subr.bf16.mxu1 %v7595_v2 }
 0x5b0   :  { %5980 = vmatpush3.bf16.msra.mxu0 %v6386_v28 }
 0x5b1   :  { %5981 = vmatprep.subr.bf16.mxu0 %v7984_v38 }
 0x5b2   :  { %4174 = vmatpush1.bf16.msra.mxu1 %v7598_v17 }
 0x5b3   :  { %4175 = vmatprep.subr.bf16.mxu1 %v7602_v0 }
 0x5b4   :  { %5982 = vmatpush3.bf16.msra.mxu0 %v6387_v33 }
 0x5b5   :  { %5983 = vmatprep.subr.bf16.mxu0 %v7984_v38 }
 0x5b6   :  { %4176 = vmatpush1.bf16.msra.mxu1 %v7605_v22 }
 0x5b7   :  { %4177 = vmatprep.subr.bf16.mxu1 %v7609_v61 }
 0x5b8   :  { %5984 = vmatpush3.bf16.msra.mxu0 %v6388_v15 }
 0x5b9   :  { %5985 = vmatprep.subr.bf16.mxu0 %v7984_v38 }
 0x5ba   :  { %4178 = vmatpush1.bf16.msra.mxu1 %v7612_v45 }
 0x5bb   :  { %4179 = vmatprep.subr.bf16.mxu1 %v7616_v10 }
 0x5bc   :  { %5986 = vmatpush3.bf16.msra.mxu0 %v6389_v4 }
 0x5bd   :  { %5987 = vmatprep.subr.bf16.mxu0 %v7984_v38 }
 0x5be   :  { %4180 = vmatpush1.bf16.msra.mxu1 %v7619_v54 }
 0x5bf   :  { %4181 = vmatprep.subr.bf16.mxu1 %v7623_v16 }
 0x5c0   :  { %5988 = vmatpush3.bf16.msra.mxu0 %v6390_v14 }
 0x5c1   :  { %5989 = vmatprep.subr.bf16.mxu0 %v7984_v38 }
 0x5c2   :  { %4182 = vmatpush1.bf16.msra.mxu1 %v7626_v46 }
 0x5c3   :  { %4435 = vmatprep.subr.bf16.mxu1 %v7630_v62 }
 0x5c4   :  { %5990 = vmatpush3.bf16.msra.mxu0 %v6391_v29 }
 0x5c5   :  { %5995 = vmatprep.subr.bf16.mxu0 %v7984_v38 }
 0x645   :  { %v3659_v26 = vpop.f32.mrf.mxu1  ;;  %v3700_v53 = vpop.f32.mrf.mxu0 }
 0x646   :  { %v3660_v50 = vadd.f32 %v3659_v26, %v7990_v20 }
 0x647   :  { %v3661_v56 = vpop.f32.mrf.mxu1  ;;  %v5953_v37 = vpop.f32.mrf.mxu0 }
 0x648   :  { %v3706_v21 = vadd.f32 %v3660_v50, %v8003_v42  ;;  %v3662_v30 = vadd.f32 %v3661_v56, %v7138_v51  ;;  %v3701_v56 = vadd.f32 %v3700_v53, %v7186_v58 }
 0x649   :  { %v3663_v13 = vpop.f32.mrf.mxu1  ;;  %v3703_v23 = vpop.f32.mrf.mxu0 }
 0x64a   :  { %v5459_v39 = vmul.f32 -1.442695, %v3706_v21  ;;  %v3713_v35 = vadd.f32 %v3662_v30, %v8004_v32  ;;  %v8005_v21 = vld [vmem:[#allocation25_spill] sm:$0xff] }
 0x64b   :  { %v3664_v3 = vpop.f32.mrf.mxu1  ;;  %v5954_v60 = vpop.f32.mrf.mxu0 }
 0x64c   :  { %6516 = vpow2.f32 %v5459_v39  ;;  %v5460_v28 = vmul.f32 -1.442695, %v3713_v35 }
 0x64e   :  { %6518 = vpow2.f32 %v5460_v28 }
 0x659   :  { %v6517_v33 = vpop.eup %6516 }
 0x65a   :  { %v3710_v15 = vadd.f32 1.0, %v6517_v33  ;;  %v8006_v33 = vld [vmem:[#allocation35_spill] sm:$0xff] }
 0x65b   :  { %v6519_v4 = vpop.eup %6518 }
 0x65c   :  { %6520 = vrcp.f32 %v3710_v15  ;;  %v3717_v26 = vadd.f32 1.0, %v6519_v4  ;;  %v8007_v4 = vld [vmem:[#allocation48_spill] sm:$0xff] }
 0x65e   :  { %6522 = vrcp.f32 %v3717_v26 }
 0x665   :  { %v3927_v14 = vpop.f32.mrf.mxu1  ;;  %v3968_v29 = vpop.f32.mrf.mxu0 }
 0x666   :  { %v3928_v50 = vadd.f32 %v3927_v14, %v7189_v5 }
 0x667   :  { %v3929_v37 = vpop.f32.mrf.mxu1  ;;  %v5973_v42 = vpop.f32.mrf.mxu0 }
 0x668   :  { %v3974_v13 = vadd.f32 %v3928_v50, %v8005_v21  ;;  %v3930_v32 = vadd.f32 %v3929_v37, %v7194_v19 }
 0x669   :  { %v6521_v23 = vpop.eup %6520  ;;  %v3931_v39 = vpop.f32.mrf.mxu1 }
 0x66a   :  { %v3971_v30 = vpop.f32.mrf.mxu0  ;;  %v3720_v3 = vmul.f32 %v6521_v23, %v3701_v56  ;;  %v5485_v60 = vmul.f32 -1.442695, %v3974_v13  ;;  %v3981_v14 = vadd.f32 %v3930_v32, %v8007_v4  ;;  %v6394_v4 = vld [vmem:[#allocation12 + $0x80] ss:$12 sps:$4 sm:$0xff]  }
 0x66b   :  { %v3932_v35 = vpop.f32.mrf.mxu1  ;;  %v6523_v53 = vpop.eup %6522 }
 0x66c   :  { %v5974_v28 = vpop.f32.mrf.mxu0  ;;  %v3721_v15 = vadd.f32 %v3720_v3, %v8006_v33  ;;  %6524 = vpow2.f32 %v5485_v60  ;;  %v5486_v42 = vmul.f32 -1.442695, %v3981_v14  ;;  %v3723_v39 = vsub.f32 1.0, %v6523_v53  ;;  %v3997_v3 = vld [vmem:[#allocation14 + $0x28] sm:$0xff]  ;;  %v6392_v60 = vld [vmem:[#allocation12 + $0xb0] ss:$12 sps:$4 sm:$0xff]  }
 0x66d   :  { %v3725_v56 = vmul.f32 %v6523_v53, %v7651_v63  ;;  %v6393_v33 = vld [vmem:[#allocation12 + $0x98] ss:$12 sps:$4 sm:$0xff]  }
 0x66e   :  { %6526 = vtanh.f32 %v3721_v15  ;;  %v3969_v15 = vadd.f32 %v3968_v29, %v7215_v36  ;;  %v8008_v53 = vld [vmem:[#allocation49_spill] sm:$0xff]  ;;  %v6396_v29 = vld [vmem:[#allocation12 + $0x50] ss:$12 sps:$4 sm:$0xff]  }
 0x66f   :  { %6528 = vpow2.f32 %v5486_v42 }
 0x679   :  { %v6525_v50 = vpop.eup %6524 }
 0x67a   :  { %v3978_v21 = vadd.f32 1.0, %v6525_v50 }
 0x67b   :  { %v6527_v30 = vpop.eup %6526 }
 0x67c   :  { %6530 = vrcp.f32 %v3978_v21  ;;  %v3724_v26 = vmul.f32 %v6527_v30, %v3723_v39  ;;  %v6529_v28 = vpop.eup %6528  ;;  %v6395_v21 = vld [vmem:[#allocation12 + $0x68] ss:$12 sps:$4 sm:$0xff]   ;;  %v6397_v39 = vld [vmem:[#allocation12 + $0x38] ss:$12 sps:$4 sm:$0xff]  }
 0x67e   :  { %v3726_v37 = vadd.f32 %v3725_v56, %v3724_v26  ;;  %v6398_v26 = vld [vmem:[#allocation12 + $0x20] ss:$12 sps:$4 sm:$0xff]  }
 0x680   :  { %v7770_v13 = vsel %vm2104_vm6, %v3726_v37, %v7651_v63  ;;  %v3728_v23 = vsel %vm2104_vm6, %v3726_v37, 0.0  ;;  %v3985_v63 = vadd.f32 1.0, %v6529_v28 }
 0x681   :  { %v3998_v32 = vadd.f32 %v3997_v3, %v3728_v23  ;;  %v4006_v35 = vpack.c.bf16 %v7770_v13, %v7770_v13  ;;  %v6399_v23 = vld [vmem:[#allocation12 + $0x8] ss:$12 sps:$4 sm:$0xff]  }
 0x682   :  { %6532 = vrcp.f32 %v3985_v63 }
 0x683   :  { %3999 = vst [vmem:[#allocation14 + $0x28] sm:$0xff] %v3998_v32  ;;  %4200 = vmatmul.mubr.bf16.vlgmr.msra.gmra.mxu1 %v4006_v35  ;;  %5992 = vmatmul.mubr.bf16.vlgmr.msra.gmra.mxu0 %v4006_v35 }
 0x684   :  { %4436 = vmatpush1.bf16.msra.mxu1 %v7655_v55  ;;  %5996 = vmatpush3.bf16.msra.mxu0 %v6392_v60 }
 0x685   :  { %4437 = vmatprep.subr.bf16.mxu1 %v7659_v47  ;;  %5997 = vmatprep.subr.bf16.mxu0 %v7984_v38 }
 0x686   :  { %4467 = vmatprep.mubr.bf16.mxu1 %v7985_v52  ;;  %6011 = vmatprep.mubr.msk.bf16.mxu0 %vm6780_vm0, %v7984_v38 }
 0x688   :  { %4438 = vmatpush1.bf16.msra.mxu1 %v7662_v31  ;;  %5998 = vmatpush3.bf16.msra.mxu0 %v6393_v33  ;;  %v4000_v33 = vld [vmem:[#allocation14 + $0x10] sm:$0xff] }
 0x689   :  { %v6531_v14 = vpop.eup %6530  ;;  %4439 = vmatprep.subr.bf16.mxu1 %v7666_v59  ;;  %5999 = vmatprep.subr.bf16.mxu0 %v7984_v38 }
 0x68a   :  { %v3988_v42 = vmul.f32 %v6531_v14, %v3969_v15 }
 0x68c   :  { %v3989_v50 = vadd.f32 %v3988_v42, %v8008_v53  ;;  %4440 = vmatpush1.bf16.msra.mxu1 %v7673_v43  ;;  %6000 = vmatpush3.bf16.msra.mxu0 %v6394_v4  ;;  %v8010_v53 = vld [vmem:[#allocation39_spill] sm:$0xff] }
 0x68d   :  { %4441 = vmatprep.subr.bf16.mxu1 %v7677_v49  ;;  %6001 = vmatprep.subr.bf16.mxu0 %v7984_v38 }
 0x68e   :  { %6534 = vtanh.f32 %v3989_v50 }
 0x68f   :  { %v6533_v30 = vpop.eup %6532 }
 0x690   :  { %4442 = vmatpush1.bf16.msra.mxu1 %v7681_v34  ;;  %6002 = vmatpush3.bf16.msra.mxu0 %v6395_v21  ;;  %v3991_v56 = vsub.f32 1.0, %v6533_v30  ;;  %v3993_v60 = vmul.f32 %v6533_v30, %v7721_v6 }
 0x691   :  { %4443 = vmatprep.subr.bf16.mxu1 %v7685_v8  ;;  %6003 = vmatprep.subr.bf16.mxu0 %v7984_v38 }
 0x694   :  { %4444 = vmatpush1.bf16.msra.mxu1 %v7688_v11  ;;  %6004 = vmatpush3.bf16.msra.mxu0 %v6396_v29 }
 0x695   :  { %4445 = vmatprep.subr.bf16.mxu1 %v7692_v24  ;;  %6005 = vmatprep.subr.bf16.mxu0 %v7984_v38 }
 0x698   :  { %4446 = vmatpush1.bf16.msra.mxu1 %v7695_v27  ;;  %6006 = vmatpush3.bf16.msra.mxu0 %v6397_v39 }
 0x699   :  { %4447 = vmatprep.subr.bf16.mxu1 %v7699_v41  ;;  %6007 = vmatprep.subr.bf16.mxu0 %v7984_v38 }
 0x69b   :  { %v6535_v37 = vpop.eup %6534 }
 0x69c   :  { %4448 = vmatpush1.bf16.msra.mxu1 %v7702_v18  ;;  %6008 = vmatpush3.bf16.msra.mxu0 %v6398_v26  ;;  %v3992_v3 = vmul.f32 %v6535_v37, %v3991_v56 }
 0x69d   :  { %4449 = vmatprep.subr.bf16.mxu1 %v7706_v40  ;;  %6009 = vmatprep.subr.bf16.mxu0 %v7984_v38 }
 0x69e   :  { %v3994_v32 = vadd.f32 %v3993_v60, %v3992_v3 }
 0x6a0   :  { %4450 = vmatpush1.bf16.msra.mxu1 %v7709_v25  ;;  %6010 = vmatpush3.bf16.msra.mxu0 %v6399_v23  ;;  %v7807_v35 = vsel %vm1835_vm5, %v3994_v32, %v7721_v6  ;;  %v3996_v28 = vsel %vm1835_vm5, %v3994_v32, 0.0 }
 0x6a1   :  { %v4001_v63 = vadd.f32 %v4000_v33, %v3996_v28  ;;  %v4274_v15 = vpack.c.bf16 %v7807_v35, %v7807_v35  ;;  %4709 = vmatprep.subr.bf16.mxu1 %v7575_v44  ;;  %6015 = vmatprep.subr.bf16.mxu0 %v7984_v38  ;;  %v6400_v44 = vld [vmem:[#allocation11 + $0xb0] ss:$12 sps:$4 sm:$0xff]  }
 0x6a2   :  { %v8011_v28 = vld [vmem:[#allocation24_spill] sm:$0xff] }
 0x6a3   :  { %4002 = vst [vmem:[#allocation14 + $0x10] sm:$0xff] %v4001_v63  ;;  %4468 = vmatmul.mubr.bf16.vlgmr.msra.gmra.mxu1 %v4274_v15  ;;  %6012 = vmatmul.mubr.bf16.vlgmr.msra.gmra.mxu0 %v4274_v15 }
 0x6a4   :  { %4710 = vmatpush1.bf16.msra.mxu1 %v7577_v1  ;;  %4741 = vmatprep.mubr.bf16.mxu1 %v7985_v52  ;;  %v6401_v1 = vld [vmem:[#allocation11 + $0x98] ss:$12 sps:$4 sm:$0xff]  }
 0x6a5   :  { %4711 = vmatprep.subr.bf16.mxu1 %v7581_v48  ;;  %6031 = vmatprep.mubr.msk.bf16.mxu0 %vm6780_vm0, %v7984_v38  ;;  %v6402_v48 = vld [vmem:[#allocation11 + $0x80] ss:$12 sps:$4 sm:$0xff]  }
 0x6a6   :  { %6016 = vmatpush3.bf16.msra.mxu0 %v6400_v44 }
 0x6a7   :  { %6017 = vmatprep.subr.bf16.mxu0 %v7984_v38 }
 0x6a8   :  { %4712 = vmatpush1.bf16.msra.mxu1 %v7584_v7  ;;  %v6403_v7 = vld [vmem:[#allocation11 + $0x68] ss:$12 sps:$4 sm:$0xff]  }
 0x6a9   :  { %4713 = vmatprep.subr.bf16.mxu1 %v7588_v57  ;;  %v6404_v57 = vld [vmem:[#allocation11 + $0x50] ss:$12 sps:$4 sm:$0xff]  }
 0x6aa   :  { %6018 = vmatpush3.bf16.msra.mxu0 %v6401_v1 }
 0x6ab   :  { %6019 = vmatprep.subr.bf16.mxu0 %v7984_v38 }
 0x6ac   :  { %4714 = vmatpush1.bf16.msra.mxu1 %v7591_v12  ;;  %v6405_v12 = vld [vmem:[#allocation11 + $0x38] ss:$12 sps:$4 sm:$0xff]  }
 0x6ad   :  { %4715 = vmatprep.subr.bf16.mxu1 %v7595_v2  ;;  %v6406_v2 = vld [vmem:[#allocation11 + $0x20] ss:$12 sps:$4 sm:$0xff]  }
 0x6ae   :  { %6020 = vmatpush3.bf16.msra.mxu0 %v6402_v48 }
 0x6af   :  { %6021 = vmatprep.subr.bf16.mxu0 %v7984_v38 }
 0x6b0   :  { %4716 = vmatpush1.bf16.msra.mxu1 %v7598_v17  ;;  %v6407_v17 = vld [vmem:[#allocation11 + $0x8] ss:$12 sps:$4 sm:$0xff]  }
 0x6b1   :  { %4717 = vmatprep.subr.bf16.mxu1 %v7602_v0 }
 0x6b2   :  { %6022 = vmatpush3.bf16.msra.mxu0 %v6403_v7 }
 0x6b3   :  { %6023 = vmatprep.subr.bf16.mxu0 %v7984_v38 }
 0x6b4   :  { %4718 = vmatpush1.bf16.msra.mxu1 %v7605_v22 }
 0x6b5   :  { %4719 = vmatprep.subr.bf16.mxu1 %v7609_v61 }
 0x6b6   :  { %6024 = vmatpush3.bf16.msra.mxu0 %v6404_v57 }
 0x6b7   :  { %6025 = vmatprep.subr.bf16.mxu0 %v7984_v38 }
 0x6b8   :  { %4720 = vmatpush1.bf16.msra.mxu1 %v7612_v45 }
 0x6b9   :  { %4721 = vmatprep.subr.bf16.mxu1 %v7616_v10 }
 0x6ba   :  { %6026 = vmatpush3.bf16.msra.mxu0 %v6405_v12 }
 0x6bb   :  { %6027 = vmatprep.subr.bf16.mxu0 %v7984_v38 }
 0x6bc   :  { %4722 = vmatpush1.bf16.msra.mxu1 %v7619_v54  ;;  %v8009_v54 = vld [vmem:[#allocation37_spill] sm:$0xff] }
 0x6bd   :  { %4723 = vmatprep.subr.bf16.mxu1 %v7623_v16 }
 0x6be   :  { %6028 = vmatpush3.bf16.msra.mxu0 %v6406_v2  ;;  %v8012_v2 = vld [vmem:[#allocation38_spill] sm:$0xff] }
 0x6bf   :  { %6029 = vmatprep.subr.bf16.mxu0 %v7984_v38 }
 0x6c0   :  { %4724 = vmatpush1.bf16.msra.mxu1 %v7626_v46 }
 0x6c1   :  { %4977 = vmatprep.subr.bf16.mxu1 %v7630_v62 }
 0x6c2   :  { %6030 = vmatpush3.bf16.msra.mxu0 %v6407_v17 }
 0x6c3   :  { %6035 = vmatprep.subr.bf16.mxu0 %v7984_v38 }
 0x743   :  { %v4201_v0 = vpop.f32.mrf.mxu1  ;;  %v4242_v22 = vpop.f32.mrf.mxu0 }
 0x744   :  { %v4202_v61 = vadd.f32 %v4201_v0, %v7990_v20  ;;  %v4243_v32 = vadd.f32 %v4242_v22, %v7186_v58  ;;  %v8013_v0 = vld [vmem:[#allocation46_spill] sm:$0xff] }
 0x745   :  { %v4203_v45 = vpop.f32.mrf.mxu1  ;;  %v5993_v10 = vpop.f32.mrf.mxu0 }
 0x746   :  { %v4248_v16 = vadd.f32 %v4202_v61, %v8009_v54  ;;  %v4204_v4 = vadd.f32 %v4203_v45, %v7138_v51 }
 0x747   :  { %v4205_v46 = vpop.f32.mrf.mxu1  ;;  %v4245_v62 = vpop.f32.mrf.mxu0 }
 0x748   :  { %v5511_v6 = vmul.f32 -1.442695, %v4248_v16  ;;  %v4255_v50 = vadd.f32 %v4204_v4, %v8010_v53  ;;  %v4539_v53 = vld [vmem:[#allocation14 + $0x30] sm:$0xff] }
 0x749   :  { %v4206_v14 = vpop.f32.mrf.mxu1  ;;  %v5994_v42 = vpop.f32.mrf.mxu0 }
 0x74a   :  { %6536 = vpow2.f32 %v5511_v6  ;;  %v5512_v21 = vmul.f32 -1.442695, %v4255_v50  ;;  %v6408_v50 = vld [vmem:[#allocation12 + $0xb0] ss:$12 sps:$4 sm:$0xff]  }
 0x74c   :  { %6538 = vpow2.f32 %v5512_v21 }
 0x757   :  { %v6537_v29 = vpop.eup %6536 }
 0x758   :  { %v4252_v39 = vadd.f32 1.0, %v6537_v29 }
 0x759   :  { %v6539_v30 = vpop.eup %6538 }
 0x75a   :  { %6540 = vrcp.f32 %v4252_v39  ;;  %v4259_v37 = vadd.f32 1.0, %v6539_v30  ;;  %v6409_v30 = vld [vmem:[#allocation12 + $0x98] ss:$12 sps:$4 sm:$0xff]  }
 0x75c   :  { %6542 = vrcp.f32 %v4259_v37  ;;  %v6410_v37 = vld [vmem:[#allocation12 + $0x80] ss:$12 sps:$4 sm:$0xff]  }
 0x763   :  { %v4469_v26 = vpop.f32.mrf.mxu1  ;;  %v4510_v56 = vpop.f32.mrf.mxu0 }
 0x764   :  { %v4470_v23 = vadd.f32 %v4469_v26, %v7189_v5  ;;  %v4511_v26 = vadd.f32 %v4510_v56, %v7215_v36 }
 0x765   :  { %v4471_v3 = vpop.f32.mrf.mxu1  ;;  %v6013_v60 = vpop.f32.mrf.mxu0 }
 0x766   :  { %v4516_v33 = vadd.f32 %v4470_v23, %v8011_v28  ;;  %v4472_v7 = vadd.f32 %v4471_v3, %v7194_v19  ;;  %v4542_v60 = vld [vmem:[#allocation14 + $0x8] sm:$0xff] }
 0x767   :  { %v6541_v63 = vpop.eup %6540  ;;  %v4473_v15 = vpop.f32.mrf.mxu1 }
 0x768   :  { %v4513_v44 = vpop.f32.mrf.mxu0  ;;  %v4262_v1 = vmul.f32 %v6541_v63, %v4243_v32  ;;  %v5537_v48 = vmul.f32 -1.442695, %v4516_v33  ;;  %v4523_v61 = vadd.f32 %v4472_v7, %v8013_v0  ;;  %v8015_v15 = vld [vmem:[#allocation40_spill] sm:$0xff] }
 0x769   :  { %v4474_v57 = vpop.f32.mrf.mxu1  ;;  %v6543_v22 = vpop.eup %6542 }
 0x76a   :  { %v6014_v12 = vpop.f32.mrf.mxu0  ;;  %v4263_v17 = vadd.f32 %v4262_v1, %v8012_v2  ;;  %6544 = vpow2.f32 %v5537_v48  ;;  %v5538_v45 = vmul.f32 -1.442695, %v4523_v61  ;;  %v4265_v16 = vsub.f32 1.0, %v6543_v22  ;;  %v8016_v2 = vld [vmem:[#allocation43_spill] sm:$0xff] }
 0x76b   :  { %v4267_v6 = vmul.f32 %v6543_v22, %v7770_v13 }
 0x76c   :  { %6546 = vtanh.f32 %v4263_v17 }
 0x76d   :  { %6548 = vpow2.f32 %v5538_v45 }
 0x777   :  { %v6545_v10 = vpop.eup %6544 }
 0x778   :  { %v4520_v54 = vadd.f32 1.0, %v6545_v10 }
 0x779   :  { %v6547_v46 = vpop.eup %6546 }
 0x77a   :  { %6550 = vrcp.f32 %v4520_v54  ;;  %v4266_v62 = vmul.f32 %v6547_v46, %v4265_v16  ;;  %v6549_v39 = vpop.eup %6548 }
 0x77c   :  { %v4268_v4 = vadd.f32 %v4267_v6, %v4266_v62  ;;  %v8017_v6 = vld [vmem:[#allocation23_spill] sm:$0xff] }
 0x77e   :  { %v7856_v14 = vsel %vm1562_vm4, %v4268_v4, %v7770_v13  ;;  %v4270_v42 = vsel %vm1562_vm4, %v4268_v4, 0.0  ;;  %v4527_v13 = vadd.f32 1.0, %v6549_v39 }
 0x77f   :  { %v4540_v21 = vadd.f32 %v4539_v53, %v4270_v42  ;;  %v4548_v29 = vpack.c.bf16 %v7856_v14, %v7856_v14 }
 0x780   :  { %6552 = vrcp.f32 %v4527_v13 }
 0x781   :  { %4541 = vst [vmem:[#allocation14 + $0x30] sm:$0xff] %v4540_v21  ;;  %4742 = vmatmul.mubr.bf16.vlgmr.msra.gmra.mxu1 %v4548_v29  ;;  %6032 = vmatmul.mubr.bf16.vlgmr.msra.gmra.mxu0 %v4548_v29 }
 0x782   :  { %4978 = vmatpush1.bf16.msra.mxu1 %v7655_v55  ;;  %6036 = vmatpush3.bf16.msra.mxu0 %v6408_v50 }
 0x783   :  { %4979 = vmatprep.subr.bf16.mxu1 %v7659_v47  ;;  %6037 = vmatprep.subr.bf16.mxu0 %v7984_v38  ;;  %v8014_v47 = vld [vmem:[#allocation47_spill] sm:$0xff] }
 0x784   :  { %5009 = vmatprep.mubr.bf16.mxu1 %v7985_v52  ;;  %6051 = vmatprep.mubr.msk.bf16.mxu0 %vm6780_vm0, %v7984_v38  ;;  %v6411_v52 = vld [vmem:[#allocation12 + $0x68] ss:$12 sps:$4 sm:$0xff]  }
 0x786   :  { %4980 = vmatpush1.bf16.msra.mxu1 %v7662_v31  ;;  %6038 = vmatpush3.bf16.msra.mxu0 %v6409_v30  ;;  %v6412_v31 = vld [vmem:[#allocation12 + $0x50] ss:$12 sps:$4 sm:$0xff]  }
 0x787   :  { %v6551_v23 = vpop.eup %6550  ;;  %4981 = vmatprep.subr.bf16.mxu1 %v7666_v59  ;;  %6039 = vmatprep.subr.bf16.mxu0 %v7984_v38  ;;  %v6413_v59 = vld [vmem:[#allocation12 + $0x38] ss:$12 sps:$4 sm:$0xff]  }
 0x788   :  { %v4530_v55 = vmul.f32 %v6551_v23, %v4511_v26  ;;  %v8018_v26 = vld [vmem:[#allocation41_spill] sm:$0xff] }
 0x78a   :  { %v4531_v3 = vadd.f32 %v4530_v55, %v8014_v47  ;;  %4982 = vmatpush1.bf16.msra.mxu1 %v7673_v43  ;;  %6040 = vmatpush3.bf16.msra.mxu0 %v6410_v37 }
 0x78b   :  { %4983 = vmatprep.subr.bf16.mxu1 %v7677_v49  ;;  %6041 = vmatprep.subr.bf16.mxu0 %v7984_v38  ;;  %v6414_v49 = vld [vmem:[#allocation12 + $0x20] ss:$12 sps:$4 sm:$0xff]  }
 0x78c   :  { %6554 = vtanh.f32 %v4531_v3 }
 0x78d   :  { %v6553_v43 = vpop.eup %6552 }
 0x78e   :  { %4984 = vmatpush1.bf16.msra.mxu1 %v7681_v34  ;;  %6042 = vmatpush3.bf16.msra.mxu0 %v6411_v52  ;;  %v4533_v34 = vsub.f32 1.0, %v6553_v43 }
 0x78f   :  { %4985 = vmatprep.subr.bf16.mxu1 %v7685_v8  ;;  %6043 = vmatprep.subr.bf16.mxu0 %v7984_v38 }
 0x792   :  { %4986 = vmatpush1.bf16.msra.mxu1 %v7688_v11  ;;  %6044 = vmatpush3.bf16.msra.mxu0 %v6412_v31  ;;  %v6415_v11 = vld [vmem:[#allocation12 + $0x8] ss:$12 sps:$4 sm:$0xff]  }
 0x793   :  { %4987 = vmatprep.subr.bf16.mxu1 %v7692_v24  ;;  %6045 = vmatprep.subr.bf16.mxu0 %v7984_v38  ;;  %v4535_v24 = vmul.f32 %v6553_v43, %v7807_v35 }
 0x796   :  { %4988 = vmatpush1.bf16.msra.mxu1 %v7695_v27  ;;  %6046 = vmatpush3.bf16.msra.mxu0 %v6413_v59 }
 0x797   :  { %4989 = vmatprep.subr.bf16.mxu1 %v7699_v41  ;;  %6047 = vmatprep.subr.bf16.mxu0 %v7984_v38 }
 0x799   :  { %v6555_v8 = vpop.eup %6554 }
 0x79a   :  { %4990 = vmatpush1.bf16.msra.mxu1 %v7702_v18  ;;  %6048 = vmatpush3.bf16.msra.mxu0 %v6414_v49  ;;  %v4534_v56 = vmul.f32 %v6555_v8, %v4533_v34  ;;  %v5081_v34 = vld [vmem:[#allocation14 + $0x38] sm:$0xff] }
 0x79b   :  { %4991 = vmatprep.subr.bf16.mxu1 %v7706_v40  ;;  %6049 = vmatprep.subr.bf16.mxu0 %v7984_v38 }
 0x79c   :  { %v4536_v27 = vadd.f32 %v4535_v24, %v4534_v56 }
 0x79e   :  { %4992 = vmatpush1.bf16.msra.mxu1 %v7709_v25  ;;  %6050 = vmatpush3.bf16.msra.mxu0 %v6415_v11  ;;  %v7893_v41 = vsel %vm1293_vm3, %v4536_v27, %v7807_v35  ;;  %v4538_v18 = vsel %vm1293_vm3, %v4536_v27, 0.0 }
 0x79f   :  { %v4543_v32 = vadd.f32 %v4542_v60, %v4538_v18  ;;  %v4816_v28 = vpack.c.bf16 %v7893_v41, %v7893_v41 }
 0x7a1   :  { %4544 = vst [vmem:[#allocation14 + $0x8] sm:$0xff] %v4543_v32  ;;  %5010 = vmatmul.mubr.bf16.vlgmr.msra.gmra.mxu1 %v4816_v28  ;;  %6052 = vmatmul.mubr.bf16.vlgmr.msra.gmra.mxu0 %v4816_v28  ;;  %v8020_v32 = vld [vmem:[#allocation45_spill] sm:$0xff] }
 0x841   :  { %v4743_v38 = vpop.f32.mrf.mxu1  ;;  %v4784_v40 = vpop.f32.mrf.mxu0 }
 0x842   :  { %v4744_v25 = vadd.f32 %v4743_v38, %v7990_v20 }
 0x843   :  { %v4745_v33 = vpop.f32.mrf.mxu1  ;;  %v6033_v63 = vpop.f32.mrf.mxu0 }
 0x844   :  { %v4790_v35 = vadd.f32 %v4744_v25, %v8015_v15  ;;  %v4746_v7 = vadd.f32 %v4745_v33, %v7138_v51  ;;  %v4785_v51 = vadd.f32 %v4784_v40, %v7186_v58  ;;  %v5084_v15 = vld [vmem:[#allocation14] sm:$0xff] }
 0x845   :  { %v4747_v44 = vpop.f32.mrf.mxu1  ;;  %v4787_v1 = vpop.f32.mrf.mxu0 }
 0x846   :  { %v5563_v48 = vmul.f32 -1.442695, %v4790_v35  ;;  %v4797_v17 = vadd.f32 %v4746_v7, %v8016_v2 }
 0x847   :  { %v4748_v57 = vpop.f32.mrf.mxu1  ;;  %v6034_v12 = vpop.f32.mrf.mxu0 }
 0x848   :  { %6556 = vpow2.f32 %v5563_v48  ;;  %v5564_v0 = vmul.f32 -1.442695, %v4797_v17 }
 0x84a   :  { %6558 = vpow2.f32 %v5564_v0 }
 0x855   :  { %v6557_v61 = vpop.eup %6556 }
 0x856   :  { %v4794_v45 = vadd.f32 1.0, %v6557_v61 }
 0x857   :  { %v6559_v20 = vpop.eup %6558 }
 0x858   :  { %6560 = vrcp.f32 %v4794_v45  ;;  %v4801_v54 = vadd.f32 1.0, %v6559_v20 }
 0x85a   :  { %6562 = vrcp.f32 %v4801_v54 }
 0x861   :  { %v5011_v22 = vpop.f32.mrf.mxu1  ;;  %v5052_v10 = vpop.f32.mrf.mxu0 }
 0x862   :  { %v5012_v16 = vadd.f32 %v5011_v22, %v7189_v5  ;;  %v8019_v5 = vld [vmem:[#allocation44_spill] sm:$0xff]  ;;  %v5053_v27 = vadd.f32 %v5052_v10, %v7215_v36 }
 0x863   :  { %v5013_v46 = vpop.f32.mrf.mxu1  ;;  %v6053_v62 = vpop.f32.mrf.mxu0 }
 0x864   :  { %v5058_v4 = vadd.f32 %v5012_v16, %v8017_v6  ;;  %v5014_v39 = vadd.f32 %v5013_v46, %v7194_v19 }
 0x865   :  { %v6561_v42 = vpop.eup %6560  ;;  %v5015_v53 = vpop.f32.mrf.mxu1 }
 0x866   :  { %v5055_v50 = vpop.f32.mrf.mxu0  ;;  %v4804_v21 = vmul.f32 %v6561_v42, %v4785_v51  ;;  %v5589_v29 = vmul.f32 -1.442695, %v5058_v4  ;;  %v5065_v23 = vadd.f32 %v5014_v39, %v8019_v5 }
 0x867   :  { %v5016_v30 = vpop.f32.mrf.mxu1  ;;  %v6563_v58 = vpop.eup %6562 }
 0x868   :  { %v6054_v13 = vpop.f32.mrf.mxu0  ;;  %v4805_v37 = vadd.f32 %v4804_v21, %v8018_v26  ;;  %6564 = vpow2.f32 %v5589_v29  ;;  %v5590_v55 = vmul.f32 -1.442695, %v5065_v23  ;;  %v4807_v3 = vsub.f32 1.0, %v6563_v58 }
 0x869   :  { %v4809_v43 = vmul.f32 %v6563_v58, %v7856_v14 }
 0x86a   :  { %6566 = vtanh.f32 %v4805_v37 }
 0x86b   :  { %6568 = vpow2.f32 %v5590_v55 }
 0x875   :  { %v6565_v47 = vpop.eup %6564 }
 0x876   :  { %v5062_v52 = vadd.f32 1.0, %v6565_v47 }
 0x877   :  { %v6567_v31 = vpop.eup %6566 }
 0x878   :  { %v4808_v59 = vmul.f32 %v6567_v31, %v4807_v3  ;;  %6570 = vrcp.f32 %v5062_v52  ;;  %v6569_v56 = vpop.eup %6568 }
 0x879   :  { %v5069_v24 = vadd.f32 1.0, %v6569_v56 }
 0x87a   :  { %v4810_v19 = vadd.f32 %v4809_v43, %v4808_v59 }
 0x87b   :  { %6572 = vrcp.f32 %v5069_v24 }
 0x87c   :  { %v4812_v49 = vsel %vm1021_vm2, %v4810_v19, 0.0  ;;  %v4811_v8 = vsel %vm1021_vm2, %v4810_v19, %v7856_v14 }
 0x87d   :  { %v5082_v11 = vadd.f32 %v5081_v34, %v4812_v49  ;;  %5087 = vst [vmem:[#allocation15] sm:$0xff] %v4811_v8 }
 0x87f   :  { %5083 = vst [vmem:[#allocation14 + $0x38] sm:$0xff] %v5082_v11 }
 0x885   :  { %v6571_v18 = vpop.eup %6570 }
 0x886   :  { %v5072_v60 = vmul.f32 %v6571_v18, %v5053_v27 }
 0x888   :  { %v5073_v28 = vadd.f32 %v5072_v60, %v8020_v32  ;;  %v6573_v38 = vpop.eup %6572 }
 0x889   :  { %v5075_v40 = vsub.f32 1.0, %v6573_v38  ;;  %v5077_v63 = vmul.f32 %v6573_v38, %v7893_v41 }
 0x88a   :  { %6574 = vtanh.f32 %v5073_v28 }
 0x897   :  { %v6575_v25 = vpop.eup %6574 }
 0x898   :  { %v5076_v33 = vmul.f32 %v6575_v25, %v5075_v40 }
 0x89a   :  { %v5078_v14 = vadd.f32 %v5077_v63, %v5076_v33 }
 0x89c   :  { %v5080_v36 = vsel %vm752_vm1, %v5078_v14, 0.0  ;;  %v5079_v35 = vsel %vm752_vm1, %v5078_v14, %v7893_v41 }
 0x89d   :  { %v5085_v44 = vadd.f32 %v5084_v15, %v5080_v36  ;;  %5089 = vst [vmem:[#allocation15 + $0x8] sm:$0xff] %v5079_v35 }
 0x89e   :  { %6725 = shalt.err (!%p6722_p6)
}
 0x89f   :  { %5113 = dma.vmem_to_hbm [thread:$0]  %s5108_s23, 256, %s7944_s9, [#allocation16], %s6771_s1, %s6771_s1, %s6772_s24   ;;  %5086 = vst [vmem:[#allocation14] sm:$0xff] %v5085_v44 }
 0x8a0   :  { %s6734_s29 = scalar_lea.vmem %s5096_s26, 1024  ;;  %p6739_p8 = scmp.lt.s32.totalorder %s5096_s26, %s5096_s26 }
 0x8a1   :  { %p6735_p7 = scmp.ne.s32.totalorder %s5096_s26, %s6734_s29  ;;  %p6740_p9 = scmp.lt.s32.totalorder %s6734_s29, %s6734_s29 }
 0x8a3   :  { %p6741_p10 = por %p6740_p9, %p6739_p8 }
 0x8a5   :  { %p6742_p11 = pnand %p6741_p10, %p6735_p7 }
 0x8a7   :  { %6745 = shalt.err (!%p6742_p11)
}
 0x8a8   :  { %5101 = dma.vmem_to_hbm [thread:$0]  %s5096_s26, 1024, %s7943_s8, [#allocation5], %s6771_s1, %s6771_s1, %s6772_s24  }
 0x8a9   :  { %6762 = dma.done.wait [#allocation5], 1024  }
 0x8aa   :  { %6763 = vsyncadd [#allocation5], 4294966272 }
 0x8ab   :  { %6764 = dma.done.wait [#allocation16], 256  }
 0x8ac   :  { %6765 = vsyncadd [#allocation16], 4294967040 }
 0x8ad   :  { %5120 = vsyncpa [#allocation4], 1 }
 0x8ae   :  { %5121 = vsyncpa [#allocation7], 1 }
 0x8af   :  { %5122 = vsyncpa [#allocation10], 1 }
 0x8b0   :  { %5123 = vsyncpa [#allocation13], 1 }
 0x8b1   :  { %5124 = vsyncpa [#allocation5], 1 }
 0x8b2   :  { %5125 = vsyncpa [#allocation16], 1 }

</bundles_post_ra>
